<compile_context>
chip_gen: v5e
topology: v5e:2x2
jax: 0.10.0
libtpu: 0.0.40
codegen_flags: <defaults>
</compile_context>

<pallas_src>
import numpy as np
import jax
import jax.numpy as jnp
from jax.experimental import pallas as pl
from jax.experimental.pallas import tpu as pltpu


# -----------------------------------------------------------------------------
# Pallas kernel: both InvertedResiduals + elementwise fusion for Bt images.
# -----------------------------------------------------------------------------
def depthfuse_kernel(x_ref, xd_ref, gate_ref,
                     w1a_ref, b1a_ref, wdw1_ref, bdw1_ref, w1b_ref, b1b_ref,
                     w2a_ref, b2a_ref, wdw2_ref, bdw2_ref, w2b_ref, b2b_ref,
                     o_ref, hpad_ref):
    x = x_ref[...].astype(jnp.float32)          # (Bt, H, W, C) f32 (streamed bf16)
    xd = xd_ref[...].astype(jnp.float32)        # (Bt, H, W, C)
    gate = gate_ref[...]                        # (Bt, 1, 1, C) f32
    Bt, H, W, C = x.shape
    HD = wdw1_ref.shape[1]

    # Zero the 1-px halo border of the depthwise scratch every invocation (scratch is
    # uninitialized and grid steps may be split across cores); the interior is fully
    # overwritten by each InvertedResidual below.
    zrow = jnp.zeros((Bt, 1, W + 2, HD), jnp.float32)
    hpad_ref[:, 0:1, :, :] = zrow
    hpad_ref[:, H + 1:H + 2, :, :] = zrow
    zcol = jnp.zeros((Bt, H + 2, 1, HD), jnp.float32)
    hpad_ref[:, :, 0:1, :] = zcol
    hpad_ref[:, :, W + 1:W + 2, :] = zcol

    # Hoist weight/bias loads (once per tile, not per tap).
    w1a = w1a_ref[...]; b1a = b1a_ref[0]; wdw1 = wdw1_ref[...]; bdw1 = bdw1_ref[0]
    w1b = w1b_ref[...]; b1b = b1b_ref[0]
    w2a = w2a_ref[...]; b2a = b2a_ref[0]; wdw2 = wdw2_ref[...]; bdw2 = bdw2_ref[0]
    w2b = w2b_ref[...]; b2b = b2b_ref[0]

    def inverted_residual(inp, wa, ba, wdw, bdw, wb, bb):
        # InvertedResidual(inp==oup, stride=1, expand_ratio=4, residual=True):
        #   1x1 conv (C->4C)  + BN + ReLU         (MXU, bf16 in / f32 accumulate)
        #   3x3 depthwise conv (pad=1) + BN + ReLU (VPU, f32, zero-halo scratch taps)
        #   1x1 conv (4C->C, bias=False) + BN      (MXU)
        #   + residual                             (f32)
        flat = inp.reshape(Bt * H * W, C)
        h = jnp.dot(flat.astype(wa.dtype), wa,
                    preferred_element_type=jnp.float32) + ba
        h = jnp.maximum(h, 0.0).reshape(Bt, H, W, HD)

        # depthwise 3x3: write the interior once, centre tap from the live value,
        # 8 static slice reads for the off-centre taps.
        hpad_ref[:, 1:H + 1, 1:W + 1, :] = h
        acc = h * wdw[4]
        for ky in range(3):
            for kx in range(3):
                if ky == 1 and kx == 1:
                    continue
                acc = acc + hpad_ref[:, ky:ky + H, kx:kx + W, :] * wdw[ky * 3 + kx]
        h2 = jnp.maximum(acc + bdw, 0.0)

        out = jnp.dot(h2.reshape(Bt * H * W, HD).astype(wb.dtype), wb,
                      preferred_element_type=jnp.float32) + bb
        return inp + out.reshape(Bt, H, W, C)

    # x_f = d_conv1(x * x_d)
    x_f = inverted_residual(x * xd, w1a, b1a, wdw1, bdw1, w1b, b1b)
    # x_f1 = d_conv2(sigmoid(d_linear(mean(x))) * x_f * x_d)   (gate precomputed)
    x_f1 = inverted_residual(gate * x_f * xd, w2a, b2a, wdw2, bdw2, w2b, b2b)
    o_ref[...] = x_f1


# -----------------------------------------------------------------------------
# Wrapper (NCHW in/out, like the PyTorch module)
# -----------------------------------------------------------------------------
def _vmem_limit_bytes():
    try:
        kind = jax.devices()[0].device_kind.lower()
    except Exception:
        kind = ""
    if "v7" in kind:
        return 56 * 1024 * 1024      # 64 MiB/TC physical on v7x -> keep headroom
    if "v6" in kind or "v5" in kind:
        return 100 * 1024 * 1024     # 128 MiB physical on v5e/v6e
    return 64 * 1024 * 1024


def _pick_batch_tile(N, H, W, C, HD, budget_bytes):
    # Per-image VMEM use: double-buffered activation blocks + halo scratch + live f32
    # intermediates (h / acc / h2) of the depthwise path.
    per_img = (2 * (H * W * C * 2) * 2        # x, x_d blocks (bf16, double-buffered)
               + H * W * C * 4 * 2            # out block (f32, double-buffered)
               + (H + 2) * (W + 2) * HD * 4   # zero-halo scratch
               + 3 * H * W * HD * 4)          # h / acc / h2 live values
    for bt in range(N, 0, -1):
        if N % bt == 0 and bt * per_img <= budget_bytes:
            return bt
    return 1


def depthfuse_forward(x_nchw, xd_nchw, params, mm_dtype=jnp.bfloat16,
                      stream_dtype=jnp.bfloat16):
    (w1a, b1a, wdw1, bdw1, w1b, b1b,
     wl1, bl1, wl2, bl2,
     w2a, b2a, wdw2, bdw2, w2b, b2b) = params

    # NCHW -> NHWC at the boundary (C -> lane dim inside the kernel).
    x = jnp.transpose(x_nchw, (0, 2, 3, 1)).astype(jnp.float32)
    xd = jnp.transpose(xd_nchw, (0, 2, 3, 1)).astype(jnp.float32)
    # HBM streaming precision of the activations (they feed the MXU as bf16 anyway
    # and the kernel is HBM-bandwidth-bound); round once so gate + kernel agree.
    x = x.astype(stream_dtype).astype(jnp.float32)
    xd = xd.astype(stream_dtype).astype(jnp.float32)
    N, H, W, C = x.shape
    HD = w1a.shape[1]

    # --- gate MLP hoisted out of the fused kernel (tiny; plain XLA) -------------
    xm = jnp.mean(x, axis=(1, 2))                                    # (N, C)
    g = jnp.maximum(xm @ wl1 + bl1, 0.0) @ wl2 + bl2
    gate = jax.nn.sigmoid(g).reshape(N, 1, 1, C).astype(jnp.float32)

    # Pointwise-conv weights feed the MXU in mm_dtype (bf16); depthwise weights and
    # all biases stay f32 (VPU math).
    weights = [
        w1a.astype(mm_dtype), b1a.astype(jnp.float32),
        wdw1.astype(jnp.float32), bdw1.astype(jnp.float32),
        w1b.astype(mm_dtype), b1b.astype(jnp.float32),
        w2a.astype(mm_dtype), b2a.astype(jnp.float32),
        wdw2.astype(jnp.float32), bdw2.astype(jnp.float32),
        w2b.astype(mm_dtype), b2b.astype(jnp.float32),
    ]

    vmem_limit = _vmem_limit_bytes()
    weight_bytes = sum(int(np.prod(w.shape)) * np.dtype(w.dtype).itemsize
                       for w in weights)
    budget = max(int(0.6 * vmem_limit) - 2 * weight_bytes, 1)
    Bt = _pick_batch_tile(N, H, W, C, HD, budget)

    x_s = x.astype(stream_dtype)
    xd_s = xd.astype(stream_dtype)

    act_spec = pl.BlockSpec((Bt, H, W, C), lambda n: (n, 0, 0, 0))
    gate_spec = pl.BlockSpec((Bt, 1, 1, C), lambda n: (n, 0, 0, 0))

    def _weight_specs(single_buffer):
        specs = []
        for w in weights:
            nd = w.ndim
            idx = (lambda n, _nd=nd: (0,) * _nd)
            if single_buffer:
                # Constant block -> keep a single VMEM-resident copy (no dead 2nd buf).
                specs.append(pl.BlockSpec(w.shape, idx, pipeline_mode=pl.Buffered(1)))
            else:
                specs.append(pl.BlockSpec(w.shape, idx))
        return specs

    def _run(single_buffer_weights):
        return pl.pallas_call(
            depthfuse_kernel,
            out_shape=jax.ShapeDtypeStruct((N, H, W, C), jnp.float32),
            grid=(N // Bt,),
            in_specs=[act_spec, act_spec, gate_spec]
                     + _weight_specs(single_buffer_weights),
            out_specs=act_spec,
            scratch_shapes=[pltpu.VMEM((Bt, H + 2, W + 2, HD), jnp.float32)],
            compiler_params=pltpu.CompilerParams(
                # batch-tile axis is independent -> shards across v7x's 2 TensorCores
                dimension_semantics=("parallel",),
                vmem_limit_bytes=vmem_limit,
            ),
        )(x_s, xd_s, gate, *weights)

    try:
        out = _run(True)
    except Exception:
        # TODO(synk): this jax version rejected pl.Buffered(1); use default buffering.
        out = _run(False)

    return jnp.transpose(out, (0, 3, 1, 2))     # NHWC -> NCHW (PyTorch convention)


# -----------------------------------------------------------------------------
# Deterministic parameter construction (BN folded, eval-mode defaults)
# -----------------------------------------------------------------------------
def init_params(key, C):
    HD = 4 * C
    bn_s = 1.0 / float(np.sqrt(1.0 + 1e-5))   # fold BN: gamma=1, beta=0, mean=0, var=1
    keys = jax.random.split(key, 16)
    sc = 0.1

    def blk(ks):
        w_pw1 = jax.random.normal(ks[0], (C, HD), jnp.float32) * sc
        b_pw1 = jax.random.normal(ks[1], (1, HD), jnp.float32) * sc
        w_dw = jax.random.normal(ks[2], (9, HD), jnp.float32) * sc      # (3*3, HD)
        b_dw = jax.random.normal(ks[3], (1, HD), jnp.float32) * sc
        w_pw2 = jax.random.normal(ks[4], (HD, C), jnp.float32) * sc
        b_pw2 = jnp.zeros((1, C), jnp.float32)                          # bias=False, BN beta=0
        return (w_pw1 * bn_s, b_pw1 * bn_s, w_dw * bn_s, b_dw * bn_s,
                w_pw2 * bn_s, b_pw2)

    p1 = blk(keys[0:5])
    wl1 = jax.random.normal(keys[5], (C, C), jnp.float32) * sc
    bl1 = jax.random.normal(keys[6], (1, C), jnp.float32) * sc
    wl2 = jax.random.normal(keys[7], (C, C), jnp.float32) * sc
    bl2 = jax.random.normal(keys[8], (1, C), jnp.float32) * sc
    p2 = blk(keys[9:14])
    return p1 + (wl1, bl1, wl2, bl2) + p2


# -----------------------------------------------------------------------------
# Pure-JAX reference of the same math (same bf16 streaming / MXU cast points)
# -----------------------------------------------------------------------------
def ref_forward(x_nchw, xd_nchw, params, mm_dtype=jnp.bfloat16,
                stream_dtype=jnp.bfloat16):
    (w1a, b1a, wdw1, bdw1, w1b, b1b,
     wl1, bl1, wl2, bl2,
     w2a, b2a, wdw2, bdw2, w2b, b2b) = params

    x = jnp.transpose(x_nchw, (0, 2, 3, 1)).astype(jnp.float32)
    xd = jnp.transpose(xd_nchw, (0, 2, 3, 1)).astype(jnp.float32)
    # match the kernel's bf16 HBM streaming of the activations
    x = x.astype(stream_dtype).astype(jnp.float32)
    xd = xd.astype(stream_dtype).astype(jnp.float32)

    def inv_res(inp, wa, ba, wdw, bdw, wb, bb):
        N, H, W, C = inp.shape
        HD = wa.shape[1]
        h = jnp.dot(inp.reshape(-1, C).astype(mm_dtype), wa.astype(mm_dtype),
                    preferred_element_type=jnp.float32) + ba
        h = jax.nn.relu(h).reshape(N, H, W, HD)
        hp = jnp.pad(h, ((0, 0), (1, 1), (1, 1), (0, 0)))
        wd = wdw.reshape(3, 3, HD)
        acc = jnp.zeros_like(h)
        for ky in range(3):
            for kx in range(3):
                acc = acc + hp[:, ky:ky + H, kx:kx + W, :] * wd[ky, kx]
        h2 = jax.nn.relu(acc + bdw)
        out = jnp.dot(h2.reshape(-1, HD).astype(mm_dtype), wb.astype(mm_dtype),
                      preferred_element_type=jnp.float32) + bb
        return inp + out.reshape(N, H, W, C)

    x_f = inv_res(x * xd, w1a, b1a, wdw1, bdw1, w1b, b1b)
    xm = x.mean(axis=(1, 2))
    g = jax.nn.relu(xm @ wl1 + bl1) @ wl2 + bl2
    gate = jax.nn.sigmoid(g)[:, None, None, :]
    x_f1 = inv_res(gate * x_f * xd, w2a, b2a, wdw2, bdw2, w2b, b2b)
    return jnp.transpose(x_f1, (0, 3, 1, 2))


if __name__ == "__main__":
    key = jax.random.PRNGKey(0)
    N, C, H, W = 2, 32, 8, 8        # small inchannels=32 (original default was 320)
    kx, kd, kp = jax.random.split(key, 3)
    x = jax.random.normal(kx, (N, C, H, W), jnp.float32)
    x_d = jax.random.uniform(kd, (N, C, H, W), jnp.float32)
    params = init_params(kp, C)

    out = depthfuse_forward(x, x_d, params)
    out = jax.block_until_ready(out)

    ref = ref_forward(x, x_d, params)
    np.testing.assert_allclose(np.asarray(out), np.asarray(ref), rtol=1e-2, atol=1e-2)
    print("KERNEL_OK")
</pallas_src>

<mosaic_0001>
module attributes {stable_mosaic.version = 11 : i64} {
  func.func @depthfuse_kernel(%arg0: i32, %arg1: memref<2x8x8x32xbf16, #tpu.memory_space<vmem>>, %arg2: memref<2x8x8x32xbf16, #tpu.memory_space<vmem>>, %arg3: memref<2x1x1x32xf32, #tpu.memory_space<vmem>>, %arg4: memref<32x128xbf16, #tpu.memory_space<vmem>>, %arg5: memref<1x128xf32, #tpu.memory_space<vmem>>, %arg6: memref<9x128xf32, #tpu.memory_space<vmem>>, %arg7: memref<1x128xf32, #tpu.memory_space<vmem>>, %arg8: memref<128x32xbf16, #tpu.memory_space<vmem>>, %arg9: memref<1x32xf32, #tpu.memory_space<vmem>>, %arg10: memref<32x128xbf16, #tpu.memory_space<vmem>>, %arg11: memref<1x128xf32, #tpu.memory_space<vmem>>, %arg12: memref<9x128xf32, #tpu.memory_space<vmem>>, %arg13: memref<1x128xf32, #tpu.memory_space<vmem>>, %arg14: memref<128x32xbf16, #tpu.memory_space<vmem>>, %arg15: memref<1x32xf32, #tpu.memory_space<vmem>>, %arg16: memref<2x8x8x32xf32, #tpu.memory_space<vmem>>, %arg17: memref<2x10x10x128xf32, #tpu.memory_space<vmem>>) attributes {dimension_semantics = [#tpu.dimension_semantics<parallel>], iteration_bounds = array<i64: 1>, scalar_prefetch = 0 : i64, scratch_operands = 1 : i64, tpu.core_type = #tpu.core_type<tc>, window_params = [{transform_indices = @transform_0, window_bounds = array<i64: 2, 8, 8, 32>}, {transform_indices = @transform_1, window_bounds = array<i64: 2, 8, 8, 32>}, {transform_indices = @transform_2, window_bounds = array<i64: 2, 1, 1, 32>}, {pipeline_mode = #tpu.pipeline_mode<synchronous>, transform_indices = @transform_3, window_bounds = array<i64: 32, 128>}, {pipeline_mode = #tpu.pipeline_mode<synchronous>, transform_indices = @transform_4, window_bounds = array<i64: 1, 128>}, {pipeline_mode = #tpu.pipeline_mode<synchronous>, transform_indices = @transform_5, window_bounds = array<i64: 9, 128>}, {pipeline_mode = #tpu.pipeline_mode<synchronous>, transform_indices = @transform_6, window_bounds = array<i64: 1, 128>}, {pipeline_mode = #tpu.pipeline_mode<synchronous>, transform_indices = @transform_7, window_bounds = array<i64: 128, 32>}, {pipeline_mode = #tpu.pipeline_mode<synchronous>, transform_indices = @transform_8, window_bounds = array<i64: 1, 32>}, {pipeline_mode = #tpu.pipeline_mode<synchronous>, transform_indices = @transform_9, window_bounds = array<i64: 32, 128>}, {pipeline_mode = #tpu.pipeline_mode<synchronous>, transform_indices = @transform_10, window_bounds = array<i64: 1, 128>}, {pipeline_mode = #tpu.pipeline_mode<synchronous>, transform_indices = @transform_11, window_bounds = array<i64: 9, 128>}, {pipeline_mode = #tpu.pipeline_mode<synchronous>, transform_indices = @transform_12, window_bounds = array<i64: 1, 128>}, {pipeline_mode = #tpu.pipeline_mode<synchronous>, transform_indices = @transform_13, window_bounds = array<i64: 128, 32>}, {pipeline_mode = #tpu.pipeline_mode<synchronous>, transform_indices = @transform_14, window_bounds = array<i64: 1, 32>}, {transform_indices = @transform_15, window_bounds = array<i64: 2, 8, 8, 32>}]} {
    %c0 = arith.constant 0 : index
    %c0_0 = arith.constant 0 : index
    %c0_1 = arith.constant 0 : index
    %c0_2 = arith.constant 0 : index
    %0 = vector.load %arg1[%c0, %c0_0, %c0_1, %c0_2] : memref<2x8x8x32xbf16, #tpu.memory_space<vmem>>, vector<2x8x8x32xbf16>
    %1 = arith.extf %0 : vector<2x8x8x32xbf16> to vector<2x8x8x32xf32>
    %c0_3 = arith.constant 0 : index
    %c0_4 = arith.constant 0 : index
    %c0_5 = arith.constant 0 : index
    %c0_6 = arith.constant 0 : index
    %2 = vector.load %arg2[%c0_3, %c0_4, %c0_5, %c0_6] : memref<2x8x8x32xbf16, #tpu.memory_space<vmem>>, vector<2x8x8x32xbf16>
    %3 = arith.extf %2 : vector<2x8x8x32xbf16> to vector<2x8x8x32xf32>
    %c0_7 = arith.constant 0 : index
    %c0_8 = arith.constant 0 : index
    %c0_9 = arith.constant 0 : index
    %c0_10 = arith.constant 0 : index
    %4 = vector.load %arg3[%c0_7, %c0_8, %c0_9, %c0_10] : memref<2x1x1x32xf32, #tpu.memory_space<vmem>>, vector<2x1x1x32xf32>
    %cst = arith.constant 0.000000e+00 : f32
    %5 = vector.broadcast %cst : f32 to vector<2x1x10x128xf32>
    %c0_11 = arith.constant 0 : index
    %c0_12 = arith.constant 0 : index
    %c0_13 = arith.constant 0 : index
    %c0_14 = arith.constant 0 : index
    %6 = vector.load %arg17[%c0_11, %c0_12, %c0_13, %c0_14] : memref<2x10x10x128xf32, #tpu.memory_space<vmem>>, vector<2x1x10x128xf32>
    tpu.vector_store %arg17[%c0_11, %c0_12, %c0_13, %c0_14], %5 {strides = array<i32>} : memref<2x10x10x128xf32, #tpu.memory_space<vmem>>, vector<2x1x10x128xf32>,
    %c0_15 = arith.constant 0 : index
    %c9 = arith.constant 9 : index
    %c0_16 = arith.constant 0 : index
    %c0_17 = arith.constant 0 : index
    %7 = vector.load %arg17[%c0_15, %c9, %c0_16, %c0_17] : memref<2x10x10x128xf32, #tpu.memory_space<vmem>>, vector<2x1x10x128xf32>
    tpu.vector_store %arg17[%c0_15, %c9, %c0_16, %c0_17], %5 {strides = array<i32>} : memref<2x10x10x128xf32, #tpu.memory_space<vmem>>, vector<2x1x10x128xf32>,
    %cst_18 = arith.constant 0.000000e+00 : f32
    %8 = vector.broadcast %cst_18 : f32 to vector<2x10x1x128xf32>
    %c0_19 = arith.constant 0 : index
    %c0_20 = arith.constant 0 : index
    %c0_21 = arith.constant 0 : index
    %c0_22 = arith.constant 0 : index
    %9 = vector.load %arg17[%c0_19, %c0_20, %c0_21, %c0_22] : memref<2x10x10x128xf32, #tpu.memory_space<vmem>>, vector<2x10x1x128xf32>
    tpu.vector_store %arg17[%c0_19, %c0_20, %c0_21, %c0_22], %8 {strides = array<i32>} : memref<2x10x10x128xf32, #tpu.memory_space<vmem>>, vector<2x10x1x128xf32>,
    %c0_23 = arith.constant 0 : index
    %c0_24 = arith.constant 0 : index
    %c9_25 = arith.constant 9 : index
    %c0_26 = arith.constant 0 : index
    %10 = vector.load %arg17[%c0_23, %c0_24, %c9_25, %c0_26] : memref<2x10x10x128xf32, #tpu.memory_space<vmem>>, vector<2x10x1x128xf32>
    tpu.vector_store %arg17[%c0_23, %c0_24, %c9_25, %c0_26], %8 {strides = array<i32>} : memref<2x10x10x128xf32, #tpu.memory_space<vmem>>, vector<2x10x1x128xf32>,
    %c0_27 = arith.constant 0 : index
    %c0_28 = arith.constant 0 : index
    %11 = vector.load %arg4[%c0_27, %c0_28] : memref<32x128xbf16, #tpu.memory_space<vmem>>, vector<32x128xbf16>
    %c0_29 = arith.constant 0 : index
    %c0_30 = arith.constant 0 : index
    %12 = vector.load %arg5[%c0_29, %c0_30] : memref<1x128xf32, #tpu.memory_space<vmem>>, vector<1x128xf32>
    %13 = vector.shape_cast %12 : vector<1x128xf32> to vector<128xf32>
    %c0_31 = arith.constant 0 : index
    %c0_32 = arith.constant 0 : index
    %14 = vector.load %arg6[%c0_31, %c0_32] : memref<9x128xf32, #tpu.memory_space<vmem>>, vector<9x128xf32>
    %c0_33 = arith.constant 0 : index
    %c0_34 = arith.constant 0 : index
    %15 = vector.load %arg7[%c0_33, %c0_34] : memref<1x128xf32, #tpu.memory_space<vmem>>, vector<1x128xf32>
    %16 = vector.shape_cast %15 : vector<1x128xf32> to vector<128xf32>
    %c0_35 = arith.constant 0 : index
    %c0_36 = arith.constant 0 : index
    %17 = vector.load %arg8[%c0_35, %c0_36] : memref<128x32xbf16, #tpu.memory_space<vmem>>, vector<128x32xbf16>
    %c0_37 = arith.constant 0 : index
    %c0_38 = arith.constant 0 : index
    %18 = vector.load %arg9[%c0_37, %c0_38] : memref<1x32xf32, #tpu.memory_space<vmem>>, vector<1x32xf32>
    %19 = vector.shape_cast %18 : vector<1x32xf32> to vector<32xf32>
    %c0_39 = arith.constant 0 : index
    %c0_40 = arith.constant 0 : index
    %20 = vector.load %arg10[%c0_39, %c0_40] : memref<32x128xbf16, #tpu.memory_space<vmem>>, vector<32x128xbf16>
    %c0_41 = arith.constant 0 : index
    %c0_42 = arith.constant 0 : index
    %21 = vector.load %arg11[%c0_41, %c0_42] : memref<1x128xf32, #tpu.memory_space<vmem>>, vector<1x128xf32>
    %22 = vector.shape_cast %21 : vector<1x128xf32> to vector<128xf32>
    %c0_43 = arith.constant 0 : index
    %c0_44 = arith.constant 0 : index
    %23 = vector.load %arg12[%c0_43, %c0_44] : memref<9x128xf32, #tpu.memory_space<vmem>>, vector<9x128xf32>
    %c0_45 = arith.constant 0 : index
    %c0_46 = arith.constant 0 : index
    %24 = vector.load %arg13[%c0_45, %c0_46] : memref<1x128xf32, #tpu.memory_space<vmem>>, vector<1x128xf32>
    %25 = vector.shape_cast %24 : vector<1x128xf32> to vector<128xf32>
    %c0_47 = arith.constant 0 : index
    %c0_48 = arith.constant 0 : index
    %26 = vector.load %arg14[%c0_47, %c0_48] : memref<128x32xbf16, #tpu.memory_space<vmem>>, vector<128x32xbf16>
    %c0_49 = arith.constant 0 : index
    %c0_50 = arith.constant 0 : index
    %27 = vector.load %arg15[%c0_49, %c0_50] : memref<1x32xf32, #tpu.memory_space<vmem>>, vector<1x32xf32>
    %28 = vector.shape_cast %27 : vector<1x32xf32> to vector<32xf32>
    %29 = arith.mulf %1, %3 : vector<2x8x8x32xf32>
    %30 = vector.shape_cast %29 : vector<2x8x8x32xf32> to vector<128x32xf32>
    %31 = arith.truncf %30 : vector<128x32xf32> to vector<128x32xbf16>
    %cst_51 = arith.constant dense<0.000000e+00> : vector<128x128xf32>
    %32 = tpu.matmul %31, %11, %cst_51 {dimension_numbers = #tpu.dot_dimension_numbers<[1], [0], [0], [1], [0, 0, 1, 1], [], []>} : vector<128x32xbf16>, vector<32x128xbf16>, vector<128x128xf32> -> vector<128x128xf32>
    %33 = vector.shape_cast %13 : vector<128xf32> to vector<1x128xf32>
    %34 = vector.broadcast %33 : vector<1x128xf32> to vector<128x128xf32>
    %35 = arith.addf %32, %34 : vector<128x128xf32>
    %cst_52 = arith.constant 0.000000e+00 : f32
    %36 = vector.broadcast %cst_52 : f32 to vector<128x128xf32>
    %37 = arith.maximumf %35, %36 : vector<128x128xf32>
    %38 = vector.shape_cast %37 : vector<128x128xf32> to vector<2x8x8x128xf32>
    %c0_53 = arith.constant 0 : index
    %c1 = arith.constant 1 : index
    %c1_54 = arith.constant 1 : index
    %c0_55 = arith.constant 0 : index
    %39 = vector.load %arg17[%c0_53, %c1, %c1_54, %c0_55] : memref<2x10x10x128xf32, #tpu.memory_space<vmem>>, vector<2x8x8x128xf32>
    tpu.vector_store %arg17[%c0_53, %c1, %c1_54, %c0_55], %38 {strides = array<i32>} : memref<2x10x10x128xf32, #tpu.memory_space<vmem>>, vector<2x8x8x128xf32>,
    %40 = vector.extract_strided_slice %14 {offsets = [4, 0], sizes = [1, 128], strides = [1, 1]} : vector<9x128xf32> to vector<1x128xf32>
    %41 = vector.shape_cast %40 : vector<1x128xf32> to vector<128xf32>
    %42 = vector.shape_cast %41 : vector<128xf32> to vector<1x1x1x128xf32>
    %43 = vector.broadcast %42 : vector<1x1x1x128xf32> to vector<2x8x8x128xf32>
    %44 = arith.mulf %38, %43 : vector<2x8x8x128xf32>
    %c0_56 = arith.constant 0 : index
    %c0_57 = arith.constant 0 : index
    %c0_58 = arith.constant 0 : index
    %c0_59 = arith.constant 0 : index
    %45 = vector.load %arg17[%c0_56, %c0_57, %c0_58, %c0_59] : memref<2x10x10x128xf32, #tpu.memory_space<vmem>>, vector<2x8x8x128xf32>
    %46 = vector.extract_strided_slice %14 {offsets = [0, 0], sizes = [1, 128], strides = [1, 1]} : vector<9x128xf32> to vector<1x128xf32>
    %47 = vector.shape_cast %46 : vector<1x128xf32> to vector<128xf32>
    %48 = vector.shape_cast %47 : vector<128xf32> to vector<1x1x1x128xf32>
    %49 = vector.broadcast %48 : vector<1x1x1x128xf32> to vector<2x8x8x128xf32>
    %50 = arith.mulf %45, %49 : vector<2x8x8x128xf32>
    %51 = arith.addf %44, %50 : vector<2x8x8x128xf32>
    %c0_60 = arith.constant 0 : index
    %c0_61 = arith.constant 0 : index
    %c1_62 = arith.constant 1 : index
    %c0_63 = arith.constant 0 : index
    %52 = vector.load %arg17[%c0_60, %c0_61, %c1_62, %c0_63] : memref<2x10x10x128xf32, #tpu.memory_space<vmem>>, vector<2x8x8x128xf32>
    %53 = vector.extract_strided_slice %14 {offsets = [1, 0], sizes = [1, 128], strides = [1, 1]} : vector<9x128xf32> to vector<1x128xf32>
    %54 = vector.shape_cast %53 : vector<1x128xf32> to vector<128xf32>
    %55 = vector.shape_cast %54 : vector<128xf32> to vector<1x1x1x128xf32>
    %56 = vector.broadcast %55 : vector<1x1x1x128xf32> to vector<2x8x8x128xf32>
    %57 = arith.mulf %52, %56 : vector<2x8x8x128xf32>
    %58 = arith.addf %51, %57 : vector<2x8x8x128xf32>
    %c0_64 = arith.constant 0 : index
    %c0_65 = arith.constant 0 : index
    %c2 = arith.constant 2 : index
    %c0_66 = arith.constant 0 : index
    %59 = vector.load %arg17[%c0_64, %c0_65, %c2, %c0_66] : memref<2x10x10x128xf32, #tpu.memory_space<vmem>>, vector<2x8x8x128xf32>
    %60 = vector.extract_strided_slice %14 {offsets = [2, 0], sizes = [1, 128], strides = [1, 1]} : vector<9x128xf32> to vector<1x128xf32>
    %61 = vector.shape_cast %60 : vector<1x128xf32> to vector<128xf32>
    %62 = vector.shape_cast %61 : vector<128xf32> to vector<1x1x1x128xf32>
    %63 = vector.broadcast %62 : vector<1x1x1x128xf32> to vector<2x8x8x128xf32>
    %64 = arith.mulf %59, %63 : vector<2x8x8x128xf32>
    %65 = arith.addf %58, %64 : vector<2x8x8x128xf32>
    %c0_67 = arith.constant 0 : index
    %c1_68 = arith.constant 1 : index
    %c0_69 = arith.constant 0 : index
    %c0_70 = arith.constant 0 : index
    %66 = vector.load %arg17[%c0_67, %c1_68, %c0_69, %c0_70] : memref<2x10x10x128xf32, #tpu.memory_space<vmem>>, vector<2x8x8x128xf32>
    %67 = vector.extract_strided_slice %14 {offsets = [3, 0], sizes = [1, 128], strides = [1, 1]} : vector<9x128xf32> to vector<1x128xf32>
    %68 = vector.shape_cast %67 : vector<1x128xf32> to vector<128xf32>
    %69 = vector.shape_cast %68 : vector<128xf32> to vector<1x1x1x128xf32>
    %70 = vector.broadcast %69 : vector<1x1x1x128xf32> to vector<2x8x8x128xf32>
    %71 = arith.mulf %66, %70 : vector<2x8x8x128xf32>
    %72 = arith.addf %65, %71 : vector<2x8x8x128xf32>
    %c0_71 = arith.constant 0 : index
    %c1_72 = arith.constant 1 : index
    %c2_73 = arith.constant 2 : index
    %c0_74 = arith.constant 0 : index
    %73 = vector.load %arg17[%c0_71, %c1_72, %c2_73, %c0_74] : memref<2x10x10x128xf32, #tpu.memory_space<vmem>>, vector<2x8x8x128xf32>
    %74 = vector.extract_strided_slice %14 {offsets = [5, 0], sizes = [1, 128], strides = [1, 1]} : vector<9x128xf32> to vector<1x128xf32>
    %75 = vector.shape_cast %74 : vector<1x128xf32> to vector<128xf32>
    %76 = vector.shape_cast %75 : vector<128xf32> to vector<1x1x1x128xf32>
    %77 = vector.broadcast %76 : vector<1x1x1x128xf32> to vector<2x8x8x128xf32>
    %78 = arith.mulf %73, %77 : vector<2x8x8x128xf32>
    %79 = arith.addf %72, %78 : vector<2x8x8x128xf32>
    %c0_75 = arith.constant 0 : index
    %c2_76 = arith.constant 2 : index
    %c0_77 = arith.constant 0 : index
    %c0_78 = arith.constant 0 : index
    %80 = vector.load %arg17[%c0_75, %c2_76, %c0_77, %c0_78] : memref<2x10x10x128xf32, #tpu.memory_space<vmem>>, vector<2x8x8x128xf32>
    %81 = vector.extract_strided_slice %14 {offsets = [6, 0], sizes = [1, 128], strides = [1, 1]} : vector<9x128xf32> to vector<1x128xf32>
    %82 = vector.shape_cast %81 : vector<1x128xf32> to vector<128xf32>
    %83 = vector.shape_cast %82 : vector<128xf32> to vector<1x1x1x128xf32>
    %84 = vector.broadcast %83 : vector<1x1x1x128xf32> to vector<2x8x8x128xf32>
    %85 = arith.mulf %80, %84 : vector<2x8x8x128xf32>
    %86 = arith.addf %79, %85 : vector<2x8x8x128xf32>
    %c0_79 = arith.constant 0 : index
    %c2_80 = arith.constant 2 : index
    %c1_81 = arith.constant 1 : index
    %c0_82 = arith.constant 0 : index
    %87 = vector.load %arg17[%c0_79, %c2_80, %c1_81, %c0_82] : memref<2x10x10x128xf32, #tpu.memory_space<vmem>>, vector<2x8x8x128xf32>
    %88 = vector.extract_strided_slice %14 {offsets = [7, 0], sizes = [1, 128], strides = [1, 1]} : vector<9x128xf32> to vector<1x128xf32>
    %89 = vector.shape_cast %88 : vector<1x128xf32> to vector<128xf32>
    %90 = vector.shape_cast %89 : vector<128xf32> to vector<1x1x1x128xf32>
    %91 = vector.broadcast %90 : vector<1x1x1x128xf32> to vector<2x8x8x128xf32>
    %92 = arith.mulf %87, %91 : vector<2x8x8x128xf32>
    %93 = arith.addf %86, %92 : vector<2x8x8x128xf32>
    %c0_83 = arith.constant 0 : index
    %c2_84 = arith.constant 2 : index
    %c2_85 = arith.constant 2 : index
    %c0_86 = arith.constant 0 : index
    %94 = vector.load %arg17[%c0_83, %c2_84, %c2_85, %c0_86] : memref<2x10x10x128xf32, #tpu.memory_space<vmem>>, vector<2x8x8x128xf32>
    %95 = vector.extract_strided_slice %14 {offsets = [8, 0], sizes = [1, 128], strides = [1, 1]} : vector<9x128xf32> to vector<1x128xf32>
    %96 = vector.shape_cast %95 : vector<1x128xf32> to vector<128xf32>
    %97 = vector.shape_cast %96 : vector<128xf32> to vector<1x1x1x128xf32>
    %98 = vector.broadcast %97 : vector<1x1x1x128xf32> to vector<2x8x8x128xf32>
    %99 = arith.mulf %94, %98 : vector<2x8x8x128xf32>
    %100 = arith.addf %93, %99 : vector<2x8x8x128xf32>
    %101 = vector.shape_cast %16 : vector<128xf32> to vector<1x1x1x128xf32>
    %102 = vector.broadcast %101 : vector<1x1x1x128xf32> to vector<2x8x8x128xf32>
    %103 = arith.addf %100, %102 : vector<2x8x8x128xf32>
    %cst_87 = arith.constant 0.000000e+00 : f32
    %104 = vector.broadcast %cst_87 : f32 to vector<2x8x8x128xf32>
    %105 = arith.maximumf %103, %104 : vector<2x8x8x128xf32>
    %106 = vector.shape_cast %105 : vector<2x8x8x128xf32> to vector<128x128xf32>
    %107 = arith.truncf %106 : vector<128x128xf32> to vector<128x128xbf16>
    %cst_88 = arith.constant dense<0.000000e+00> : vector<128x32xf32>
    %108 = tpu.matmul %107, %17, %cst_88 {dimension_numbers = #tpu.dot_dimension_numbers<[1], [0], [0], [1], [0, 0, 1, 1], [], []>} : vector<128x128xbf16>, vector<128x32xbf16>, vector<128x32xf32> -> vector<128x32xf32>
    %109 = vector.shape_cast %19 : vector<32xf32> to vector<1x32xf32>
    %110 = vector.broadcast %109 : vector<1x32xf32> to vector<128x32xf32>
    %111 = arith.addf %108, %110 : vector<128x32xf32>
    %112 = vector.shape_cast %111 : vector<128x32xf32> to vector<2x8x8x32xf32>
    %113 = arith.addf %29, %112 : vector<2x8x8x32xf32>
    %114 = vector.broadcast %4 : vector<2x1x1x32xf32> to vector<2x8x8x32xf32>
    %115 = arith.mulf %114, %113 : vector<2x8x8x32xf32>
    %116 = arith.mulf %115, %3 : vector<2x8x8x32xf32>
    %117 = vector.shape_cast %116 : vector<2x8x8x32xf32> to vector<128x32xf32>
    %118 = arith.truncf %117 : vector<128x32xf32> to vector<128x32xbf16>
    %cst_89 = arith.constant dense<0.000000e+00> : vector<128x128xf32>
    %119 = tpu.matmul %118, %20, %cst_89 {dimension_numbers = #tpu.dot_dimension_numbers<[1], [0], [0], [1], [0, 0, 1, 1], [], []>} : vector<128x32xbf16>, vector<32x128xbf16>, vector<128x128xf32> -> vector<128x128xf32>
    %120 = vector.shape_cast %22 : vector<128xf32> to vector<1x128xf32>
    %121 = vector.broadcast %120 : vector<1x128xf32> to vector<128x128xf32>
    %122 = arith.addf %119, %121 : vector<128x128xf32>
    %cst_90 = arith.constant 0.000000e+00 : f32
    %123 = vector.broadcast %cst_90 : f32 to vector<128x128xf32>
    %124 = arith.maximumf %122, %123 : vector<128x128xf32>
    %125 = vector.shape_cast %124 : vector<128x128xf32> to vector<2x8x8x128xf32>
    %c0_91 = arith.constant 0 : index
    %c1_92 = arith.constant 1 : index
    %c1_93 = arith.constant 1 : index
    %c0_94 = arith.constant 0 : index
    %126 = vector.load %arg17[%c0_91, %c1_92, %c1_93, %c0_94] : memref<2x10x10x128xf32, #tpu.memory_space<vmem>>, vector<2x8x8x128xf32>
    tpu.vector_store %arg17[%c0_91, %c1_92, %c1_93, %c0_94], %125 {strides = array<i32>} : memref<2x10x10x128xf32, #tpu.memory_space<vmem>>, vector<2x8x8x128xf32>,
    %127 = vector.extract_strided_slice %23 {offsets = [4, 0], sizes = [1, 128], strides = [1, 1]} : vector<9x128xf32> to vector<1x128xf32>
    %128 = vector.shape_cast %127 : vector<1x128xf32> to vector<128xf32>
    %129 = vector.shape_cast %128 : vector<128xf32> to vector<1x1x1x128xf32>
    %130 = vector.broadcast %129 : vector<1x1x1x128xf32> to vector<2x8x8x128xf32>
    %131 = arith.mulf %125, %130 : vector<2x8x8x128xf32>
    %c0_95 = arith.constant 0 : index
    %c0_96 = arith.constant 0 : index
    %c0_97 = arith.constant 0 : index
    %c0_98 = arith.constant 0 : index
    %132 = vector.load %arg17[%c0_95, %c0_96, %c0_97, %c0_98] : memref<2x10x10x128xf32, #tpu.memory_space<vmem>>, vector<2x8x8x128xf32>
    %133 = vector.extract_strided_slice %23 {offsets = [0, 0], sizes = [1, 128], strides = [1, 1]} : vector<9x128xf32> to vector<1x128xf32>
    %134 = vector.shape_cast %133 : vector<1x128xf32> to vector<128xf32>
    %135 = vector.shape_cast %134 : vector<128xf32> to vector<1x1x1x128xf32>
    %136 = vector.broadcast %135 : vector<1x1x1x128xf32> to vector<2x8x8x128xf32>
    %137 = arith.mulf %132, %136 : vector<2x8x8x128xf32>
    %138 = arith.addf %131, %137 : vector<2x8x8x128xf32>
    %c0_99 = arith.constant 0 : index
    %c0_100 = arith.constant 0 : index
    %c1_101 = arith.constant 1 : index
    %c0_102 = arith.constant 0 : index
    %139 = vector.load %arg17[%c0_99, %c0_100, %c1_101, %c0_102] : memref<2x10x10x128xf32, #tpu.memory_space<vmem>>, vector<2x8x8x128xf32>
    %140 = vector.extract_strided_slice %23 {offsets = [1, 0], sizes = [1, 128], strides = [1, 1]} : vector<9x128xf32> to vector<1x128xf32>
    %141 = vector.shape_cast %140 : vector<1x128xf32> to vector<128xf32>
    %142 = vector.shape_cast %141 : vector<128xf32> to vector<1x1x1x128xf32>
    %143 = vector.broadcast %142 : vector<1x1x1x128xf32> to vector<2x8x8x128xf32>
    %144 = arith.mulf %139, %143 : vector<2x8x8x128xf32>
    %145 = arith.addf %138, %144 : vector<2x8x8x128xf32>
    %c0_103 = arith.constant 0 : index
    %c0_104 = arith.constant 0 : index
    %c2_105 = arith.constant 2 : index
    %c0_106 = arith.constant 0 : index
    %146 = vector.load %arg17[%c0_103, %c0_104, %c2_105, %c0_106] : memref<2x10x10x128xf32, #tpu.memory_space<vmem>>, vector<2x8x8x128xf32>
    %147 = vector.extract_strided_slice %23 {offsets = [2, 0], sizes = [1, 128], strides = [1, 1]} : vector<9x128xf32> to vector<1x128xf32>
    %148 = vector.shape_cast %147 : vector<1x128xf32> to vector<128xf32>
    %149 = vector.shape_cast %148 : vector<128xf32> to vector<1x1x1x128xf32>
    %150 = vector.broadcast %149 : vector<1x1x1x128xf32> to vector<2x8x8x128xf32>
    %151 = arith.mulf %146, %150 : vector<2x8x8x128xf32>
    %152 = arith.addf %145, %151 : vector<2x8x8x128xf32>
    %c0_107 = arith.constant 0 : index
    %c1_108 = arith.constant 1 : index
    %c0_109 = arith.constant 0 : index
    %c0_110 = arith.constant 0 : index
    %153 = vector.load %arg17[%c0_107, %c1_108, %c0_109, %c0_110] : memref<2x10x10x128xf32, #tpu.memory_space<vmem>>, vector<2x8x8x128xf32>
    %154 = vector.extract_strided_slice %23 {offsets = [3, 0], sizes = [1, 128], strides = [1, 1]} : vector<9x128xf32> to vector<1x128xf32>
    %155 = vector.shape_cast %154 : vector<1x128xf32> to vector<128xf32>
    %156 = vector.shape_cast %155 : vector<128xf32> to vector<1x1x1x128xf32>
    %157 = vector.broadcast %156 : vector<1x1x1x128xf32> to vector<2x8x8x128xf32>
    %158 = arith.mulf %153, %157 : vector<2x8x8x128xf32>
    %159 = arith.addf %152, %158 : vector<2x8x8x128xf32>
    %c0_111 = arith.constant 0 : index
    %c1_112 = arith.constant 1 : index
    %c2_113 = arith.constant 2 : index
    %c0_114 = arith.constant 0 : index
    %160 = vector.load %arg17[%c0_111, %c1_112, %c2_113, %c0_114] : memref<2x10x10x128xf32, #tpu.memory_space<vmem>>, vector<2x8x8x128xf32>
    %161 = vector.extract_strided_slice %23 {offsets = [5, 0], sizes = [1, 128], strides = [1, 1]} : vector<9x128xf32> to vector<1x128xf32>
    %162 = vector.shape_cast %161 : vector<1x128xf32> to vector<128xf32>
    %163 = vector.shape_cast %162 : vector<128xf32> to vector<1x1x1x128xf32>
    %164 = vector.broadcast %163 : vector<1x1x1x128xf32> to vector<2x8x8x128xf32>
    %165 = arith.mulf %160, %164 : vector<2x8x8x128xf32>
    %166 = arith.addf %159, %165 : vector<2x8x8x128xf32>
    %c0_115 = arith.constant 0 : index
    %c2_116 = arith.constant 2 : index
    %c0_117 = arith.constant 0 : index
    %c0_118 = arith.constant 0 : index
    %167 = vector.load %arg17[%c0_115, %c2_116, %c0_117, %c0_118] : memref<2x10x10x128xf32, #tpu.memory_space<vmem>>, vector<2x8x8x128xf32>
    %168 = vector.extract_strided_slice %23 {offsets = [6, 0], sizes = [1, 128], strides = [1, 1]} : vector<9x128xf32> to vector<1x128xf32>
    %169 = vector.shape_cast %168 : vector<1x128xf32> to vector<128xf32>
    %170 = vector.shape_cast %169 : vector<128xf32> to vector<1x1x1x128xf32>
    %171 = vector.broadcast %170 : vector<1x1x1x128xf32> to vector<2x8x8x128xf32>
    %172 = arith.mulf %167, %171 : vector<2x8x8x128xf32>
    %173 = arith.addf %166, %172 : vector<2x8x8x128xf32>
    %c0_119 = arith.constant 0 : index
    %c2_120 = arith.constant 2 : index
    %c1_121 = arith.constant 1 : index
    %c0_122 = arith.constant 0 : index
    %174 = vector.load %arg17[%c0_119, %c2_120, %c1_121, %c0_122] : memref<2x10x10x128xf32, #tpu.memory_space<vmem>>, vector<2x8x8x128xf32>
    %175 = vector.extract_strided_slice %23 {offsets = [7, 0], sizes = [1, 128], strides = [1, 1]} : vector<9x128xf32> to vector<1x128xf32>
    %176 = vector.shape_cast %175 : vector<1x128xf32> to vector<128xf32>
    %177 = vector.shape_cast %176 : vector<128xf32> to vector<1x1x1x128xf32>
    %178 = vector.broadcast %177 : vector<1x1x1x128xf32> to vector<2x8x8x128xf32>
    %179 = arith.mulf %174, %178 : vector<2x8x8x128xf32>
    %180 = arith.addf %173, %179 : vector<2x8x8x128xf32>
    %c0_123 = arith.constant 0 : index
    %c2_124 = arith.constant 2 : index
    %c2_125 = arith.constant 2 : index
    %c0_126 = arith.constant 0 : index
    %181 = vector.load %arg17[%c0_123, %c2_124, %c2_125, %c0_126] : memref<2x10x10x128xf32, #tpu.memory_space<vmem>>, vector<2x8x8x128xf32>
    %182 = vector.extract_strided_slice %23 {offsets = [8, 0], sizes = [1, 128], strides = [1, 1]} : vector<9x128xf32> to vector<1x128xf32>
    %183 = vector.shape_cast %182 : vector<1x128xf32> to vector<128xf32>
    %184 = vector.shape_cast %183 : vector<128xf32> to vector<1x1x1x128xf32>
    %185 = vector.broadcast %184 : vector<1x1x1x128xf32> to vector<2x8x8x128xf32>
    %186 = arith.mulf %181, %185 : vector<2x8x8x128xf32>
    %187 = arith.addf %180, %186 : vector<2x8x8x128xf32>
    %188 = vector.shape_cast %25 : vector<128xf32> to vector<1x1x1x128xf32>
    %189 = vector.broadcast %188 : vector<1x1x1x128xf32> to vector<2x8x8x128xf32>
    %190 = arith.addf %187, %189 : vector<2x8x8x128xf32>
    %cst_127 = arith.constant 0.000000e+00 : f32
    %191 = vector.broadcast %cst_127 : f32 to vector<2x8x8x128xf32>
    %192 = arith.maximumf %190, %191 : vector<2x8x8x128xf32>
    %193 = vector.shape_cast %192 : vector<2x8x8x128xf32> to vector<128x128xf32>
    %194 = arith.truncf %193 : vector<128x128xf32> to vector<128x128xbf16>
    %cst_128 = arith.constant dense<0.000000e+00> : vector<128x32xf32>
    %195 = tpu.matmul %194, %26, %cst_128 {dimension_numbers = #tpu.dot_dimension_numbers<[1], [0], [0], [1], [0, 0, 1, 1], [], []>} : vector<128x128xbf16>, vector<128x32xbf16>, vector<128x32xf32> -> vector<128x32xf32>
    %196 = vector.shape_cast %28 : vector<32xf32> to vector<1x32xf32>
    %197 = vector.broadcast %196 : vector<1x32xf32> to vector<128x32xf32>
    %198 = arith.addf %195, %197 : vector<128x32xf32>
    %199 = vector.shape_cast %198 : vector<128x32xf32> to vector<2x8x8x32xf32>
    %200 = arith.addf %116, %199 : vector<2x8x8x32xf32>
    %c0_129 = arith.constant 0 : index
    %c0_130 = arith.constant 0 : index
    %c0_131 = arith.constant 0 : index
    %c0_132 = arith.constant 0 : index
    %201 = vector.load %arg16[%c0_129, %c0_130, %c0_131, %c0_132] : memref<2x8x8x32xf32, #tpu.memory_space<vmem>>, vector<2x8x8x32xf32>
    tpu.vector_store %arg16[%c0_129, %c0_130, %c0_131, %c0_132], %200 {strides = array<i32>} : memref<2x8x8x32xf32, #tpu.memory_space<vmem>>, vector<2x8x8x32xf32>,
    return
  }
  func.func @transform_0(%arg0: i32) -> (i32, i32, i32, i32) {
    %c0_i32 = arith.constant 0 : i32
    %c0_i32_0 = arith.constant 0 : i32
    %c0_i32_1 = arith.constant 0 : i32
    %c0_i32_2 = arith.constant 0 : i32
    return %arg0, %c0_i32, %c0_i32_0, %c0_i32_1 : i32, i32, i32, i32
  }
  func.func @transform_1(%arg0: i32) -> (i32, i32, i32, i32) {
    %c0_i32 = arith.constant 0 : i32
    %c0_i32_0 = arith.constant 0 : i32
    %c0_i32_1 = arith.constant 0 : i32
    %c0_i32_2 = arith.constant 0 : i32
    return %arg0, %c0_i32, %c0_i32_0, %c0_i32_1 : i32, i32, i32, i32
  }
  func.func @transform_2(%arg0: i32) -> (i32, i32, i32, i32) {
    %c0_i32 = arith.constant 0 : i32
    %c0_i32_0 = arith.constant 0 : i32
    %c0_i32_1 = arith.constant 0 : i32
    %c0_i32_2 = arith.constant 0 : i32
    return %arg0, %c0_i32, %c0_i32_0, %c0_i32_1 : i32, i32, i32, i32
  }
  func.func @transform_3(%arg0: i32) -> (i32, i32) {
    %c0_i32 = arith.constant 0 : i32
    %c0_i32_0 = arith.constant 0 : i32
    %c0_i32_1 = arith.constant 0 : i32
    return %c0_i32, %c0_i32_0 : i32, i32
  }
  func.func @transform_4(%arg0: i32) -> (i32, i32) {
    %c0_i32 = arith.constant 0 : i32
    %c0_i32_0 = arith.constant 0 : i32
    %c0_i32_1 = arith.constant 0 : i32
    return %c0_i32, %c0_i32_0 : i32, i32
  }
  func.func @transform_5(%arg0: i32) -> (i32, i32) {
    %c0_i32 = arith.constant 0 : i32
    %c0_i32_0 = arith.constant 0 : i32
    %c0_i32_1 = arith.constant 0 : i32
    return %c0_i32, %c0_i32_0 : i32, i32
  }
  func.func @transform_6(%arg0: i32) -> (i32, i32) {
    %c0_i32 = arith.constant 0 : i32
    %c0_i32_0 = arith.constant 0 : i32
    %c0_i32_1 = arith.constant 0 : i32
    return %c0_i32, %c0_i32_0 : i32, i32
  }
  func.func @transform_7(%arg0: i32) -> (i32, i32) {
    %c0_i32 = arith.constant 0 : i32
    %c0_i32_0 = arith.constant 0 : i32
    %c0_i32_1 = arith.constant 0 : i32
    return %c0_i32, %c0_i32_0 : i32, i32
  }
  func.func @transform_8(%arg0: i32) -> (i32, i32) {
    %c0_i32 = arith.constant 0 : i32
    %c0_i32_0 = arith.constant 0 : i32
    %c0_i32_1 = arith.constant 0 : i32
    return %c0_i32, %c0_i32_0 : i32, i32
  }
  func.func @transform_9(%arg0: i32) -> (i32, i32) {
    %c0_i32 = arith.constant 0 : i32
    %c0_i32_0 = arith.constant 0 : i32
    %c0_i32_1 = arith.constant 0 : i32
    return %c0_i32, %c0_i32_0 : i32, i32
  }
  func.func @transform_10(%arg0: i32) -> (i32, i32) {
    %c0_i32 = arith.constant 0 : i32
    %c0_i32_0 = arith.constant 0 : i32
    %c0_i32_1 = arith.constant 0 : i32
    return %c0_i32, %c0_i32_0 : i32, i32
  }
  func.func @transform_11(%arg0: i32) -> (i32, i32) {
    %c0_i32 = arith.constant 0 : i32
    %c0_i32_0 = arith.constant 0 : i32
    %c0_i32_1 = arith.constant 0 : i32
    return %c0_i32, %c0_i32_0 : i32, i32
  }
  func.func @transform_12(%arg0: i32) -> (i32, i32) {
    %c0_i32 = arith.constant 0 : i32
    %c0_i32_0 = arith.constant 0 : i32
    %c0_i32_1 = arith.constant 0 : i32
    return %c0_i32, %c0_i32_0 : i32, i32
  }
  func.func @transform_13(%arg0: i32) -> (i32, i32) {
    %c0_i32 = arith.constant 0 : i32
    %c0_i32_0 = arith.constant 0 : i32
    %c0_i32_1 = arith.constant 0 : i32
    return %c0_i32, %c0_i32_0 : i32, i32
  }
  func.func @transform_14(%arg0: i32) -> (i32, i32) {
    %c0_i32 = arith.constant 0 : i32
    %c0_i32_0 = arith.constant 0 : i32
    %c0_i32_1 = arith.constant 0 : i32
    return %c0_i32, %c0_i32_0 : i32, i32
  }
  func.func @transform_15(%arg0: i32) -> (i32, i32, i32, i32) {
    %c0_i32 = arith.constant 0 : i32
    %c0_i32_0 = arith.constant 0 : i32
    %c0_i32_1 = arith.constant 0 : i32
    %c0_i32_2 = arith.constant 0 : i32
    return %arg0, %c0_i32, %c0_i32_0, %c0_i32_1 : i32, i32, i32, i32
  }
}

module attributes {stable_mosaic.version = 11 : i64} {
  func.func @depthfuse_kernel(%arg0: i32, %arg1: memref<2x8x8x32xbf16, #tpu.memory_space<vmem>>, %arg2: memref<2x8x8x32xbf16, #tpu.memory_space<vmem>>, %arg3: memref<2x1x1x32xf32, #tpu.memory_space<vmem>>, %arg4: memref<32x128xbf16, #tpu.memory_space<vmem>>, %arg5: memref<1x128xf32, #tpu.memory_space<vmem>>, %arg6: memref<9x128xf32, #tpu.memory_space<vmem>>, %arg7: memref<1x128xf32, #tpu.memory_space<vmem>>, %arg8: memref<128x32xbf16, #tpu.memory_space<vmem>>, %arg9: memref<1x32xf32, #tpu.memory_space<vmem>>, %arg10: memref<32x128xbf16, #tpu.memory_space<vmem>>, %arg11: memref<1x128xf32, #tpu.memory_space<vmem>>, %arg12: memref<9x128xf32, #tpu.memory_space<vmem>>, %arg13: memref<1x128xf32, #tpu.memory_space<vmem>>, %arg14: memref<128x32xbf16, #tpu.memory_space<vmem>>, %arg15: memref<1x32xf32, #tpu.memory_space<vmem>>, %arg16: memref<2x8x8x32xf32, #tpu.memory_space<vmem>>, %arg17: memref<2x10x10x128xf32, #tpu.memory_space<vmem>>) attributes {dimension_semantics = [#tpu.dimension_semantics<parallel>], iteration_bounds = array<i64: 1>, scalar_prefetch = 0 : i64, scratch_operands = 1 : i64, tpu.core_type = #tpu.core_type<tc>, window_params = [{transform_indices = @transform_0, window_bounds = array<i64: 2, 8, 8, 32>}, {transform_indices = @transform_1, window_bounds = array<i64: 2, 8, 8, 32>}, {transform_indices = @transform_2, window_bounds = array<i64: 2, 1, 1, 32>}, {pipeline_mode = #tpu.pipeline_mode<synchronous>, transform_indices = @transform_3, window_bounds = array<i64: 32, 128>}, {pipeline_mode = #tpu.pipeline_mode<synchronous>, transform_indices = @transform_4, window_bounds = array<i64: 1, 128>}, {pipeline_mode = #tpu.pipeline_mode<synchronous>, transform_indices = @transform_5, window_bounds = array<i64: 9, 128>}, {pipeline_mode = #tpu.pipeline_mode<synchronous>, transform_indices = @transform_6, window_bounds = array<i64: 1, 128>}, {pipeline_mode = #tpu.pipeline_mode<synchronous>, transform_indices = @transform_7, window_bounds = array<i64: 128, 32>}, {pipeline_mode = #tpu.pipeline_mode<synchronous>, transform_indices = @transform_8, window_bounds = array<i64: 1, 32>}, {pipeline_mode = #tpu.pipeline_mode<synchronous>, transform_indices = @transform_9, window_bounds = array<i64: 32, 128>}, {pipeline_mode = #tpu.pipeline_mode<synchronous>, transform_indices = @transform_10, window_bounds = array<i64: 1, 128>}, {pipeline_mode = #tpu.pipeline_mode<synchronous>, transform_indices = @transform_11, window_bounds = array<i64: 9, 128>}, {pipeline_mode = #tpu.pipeline_mode<synchronous>, transform_indices = @transform_12, window_bounds = array<i64: 1, 128>}, {pipeline_mode = #tpu.pipeline_mode<synchronous>, transform_indices = @transform_13, window_bounds = array<i64: 128, 32>}, {pipeline_mode = #tpu.pipeline_mode<synchronous>, transform_indices = @transform_14, window_bounds = array<i64: 1, 32>}, {transform_indices = @transform_15, window_bounds = array<i64: 2, 8, 8, 32>}]} {
    %c0 = arith.constant 0 : index
    %c0_0 = arith.constant 0 : index
    %c0_1 = arith.constant 0 : index
    %c0_2 = arith.constant 0 : index
    %0 = vector.load %arg1[%c0, %c0_0, %c0_1, %c0_2] : memref<2x8x8x32xbf16, #tpu.memory_space<vmem>>, vector<2x8x8x32xbf16>
    %1 = arith.extf %0 : vector<2x8x8x32xbf16> to vector<2x8x8x32xf32>
    %c0_3 = arith.constant 0 : index
    %c0_4 = arith.constant 0 : index
    %c0_5 = arith.constant 0 : index
    %c0_6 = arith.constant 0 : index
    %2 = vector.load %arg2[%c0_3, %c0_4, %c0_5, %c0_6] : memref<2x8x8x32xbf16, #tpu.memory_space<vmem>>, vector<2x8x8x32xbf16>
    %3 = arith.extf %2 : vector<2x8x8x32xbf16> to vector<2x8x8x32xf32>
    %c0_7 = arith.constant 0 : index
    %c0_8 = arith.constant 0 : index
    %c0_9 = arith.constant 0 : index
    %c0_10 = arith.constant 0 : index
    %4 = vector.load %arg3[%c0_7, %c0_8, %c0_9, %c0_10] : memref<2x1x1x32xf32, #tpu.memory_space<vmem>>, vector<2x1x1x32xf32>
    %cst = arith.constant 0.000000e+00 : f32
    %5 = vector.broadcast %cst : f32 to vector<2x1x10x128xf32>
    %c0_11 = arith.constant 0 : index
    %c0_12 = arith.constant 0 : index
    %c0_13 = arith.constant 0 : index
    %c0_14 = arith.constant 0 : index
    %6 = vector.load %arg17[%c0_11, %c0_12, %c0_13, %c0_14] : memref<2x10x10x128xf32, #tpu.memory_space<vmem>>, vector<2x1x10x128xf32>
    tpu.vector_store %arg17[%c0_11, %c0_12, %c0_13, %c0_14], %5 {strides = array<i32>} : memref<2x10x10x128xf32, #tpu.memory_space<vmem>>, vector<2x1x10x128xf32>,
    %c0_15 = arith.constant 0 : index
    %c9 = arith.constant 9 : index
    %c0_16 = arith.constant 0 : index
    %c0_17 = arith.constant 0 : index
    %7 = vector.load %arg17[%c0_15, %c9, %c0_16, %c0_17] : memref<2x10x10x128xf32, #tpu.memory_space<vmem>>, vector<2x1x10x128xf32>
    tpu.vector_store %arg17[%c0_15, %c9, %c0_16, %c0_17], %5 {strides = array<i32>} : memref<2x10x10x128xf32, #tpu.memory_space<vmem>>, vector<2x1x10x128xf32>,
    %cst_18 = arith.constant 0.000000e+00 : f32
    %8 = vector.broadcast %cst_18 : f32 to vector<2x10x1x128xf32>
    %c0_19 = arith.constant 0 : index
    %c0_20 = arith.constant 0 : index
    %c0_21 = arith.constant 0 : index
    %c0_22 = arith.constant 0 : index
    %9 = vector.load %arg17[%c0_19, %c0_20, %c0_21, %c0_22] : memref<2x10x10x128xf32, #tpu.memory_space<vmem>>, vector<2x10x1x128xf32>
    tpu.vector_store %arg17[%c0_19, %c0_20, %c0_21, %c0_22], %8 {strides = array<i32>} : memref<2x10x10x128xf32, #tpu.memory_space<vmem>>, vector<2x10x1x128xf32>,
    %c0_23 = arith.constant 0 : index
    %c0_24 = arith.constant 0 : index
    %c9_25 = arith.constant 9 : index
    %c0_26 = arith.constant 0 : index
    %10 = vector.load %arg17[%c0_23, %c0_24, %c9_25, %c0_26] : memref<2x10x10x128xf32, #tpu.memory_space<vmem>>, vector<2x10x1x128xf32>
    tpu.vector_store %arg17[%c0_23, %c0_24, %c9_25, %c0_26], %8 {strides = array<i32>} : memref<2x10x10x128xf32, #tpu.memory_space<vmem>>, vector<2x10x1x128xf32>,
    %c0_27 = arith.constant 0 : index
    %c0_28 = arith.constant 0 : index
    %11 = vector.load %arg4[%c0_27, %c0_28] : memref<32x128xbf16, #tpu.memory_space<vmem>>, vector<32x128xbf16>
    %c0_29 = arith.constant 0 : index
    %c0_30 = arith.constant 0 : index
    %12 = vector.load %arg5[%c0_29, %c0_30] : memref<1x128xf32, #tpu.memory_space<vmem>>, vector<1x128xf32>
    %13 = vector.shape_cast %12 : vector<1x128xf32> to vector<128xf32>
    %c0_31 = arith.constant 0 : index
    %c0_32 = arith.constant 0 : index
    %14 = vector.load %arg6[%c0_31, %c0_32] : memref<9x128xf32, #tpu.memory_space<vmem>>, vector<9x128xf32>
    %c0_33 = arith.constant 0 : index
    %c0_34 = arith.constant 0 : index
    %15 = vector.load %arg7[%c0_33, %c0_34] : memref<1x128xf32, #tpu.memory_space<vmem>>, vector<1x128xf32>
    %16 = vector.shape_cast %15 : vector<1x128xf32> to vector<128xf32>
    %c0_35 = arith.constant 0 : index
    %c0_36 = arith.constant 0 : index
    %17 = vector.load %arg8[%c0_35, %c0_36] : memref<128x32xbf16, #tpu.memory_space<vmem>>, vector<128x32xbf16>
    %c0_37 = arith.constant 0 : index
    %c0_38 = arith.constant 0 : index
    %18 = vector.load %arg9[%c0_37, %c0_38] : memref<1x32xf32, #tpu.memory_space<vmem>>, vector<1x32xf32>
    %19 = vector.shape_cast %18 : vector<1x32xf32> to vector<32xf32>
    %c0_39 = arith.constant 0 : index
    %c0_40 = arith.constant 0 : index
    %20 = vector.load %arg10[%c0_39, %c0_40] : memref<32x128xbf16, #tpu.memory_space<vmem>>, vector<32x128xbf16>
    %c0_41 = arith.constant 0 : index
    %c0_42 = arith.constant 0 : index
    %21 = vector.load %arg11[%c0_41, %c0_42] : memref<1x128xf32, #tpu.memory_space<vmem>>, vector<1x128xf32>
    %22 = vector.shape_cast %21 : vector<1x128xf32> to vector<128xf32>
    %c0_43 = arith.constant 0 : index
    %c0_44 = arith.constant 0 : index
    %23 = vector.load %arg12[%c0_43, %c0_44] : memref<9x128xf32, #tpu.memory_space<vmem>>, vector<9x128xf32>
    %c0_45 = arith.constant 0 : index
    %c0_46 = arith.constant 0 : index
    %24 = vector.load %arg13[%c0_45, %c0_46] : memref<1x128xf32, #tpu.memory_space<vmem>>, vector<1x128xf32>
    %25 = vector.shape_cast %24 : vector<1x128xf32> to vector<128xf32>
    %c0_47 = arith.constant 0 : index
    %c0_48 = arith.constant 0 : index
    %26 = vector.load %arg14[%c0_47, %c0_48] : memref<128x32xbf16, #tpu.memory_space<vmem>>, vector<128x32xbf16>
    %c0_49 = arith.constant 0 : index
    %c0_50 = arith.constant 0 : index
    %27 = vector.load %arg15[%c0_49, %c0_50] : memref<1x32xf32, #tpu.memory_space<vmem>>, vector<1x32xf32>
    %28 = vector.shape_cast %27 : vector<1x32xf32> to vector<32xf32>
    %29 = arith.mulf %1, %3 : vector<2x8x8x32xf32>
    %30 = vector.shape_cast %29 : vector<2x8x8x32xf32> to vector<128x32xf32>
    %31 = arith.truncf %30 : vector<128x32xf32> to vector<128x32xbf16>
    %cst_51 = arith.constant dense<0.000000e+00> : vector<128x128xf32>
    %32 = tpu.matmul %31, %11, %cst_51 {dimension_numbers = #tpu.dot_dimension_numbers<[1], [0], [0], [1], [0, 0, 1, 1], [], []>} : vector<128x32xbf16>, vector<32x128xbf16>, vector<128x128xf32> -> vector<128x128xf32>
    %33 = vector.shape_cast %13 : vector<128xf32> to vector<1x128xf32>
    %34 = vector.broadcast %33 : vector<1x128xf32> to vector<128x128xf32>
    %35 = arith.addf %32, %34 : vector<128x128xf32>
    %cst_52 = arith.constant 0.000000e+00 : f32
    %36 = vector.broadcast %cst_52 : f32 to vector<128x128xf32>
    %37 = arith.maximumf %35, %36 : vector<128x128xf32>
    %38 = vector.shape_cast %37 : vector<128x128xf32> to vector<2x8x8x128xf32>
    %c0_53 = arith.constant 0 : index
    %c1 = arith.constant 1 : index
    %c1_54 = arith.constant 1 : index
    %c0_55 = arith.constant 0 : index
    %39 = vector.load %arg17[%c0_53, %c1, %c1_54, %c0_55] : memref<2x10x10x128xf32, #tpu.memory_space<vmem>>, vector<2x8x8x128xf32>
    tpu.vector_store %arg17[%c0_53, %c1, %c1_54, %c0_55], %38 {strides = array<i32>} : memref<2x10x10x128xf32, #tpu.memory_space<vmem>>, vector<2x8x8x128xf32>,
    %40 = vector.extract_strided_slice %14 {offsets = [4, 0], sizes = [1, 128], strides = [1, 1]} : vector<9x128xf32> to vector<1x128xf32>
    %41 = vector.shape_cast %40 : vector<1x128xf32> to vector<128xf32>
    %42 = vector.shape_cast %41 : vector<128xf32> to vector<1x1x1x128xf32>
    %43 = vector.broadcast %42 : vector<1x1x1x128xf32> to vector<2x8x8x128xf32>
    %44 = arith.mulf %38, %43 : vector<2x8x8x128xf32>
    %c0_56 = arith.constant 0 : index
    %c0_57 = arith.constant 0 : index
    %c0_58 = arith.constant 0 : index
    %c0_59 = arith.constant 0 : index
    %45 = vector.load %arg17[%c0_56, %c0_57, %c0_58, %c0_59] : memref<2x10x10x128xf32, #tpu.memory_space<vmem>>, vector<2x8x8x128xf32>
    %46 = vector.extract_strided_slice %14 {offsets = [0, 0], sizes = [1, 128], strides = [1, 1]} : vector<9x128xf32> to vector<1x128xf32>
    %47 = vector.shape_cast %46 : vector<1x128xf32> to vector<128xf32>
    %48 = vector.shape_cast %47 : vector<128xf32> to vector<1x1x1x128xf32>
    %49 = vector.broadcast %48 : vector<1x1x1x128xf32> to vector<2x8x8x128xf32>
    %50 = arith.mulf %45, %49 : vector<2x8x8x128xf32>
    %51 = arith.addf %44, %50 : vector<2x8x8x128xf32>
    %c0_60 = arith.constant 0 : index
    %c0_61 = arith.constant 0 : index
    %c1_62 = arith.constant 1 : index
    %c0_63 = arith.constant 0 : index
    %52 = vector.load %arg17[%c0_60, %c0_61, %c1_62, %c0_63] : memref<2x10x10x128xf32, #tpu.memory_space<vmem>>, vector<2x8x8x128xf32>
    %53 = vector.extract_strided_slice %14 {offsets = [1, 0], sizes = [1, 128], strides = [1, 1]} : vector<9x128xf32> to vector<1x128xf32>
    %54 = vector.shape_cast %53 : vector<1x128xf32> to vector<128xf32>
    %55 = vector.shape_cast %54 : vector<128xf32> to vector<1x1x1x128xf32>
    %56 = vector.broadcast %55 : vector<1x1x1x128xf32> to vector<2x8x8x128xf32>
    %57 = arith.mulf %52, %56 : vector<2x8x8x128xf32>
    %58 = arith.addf %51, %57 : vector<2x8x8x128xf32>
    %c0_64 = arith.constant 0 : index
    %c0_65 = arith.constant 0 : index
    %c2 = arith.constant 2 : index
    %c0_66 = arith.constant 0 : index
    %59 = vector.load %arg17[%c0_64, %c0_65, %c2, %c0_66] : memref<2x10x10x128xf32, #tpu.memory_space<vmem>>, vector<2x8x8x128xf32>
    %60 = vector.extract_strided_slice %14 {offsets = [2, 0], sizes = [1, 128], strides = [1, 1]} : vector<9x128xf32> to vector<1x128xf32>
    %61 = vector.shape_cast %60 : vector<1x128xf32> to vector<128xf32>
    %62 = vector.shape_cast %61 : vector<128xf32> to vector<1x1x1x128xf32>
    %63 = vector.broadcast %62 : vector<1x1x1x128xf32> to vector<2x8x8x128xf32>
    %64 = arith.mulf %59, %63 : vector<2x8x8x128xf32>
    %65 = arith.addf %58, %64 : vector<2x8x8x128xf32>
    %c0_67 = arith.constant 0 : index
    %c1_68 = arith.constant 1 : index
    %c0_69 = arith.constant 0 : index
    %c0_70 = arith.constant 0 : index
    %66 = vector.load %arg17[%c0_67, %c1_68, %c0_69, %c0_70] : memref<2x10x10x128xf32, #tpu.memory_space<vmem>>, vector<2x8x8x128xf32>
    %67 = vector.extract_strided_slice %14 {offsets = [3, 0], sizes = [1, 128], strides = [1, 1]} : vector<9x128xf32> to vector<1x128xf32>
    %68 = vector.shape_cast %67 : vector<1x128xf32> to vector<128xf32>
    %69 = vector.shape_cast %68 : vector<128xf32> to vector<1x1x1x128xf32>
    %70 = vector.broadcast %69 : vector<1x1x1x128xf32> to vector<2x8x8x128xf32>
    %71 = arith.mulf %66, %70 : vector<2x8x8x128xf32>
    %72 = arith.addf %65, %71 : vector<2x8x8x128xf32>
    %c0_71 = arith.constant 0 : index
    %c1_72 = arith.constant 1 : index
    %c2_73 = arith.constant 2 : index
    %c0_74 = arith.constant 0 : index
    %73 = vector.load %arg17[%c0_71, %c1_72, %c2_73, %c0_74] : memref<2x10x10x128xf32, #tpu.memory_space<vmem>>, vector<2x8x8x128xf32>
    %74 = vector.extract_strided_slice %14 {offsets = [5, 0], sizes = [1, 128], strides = [1, 1]} : vector<9x128xf32> to vector<1x128xf32>
    %75 = vector.shape_cast %74 : vector<1x128xf32> to vector<128xf32>
    %76 = vector.shape_cast %75 : vector<128xf32> to vector<1x1x1x128xf32>
    %77 = vector.broadcast %76 : vector<1x1x1x128xf32> to vector<2x8x8x128xf32>
    %78 = arith.mulf %73, %77 : vector<2x8x8x128xf32>
    %79 = arith.addf %72, %78 : vector<2x8x8x128xf32>
    %c0_75 = arith.constant 0 : index
    %c2_76 = arith.constant 2 : index
    %c0_77 = arith.constant 0 : index
    %c0_78 = arith.constant 0 : index
    %80 = vector.load %arg17[%c0_75, %c2_76, %c0_77, %c0_78] : memref<2x10x10x128xf32, #tpu.memory_space<vmem>>, vector<2x8x8x128xf32>
    %81 = vector.extract_strided_slice %14 {offsets = [6, 0], sizes = [1, 128], strides = [1, 1]} : vector<9x128xf32> to vector<1x128xf32>
    %82 = vector.shape_cast %81 : vector<1x128xf32> to vector<128xf32>
    %83 = vector.shape_cast %82 : vector<128xf32> to vector<1x1x1x128xf32>
    %84 = vector.broadcast %83 : vector<1x1x1x128xf32> to vector<2x8x8x128xf32>
    %85 = arith.mulf %80, %84 : vector<2x8x8x128xf32>
    %86 = arith.addf %79, %85 : vector<2x8x8x128xf32>
    %c0_79 = arith.constant 0 : index
    %c2_80 = arith.constant 2 : index
    %c1_81 = arith.constant 1 : index
    %c0_82 = arith.constant 0 : index
    %87 = vector.load %arg17[%c0_79, %c2_80, %c1_81, %c0_82] : memref<2x10x10x128xf32, #tpu.memory_space<vmem>>, vector<2x8x8x128xf32>
    %88 = vector.extract_strided_slice %14 {offsets = [7, 0], sizes = [1, 128], strides = [1, 1]} : vector<9x128xf32> to vector<1x128xf32>
    %89 = vector.shape_cast %88 : vector<1x128xf32> to vector<128xf32>
    %90 = vector.shape_cast %89 : vector<128xf32> to vector<1x1x1x128xf32>
    %91 = vector.broadcast %90 : vector<1x1x1x128xf32> to vector<2x8x8x128xf32>
    %92 = arith.mulf %87, %91 : vector<2x8x8x128xf32>
    %93 = arith.addf %86, %92 : vector<2x8x8x128xf32>
    %c0_83 = arith.constant 0 : index
    %c2_84 = arith.constant 2 : index
    %c2_85 = arith.constant 2 : index
    %c0_86 = arith.constant 0 : index
    %94 = vector.load %arg17[%c0_83, %c2_84, %c2_85, %c0_86] : memref<2x10x10x128xf32, #tpu.memory_space<vmem>>, vector<2x8x8x128xf32>
    %95 = vector.extract_strided_slice %14 {offsets = [8, 0], sizes = [1, 128], strides = [1, 1]} : vector<9x128xf32> to vector<1x128xf32>
    %96 = vector.shape_cast %95 : vector<1x128xf32> to vector<128xf32>
    %97 = vector.shape_cast %96 : vector<128xf32> to vector<1x1x1x128xf32>
    %98 = vector.broadcast %97 : vector<1x1x1x128xf32> to vector<2x8x8x128xf32>
    %99 = arith.mulf %94, %98 : vector<2x8x8x128xf32>
    %100 = arith.addf %93, %99 : vector<2x8x8x128xf32>
    %101 = vector.shape_cast %16 : vector<128xf32> to vector<1x1x1x128xf32>
    %102 = vector.broadcast %101 : vector<1x1x1x128xf32> to vector<2x8x8x128xf32>
    %103 = arith.addf %100, %102 : vector<2x8x8x128xf32>
    %cst_87 = arith.constant 0.000000e+00 : f32
    %104 = vector.broadcast %cst_87 : f32 to vector<2x8x8x128xf32>
    %105 = arith.maximumf %103, %104 : vector<2x8x8x128xf32>
    %106 = vector.shape_cast %105 : vector<2x8x8x128xf32> to vector<128x128xf32>
    %107 = arith.truncf %106 : vector<128x128xf32> to vector<128x128xbf16>
    %cst_88 = arith.constant dense<0.000000e+00> : vector<128x32xf32>
    %108 = tpu.matmul %107, %17, %cst_88 {dimension_numbers = #tpu.dot_dimension_numbers<[1], [0], [0], [1], [0, 0, 1, 1], [], []>} : vector<128x128xbf16>, vector<128x32xbf16>, vector<128x32xf32> -> vector<128x32xf32>
    %109 = vector.shape_cast %19 : vector<32xf32> to vector<1x32xf32>
    %110 = vector.broadcast %109 : vector<1x32xf32> to vector<128x32xf32>
    %111 = arith.addf %108, %110 : vector<128x32xf32>
    %112 = vector.shape_cast %111 : vector<128x32xf32> to vector<2x8x8x32xf32>
    %113 = arith.addf %29, %112 : vector<2x8x8x32xf32>
    %114 = vector.broadcast %4 : vector<2x1x1x32xf32> to vector<2x8x8x32xf32>
    %115 = arith.mulf %114, %113 : vector<2x8x8x32xf32>
    %116 = arith.mulf %115, %3 : vector<2x8x8x32xf32>
    %117 = vector.shape_cast %116 : vector<2x8x8x32xf32> to vector<128x32xf32>
    %118 = arith.truncf %117 : vector<128x32xf32> to vector<128x32xbf16>
    %cst_89 = arith.constant dense<0.000000e+00> : vector<128x128xf32>
    %119 = tpu.matmul %118, %20, %cst_89 {dimension_numbers = #tpu.dot_dimension_numbers<[1], [0], [0], [1], [0, 0, 1, 1], [], []>} : vector<128x32xbf16>, vector<32x128xbf16>, vector<128x128xf32> -> vector<128x128xf32>
    %120 = vector.shape_cast %22 : vector<128xf32> to vector<1x128xf32>
    %121 = vector.broadcast %120 : vector<1x128xf32> to vector<128x128xf32>
    %122 = arith.addf %119, %121 : vector<128x128xf32>
    %cst_90 = arith.constant 0.000000e+00 : f32
    %123 = vector.broadcast %cst_90 : f32 to vector<128x128xf32>
    %124 = arith.maximumf %122, %123 : vector<128x128xf32>
    %125 = vector.shape_cast %124 : vector<128x128xf32> to vector<2x8x8x128xf32>
    %c0_91 = arith.constant 0 : index
    %c1_92 = arith.constant 1 : index
    %c1_93 = arith.constant 1 : index
    %c0_94 = arith.constant 0 : index
    %126 = vector.load %arg17[%c0_91, %c1_92, %c1_93, %c0_94] : memref<2x10x10x128xf32, #tpu.memory_space<vmem>>, vector<2x8x8x128xf32>
    tpu.vector_store %arg17[%c0_91, %c1_92, %c1_93, %c0_94], %125 {strides = array<i32>} : memref<2x10x10x128xf32, #tpu.memory_space<vmem>>, vector<2x8x8x128xf32>,
    %127 = vector.extract_strided_slice %23 {offsets = [4, 0], sizes = [1, 128], strides = [1, 1]} : vector<9x128xf32> to vector<1x128xf32>
    %128 = vector.shape_cast %127 : vector<1x128xf32> to vector<128xf32>
    %129 = vector.shape_cast %128 : vector<128xf32> to vector<1x1x1x128xf32>
    %130 = vector.broadcast %129 : vector<1x1x1x128xf32> to vector<2x8x8x128xf32>
    %131 = arith.mulf %125, %130 : vector<2x8x8x128xf32>
    %c0_95 = arith.constant 0 : index
    %c0_96 = arith.constant 0 : index
    %c0_97 = arith.constant 0 : index
    %c0_98 = arith.constant 0 : index
    %132 = vector.load %arg17[%c0_95, %c0_96, %c0_97, %c0_98] : memref<2x10x10x128xf32, #tpu.memory_space<vmem>>, vector<2x8x8x128xf32>
    %133 = vector.extract_strided_slice %23 {offsets = [0, 0], sizes = [1, 128], strides = [1, 1]} : vector<9x128xf32> to vector<1x128xf32>
    %134 = vector.shape_cast %133 : vector<1x128xf32> to vector<128xf32>
    %135 = vector.shape_cast %134 : vector<128xf32> to vector<1x1x1x128xf32>
    %136 = vector.broadcast %135 : vector<1x1x1x128xf32> to vector<2x8x8x128xf32>
    %137 = arith.mulf %132, %136 : vector<2x8x8x128xf32>
    %138 = arith.addf %131, %137 : vector<2x8x8x128xf32>
    %c0_99 = arith.constant 0 : index
    %c0_100 = arith.constant 0 : index
    %c1_101 = arith.constant 1 : index
    %c0_102 = arith.constant 0 : index
    %139 = vector.load %arg17[%c0_99, %c0_100, %c1_101, %c0_102] : memref<2x10x10x128xf32, #tpu.memory_space<vmem>>, vector<2x8x8x128xf32>
    %140 = vector.extract_strided_slice %23 {offsets = [1, 0], sizes = [1, 128], strides = [1, 1]} : vector<9x128xf32> to vector<1x128xf32>
    %141 = vector.shape_cast %140 : vector<1x128xf32> to vector<128xf32>
    %142 = vector.shape_cast %141 : vector<128xf32> to vector<1x1x1x128xf32>
    %143 = vector.broadcast %142 : vector<1x1x1x128xf32> to vector<2x8x8x128xf32>
    %144 = arith.mulf %139, %143 : vector<2x8x8x128xf32>
    %145 = arith.addf %138, %144 : vector<2x8x8x128xf32>
    %c0_103 = arith.constant 0 : index
    %c0_104 = arith.constant 0 : index
    %c2_105 = arith.constant 2 : index
    %c0_106 = arith.constant 0 : index
    %146 = vector.load %arg17[%c0_103, %c0_104, %c2_105, %c0_106] : memref<2x10x10x128xf32, #tpu.memory_space<vmem>>, vector<2x8x8x128xf32>
    %147 = vector.extract_strided_slice %23 {offsets = [2, 0], sizes = [1, 128], strides = [1, 1]} : vector<9x128xf32> to vector<1x128xf32>
    %148 = vector.shape_cast %147 : vector<1x128xf32> to vector<128xf32>
    %149 = vector.shape_cast %148 : vector<128xf32> to vector<1x1x1x128xf32>
    %150 = vector.broadcast %149 : vector<1x1x1x128xf32> to vector<2x8x8x128xf32>
    %151 = arith.mulf %146, %150 : vector<2x8x8x128xf32>
    %152 = arith.addf %145, %151 : vector<2x8x8x128xf32>
    %c0_107 = arith.constant 0 : index
    %c1_108 = arith.constant 1 : index
    %c0_109 = arith.constant 0 : index
    %c0_110 = arith.constant 0 : index
    %153 = vector.load %arg17[%c0_107, %c1_108, %c0_109, %c0_110] : memref<2x10x10x128xf32, #tpu.memory_space<vmem>>, vector<2x8x8x128xf32>
    %154 = vector.extract_strided_slice %23 {offsets = [3, 0], sizes = [1, 128], strides = [1, 1]} : vector<9x128xf32> to vector<1x128xf32>
    %155 = vector.shape_cast %154 : vector<1x128xf32> to vector<128xf32>
    %156 = vector.shape_cast %155 : vector<128xf32> to vector<1x1x1x128xf32>
    %157 = vector.broadcast %156 : vector<1x1x1x128xf32> to vector<2x8x8x128xf32>
    %158 = arith.mulf %153, %157 : vector<2x8x8x128xf32>
    %159 = arith.addf %152, %158 : vector<2x8x8x128xf32>
    %c0_111 = arith.constant 0 : index
    %c1_112 = arith.constant 1 : index
    %c2_113 = arith.constant 2 : index
    %c0_114 = arith.constant 0 : index
    %160 = vector.load %arg17[%c0_111, %c1_112, %c2_113, %c0_114] : memref<2x10x10x128xf32, #tpu.memory_space<vmem>>, vector<2x8x8x128xf32>
    %161 = vector.extract_strided_slice %23 {offsets = [5, 0], sizes = [1, 128], strides = [1, 1]} : vector<9x128xf32> to vector<1x128xf32>
    %162 = vector.shape_cast %161 : vector<1x128xf32> to vector<128xf32>
    %163 = vector.shape_cast %162 : vector<128xf32> to vector<1x1x1x128xf32>
    %164 = vector.broadcast %163 : vector<1x1x1x128xf32> to vector<2x8x8x128xf32>
    %165 = arith.mulf %160, %164 : vector<2x8x8x128xf32>
    %166 = arith.addf %159, %165 : vector<2x8x8x128xf32>
    %c0_115 = arith.constant 0 : index
    %c2_116 = arith.constant 2 : index
    %c0_117 = arith.constant 0 : index
    %c0_118 = arith.constant 0 : index
    %167 = vector.load %arg17[%c0_115, %c2_116, %c0_117, %c0_118] : memref<2x10x10x128xf32, #tpu.memory_space<vmem>>, vector<2x8x8x128xf32>
    %168 = vector.extract_strided_slice %23 {offsets = [6, 0], sizes = [1, 128], strides = [1, 1]} : vector<9x128xf32> to vector<1x128xf32>
    %169 = vector.shape_cast %168 : vector<1x128xf32> to vector<128xf32>
    %170 = vector.shape_cast %169 : vector<128xf32> to vector<1x1x1x128xf32>
    %171 = vector.broadcast %170 : vector<1x1x1x128xf32> to vector<2x8x8x128xf32>
    %172 = arith.mulf %167, %171 : vector<2x8x8x128xf32>
    %173 = arith.addf %166, %172 : vector<2x8x8x128xf32>
    %c0_119 = arith.constant 0 : index
    %c2_120 = arith.constant 2 : index
    %c1_121 = arith.constant 1 : index
    %c0_122 = arith.constant 0 : index
    %174 = vector.load %arg17[%c0_119, %c2_120, %c1_121, %c0_122] : memref<2x10x10x128xf32, #tpu.memory_space<vmem>>, vector<2x8x8x128xf32>
    %175 = vector.extract_strided_slice %23 {offsets = [7, 0], sizes = [1, 128], strides = [1, 1]} : vector<9x128xf32> to vector<1x128xf32>
    %176 = vector.shape_cast %175 : vector<1x128xf32> to vector<128xf32>
    %177 = vector.shape_cast %176 : vector<128xf32> to vector<1x1x1x128xf32>
    %178 = vector.broadcast %177 : vector<1x1x1x128xf32> to vector<2x8x8x128xf32>
    %179 = arith.mulf %174, %178 : vector<2x8x8x128xf32>
    %180 = arith.addf %173, %179 : vector<2x8x8x128xf32>
    %c0_123 = arith.constant 0 : index
    %c2_124 = arith.constant 2 : index
    %c2_125 = arith.constant 2 : index
    %c0_126 = arith.constant 0 : index
    %181 = vector.load %arg17[%c0_123, %c2_124, %c2_125, %c0_126] : memref<2x10x10x128xf32, #tpu.memory_space<vmem>>, vector<2x8x8x128xf32>
    %182 = vector.extract_strided_slice %23 {offsets = [8, 0], sizes = [1, 128], strides = [1, 1]} : vector<9x128xf32> to vector<1x128xf32>
    %183 = vector.shape_cast %182 : vector<1x128xf32> to vector<128xf32>
    %184 = vector.shape_cast %183 : vector<128xf32> to vector<1x1x1x128xf32>
    %185 = vector.broadcast %184 : vector<1x1x1x128xf32> to vector<2x8x8x128xf32>
    %186 = arith.mulf %181, %185 : vector<2x8x8x128xf32>
    %187 = arith.addf %180, %186 : vector<2x8x8x128xf32>
    %188 = vector.shape_cast %25 : vector<128xf32> to vector<1x1x1x128xf32>
    %189 = vector.broadcast %188 : vector<1x1x1x128xf32> to vector<2x8x8x128xf32>
    %190 = arith.addf %187, %189 : vector<2x8x8x128xf32>
    %cst_127 = arith.constant 0.000000e+00 : f32
    %191 = vector.broadcast %cst_127 : f32 to vector<2x8x8x128xf32>
    %192 = arith.maximumf %190, %191 : vector<2x8x8x128xf32>
    %193 = vector.shape_cast %192 : vector<2x8x8x128xf32> to vector<128x128xf32>
    %194 = arith.truncf %193 : vector<128x128xf32> to vector<128x128xbf16>
    %cst_128 = arith.constant dense<0.000000e+00> : vector<128x32xf32>
    %195 = tpu.matmul %194, %26, %cst_128 {dimension_numbers = #tpu.dot_dimension_numbers<[1], [0], [0], [1], [0, 0, 1, 1], [], []>} : vector<128x128xbf16>, vector<128x32xbf16>, vector<128x32xf32> -> vector<128x32xf32>
    %196 = vector.shape_cast %28 : vector<32xf32> to vector<1x32xf32>
    %197 = vector.broadcast %196 : vector<1x32xf32> to vector<128x32xf32>
    %198 = arith.addf %195, %197 : vector<128x32xf32>
    %199 = vector.shape_cast %198 : vector<128x32xf32> to vector<2x8x8x32xf32>
    %200 = arith.addf %116, %199 : vector<2x8x8x32xf32>
    %c0_129 = arith.constant 0 : index
    %c0_130 = arith.constant 0 : index
    %c0_131 = arith.constant 0 : index
    %c0_132 = arith.constant 0 : index
    %201 = vector.load %arg16[%c0_129, %c0_130, %c0_131, %c0_132] : memref<2x8x8x32xf32, #tpu.memory_space<vmem>>, vector<2x8x8x32xf32>
    tpu.vector_store %arg16[%c0_129, %c0_130, %c0_131, %c0_132], %200 {strides = array<i32>} : memref<2x8x8x32xf32, #tpu.memory_space<vmem>>, vector<2x8x8x32xf32>,
    return
  }
  func.func @transform_0(%arg0: i32) -> (i32, i32, i32, i32) {
    %c0_i32 = arith.constant 0 : i32
    %c0_i32_0 = arith.constant 0 : i32
    %c0_i32_1 = arith.constant 0 : i32
    %c0_i32_2 = arith.constant 0 : i32
    return %arg0, %c0_i32, %c0_i32_0, %c0_i32_1 : i32, i32, i32, i32
  }
  func.func @transform_1(%arg0: i32) -> (i32, i32, i32, i32) {
    %c0_i32 = arith.constant 0 : i32
    %c0_i32_0 = arith.constant 0 : i32
    %c0_i32_1 = arith.constant 0 : i32
    %c0_i32_2 = arith.constant 0 : i32
    return %arg0, %c0_i32, %c0_i32_0, %c0_i32_1 : i32, i32, i32, i32
  }
  func.func @transform_2(%arg0: i32) -> (i32, i32, i32, i32) {
    %c0_i32 = arith.constant 0 : i32
    %c0_i32_0 = arith.constant 0 : i32
    %c0_i32_1 = arith.constant 0 : i32
    %c0_i32_2 = arith.constant 0 : i32
    return %arg0, %c0_i32, %c0_i32_0, %c0_i32_1 : i32, i32, i32, i32
  }
  func.func @transform_3(%arg0: i32) -> (i32, i32) {
    %c0_i32 = arith.constant 0 : i32
    %c0_i32_0 = arith.constant 0 : i32
    %c0_i32_1 = arith.constant 0 : i32
    return %c0_i32, %c0_i32_0 : i32, i32
  }
  func.func @transform_4(%arg0: i32) -> (i32, i32) {
    %c0_i32 = arith.constant 0 : i32
    %c0_i32_0 = arith.constant 0 : i32
    %c0_i32_1 = arith.constant 0 : i32
    return %c0_i32, %c0_i32_0 : i32, i32
  }
  func.func @transform_5(%arg0: i32) -> (i32, i32) {
    %c0_i32 = arith.constant 0 : i32
    %c0_i32_0 = arith.constant 0 : i32
    %c0_i32_1 = arith.constant 0 : i32
    return %c0_i32, %c0_i32_0 : i32, i32
  }
  func.func @transform_6(%arg0: i32) -> (i32, i32) {
    %c0_i32 = arith.constant 0 : i32
    %c0_i32_0 = arith.constant 0 : i32
    %c0_i32_1 = arith.constant 0 : i32
    return %c0_i32, %c0_i32_0 : i32, i32
  }
  func.func @transform_7(%arg0: i32) -> (i32, i32) {
    %c0_i32 = arith.constant 0 : i32
    %c0_i32_0 = arith.constant 0 : i32
    %c0_i32_1 = arith.constant 0 : i32
    return %c0_i32, %c0_i32_0 : i32, i32
  }
  func.func @transform_8(%arg0: i32) -> (i32, i32) {
    %c0_i32 = arith.constant 0 : i32
    %c0_i32_0 = arith.constant 0 : i32
    %c0_i32_1 = arith.constant 0 : i32
    return %c0_i32, %c0_i32_0 : i32, i32
  }
  func.func @transform_9(%arg0: i32) -> (i32, i32) {
    %c0_i32 = arith.constant 0 : i32
    %c0_i32_0 = arith.constant 0 : i32
    %c0_i32_1 = arith.constant 0 : i32
    return %c0_i32, %c0_i32_0 : i32, i32
  }
  func.func @transform_10(%arg0: i32) -> (i32, i32) {
    %c0_i32 = arith.constant 0 : i32
    %c0_i32_0 = arith.constant 0 : i32
    %c0_i32_1 = arith.constant 0 : i32
    return %c0_i32, %c0_i32_0 : i32, i32
  }
  func.func @transform_11(%arg0: i32) -> (i32, i32) {
    %c0_i32 = arith.constant 0 : i32
    %c0_i32_0 = arith.constant 0 : i32
    %c0_i32_1 = arith.constant 0 : i32
    return %c0_i32, %c0_i32_0 : i32, i32
  }
  func.func @transform_12(%arg0: i32) -> (i32, i32) {
    %c0_i32 = arith.constant 0 : i32
    %c0_i32_0 = arith.constant 0 : i32
    %c0_i32_1 = arith.constant 0 : i32
    return %c0_i32, %c0_i32_0 : i32, i32
  }
  func.func @transform_13(%arg0: i32) -> (i32, i32) {
    %c0_i32 = arith.constant 0 : i32
    %c0_i32_0 = arith.constant 0 : i32
    %c0_i32_1 = arith.constant 0 : i32
    return %c0_i32, %c0_i32_0 : i32, i32
  }
  func.func @transform_14(%arg0: i32) -> (i32, i32) {
    %c0_i32 = arith.constant 0 : i32
    %c0_i32_0 = arith.constant 0 : i32
    %c0_i32_1 = arith.constant 0 : i32
    return %c0_i32, %c0_i32_0 : i32, i32
  }
  func.func @transform_15(%arg0: i32) -> (i32, i32, i32, i32) {
    %c0_i32 = arith.constant 0 : i32
    %c0_i32_0 = arith.constant 0 : i32
    %c0_i32_1 = arith.constant 0 : i32
    %c0_i32_2 = arith.constant 0 : i32
    return %arg0, %c0_i32, %c0_i32_0, %c0_i32_1 : i32, i32, i32, i32
  }
}

</mosaic_0001>

<bundles_post_ra>
// kernel: tpu_custom_call.1
= control target key start
LH: loop header
LB: loop body
LE: loop exit
PB: predicated region body
PF: predicated region fallthrough
CT: control target
= control target key end

     0   :  { %20 = vsyncpa [#allocation4], 0  ;;  %s3082_s0 = inlined_call_operand.vmem [shape: bf16[2,8,8,32], index: 0, kind: input, shape index: {}]   ;;  %s3083_s1 = inlined_call_operand.vmem [shape: bf16[2,8,8,32], index: 1, kind: input, shape index: {}]   ;;  %s3084_s2 = inlined_call_operand.hbm [shape: f32[2,1,1,32], index: 2, kind: input, shape index: {}]   ;;  %s3085_s3 = inlined_call_operand.vmem [shape: bf16[32,128], index: 3, kind: input, shape index: {}]   ;;  %s3086_s4 = inlined_call_operand.vmem [shape: f32[1,128], index: 4, kind: input, shape index: {}]   ;;  %s3087_s5 = inlined_call_operand.hbm [shape: f32[9,128], index: 5, kind: input, shape index: {}]   ;;  %s3088_s6 = inlined_call_operand.vmem [shape: f32[1,128], index: 6, kind: input, shape index: {}]   ;;  %s3089_s7 = inlined_call_operand.vmem [shape: bf16[128,32], index: 7, kind: input, shape index: {}]   ;;  %s3090_s8 = inlined_call_operand.vmem [shape: f32[1,32], index: 8, kind: input, shape index: {}]   ;;  %s3091_s9 = inlined_call_operand.hbm [shape: bf16[32,128], index: 9, kind: input, shape index: {}]   ;;  %s3092_s10 = inlined_call_operand.vmem [shape: f32[1,128], index: 10, kind: input, shape index: {}]   ;;  %s3093_s11 = inlined_call_operand.hbm [shape: f32[9,128], index: 11, kind: input, shape index: {}]   ;;  %s3094_s12 = inlined_call_operand.vmem [shape: f32[1,128], index: 12, kind: input, shape index: {}]   ;;  %s3095_s13 = inlined_call_operand.vmem [shape: bf16[128,32], index: 13, kind: input, shape index: {}]   ;;  %s3096_s14 = inlined_call_operand.vmem [shape: f32[1,32], index: 14, kind: input, shape index: {}]   ;;  %s3097_s15 = inlined_call_operand.hbm [shape: f32[2,8,8,32], index: 15, kind: output, shape index: {}]  }
   0x1   :  { %21 = vsyncpa [#allocation7], 0 }
   0x2   :  { %22 = vsyncpa [#allocation10], 0  ;;  %s49_s20 = sshll.u32 %s3087_s5, 4  ;;  %s50_s20 = int_to_ptr.hbm [resolvable:$true] %s49_s20 }
   0x3   :  { %23 = vsyncpa [#allocation5], 0  ;;  %s2110_s21 = smov [#allocation6]   ;;  %s32_s25 = sshll.u32 %s3084_s2, 4  ;;  %s33_s25 = int_to_ptr.hbm [resolvable:$true] %s32_s25 }
   0x4   :  { %s51_s22 = sshll.u32 %s2110_s21, 4  ;;  %s3098_s26 = smov 128   ;;  %s52_s22 = int_to_ptr.vmem [resolvable:$true] %s51_s22 }
   0x5   :  { %s2112_s27 = smov 8   ;;  %s2113_s28 = smov [#allocation3]  }
   0x6   :  { %57 = dma.hbm_to_vmem [thread:$0]  %s50_s20, 256, %s52_s22, [#allocation7], %s3098_s26, %s3098_s26, %s2112_s27  }
   0x7   :  { %s34_s29 = sshll.u32 %s2113_s28, 4  ;;  %s2114_s5 = smov 16   ;;  %s35_s29 = int_to_ptr.vmem [resolvable:$true] %s34_s29 }
   0x8   :  { %s2115_s30 = smov 1   ;;  %s68_s18 = sshll.u32 %s3091_s9, 4  ;;  %s69_s18 = int_to_ptr.hbm [resolvable:$true] %s68_s18 }
   0x9   :  { %40 = dma.hbm_to_vmem [thread:$0]  %s33_s25, 32, %s35_s29, [#allocation4], %s2114_s5, %s2114_s5, %s2115_s30  }
   0xa   :  { %s2116_s19 = smov [#allocation8]   ;;  %s83_s24 = sshll.u32 %s3093_s11, 4  ;;  %s84_s24 = int_to_ptr.hbm [resolvable:$true] %s83_s24 }
   0xb   :  { %s70_s2 = sshll.u32 %s2116_s19, 4  ;;  %s2117_s20 = smov 64   ;;  %s71_s2 = int_to_ptr.vmem [resolvable:$true] %s70_s2 }
   0xc   :  { %s2118_s22 = smov 4   ;;  %s2119_s28 = smov [#allocation9]  }
   0xd   :  { %76 = dma.hbm_to_vmem [thread:$0]  %s69_s18, 256, %s71_s2, [#allocation7], %s2117_s20, %s2117_s20, %s2118_s22  }
   0xe   :  { %s85_s26 = sshll.u32 %s2119_s28, 4  ;;  %s3118_s25 = smov 128   ;;  %s86_s26 = int_to_ptr.vmem [resolvable:$true] %s85_s26 }
   0xf   :  { %91 = dma.hbm_to_vmem [thread:$0]  %s84_s24, 256, %s86_s26, [#allocation10], %s3118_s25, %s3118_s25, %s2112_s27  }
  0x10   :  { %2102 = dma.done.wait [#allocation4], 32  }
  0x11   :  { %2103 = vsyncadd [#allocation4], 4294967264 }
  0x12   :  { %2104 = dma.done.wait [#allocation7], 512  }
  0x13   :  { %2105 = vsyncadd [#allocation7], 4294966784 }
  0x14   :  { %2106 = dma.done.wait [#allocation10], 256  }
  0x15   :  { %2107 = vsyncadd [#allocation10], 4294967040  ;;  %v1863_v0 = vld [vmem:[%s3085_s3 + $0x8] sm:$0xff]  ;;  %v1883_v1 = vld [vmem:[%s3082_s0] sm:$0xff]   ;;  %vm319_vm0 = vcmask 261120   ;;  %v2120_v58 = vmov 0.0  }
  0x16   :  { %v1884_v2 = vunpack.c.l.bf16 %v1883_v1  ;;  %v1885_v3 = vunpack.c.h.bf16 %v1883_v1  ;;  %v2229_v4 = vld [vmem:[%s3083_s1] sm:$0xff]   ;;  %350 = vmatpush.bf16.msra.mxu0 %v1863_v0  ;;  %v1946_v11 = vld [vmem:[%s3082_s0 + $0x8] sm:$0xff]   ;;  %v1947_v20 = vld [vmem:[%s3082_s0 + $0x10] sm:$0xff]   ;;  %181 = vst [vmem:[#allocation2] sm:$0xff] %v2120_v58 }
  0x17   :  { %v1862_v5 = vld [vmem:[%s3085_s3] sm:$0xff]  ;;  %v3115_v6 = vunpack.c.l.bf16 %v2229_v4  ;;  %v3114_v7 = vunpack.c.h.bf16 %v2229_v4  ;;  %v2253_v12 = vld [vmem:[%s3083_s1 + $0x8] sm:$0xff]   ;;  %v1888_v13 = vunpack.c.l.bf16 %v1946_v11  ;;  %v1889_v14 = vunpack.c.h.bf16 %v1946_v11  ;;  %v2274_v21 = vld [vmem:[%s3083_s1 + $0x10] sm:$0xff]   ;;  %182 = vst [vmem:[#allocation2 + $0x8] sm:$0x3] %v2120_v58 }
  0x18   :  { %v3113_v15 = vunpack.c.l.bf16 %v2253_v12  ;;  %v3112_v16 = vunpack.c.h.bf16 %v2253_v12  ;;  %v1892_v22 = vunpack.c.l.bf16 %v1947_v20  ;;  %v1893_v23 = vunpack.c.h.bf16 %v1947_v20  ;;  %v1948_v29 = vld [vmem:[%s3082_s0 + $0x18] sm:$0xff]   ;;  %v1949_v38 = vld [vmem:[%s3082_s0 + $0x20] sm:$0xff]   ;;  %v1950_v47 = vld [vmem:[%s3082_s0 + $0x28] sm:$0xff]   ;;  %190 = vst [vmem:[#allocation2] sm:$0x1] %v2120_v58 }
  0x19   :  { %v2238_v8 = vmul.f32 %v3115_v6, %v1884_v2  ;;  %v2242_v9 = vmul.f32 %v3114_v7, %v1885_v3  ;;  %v3111_v24 = vunpack.c.l.bf16 %v2274_v21  ;;  %v3110_v25 = vunpack.c.h.bf16 %v2274_v21  ;;  %v2295_v30 = vld [vmem:[%s3083_s1 + $0x18] sm:$0xff]   ;;  %v2316_v39 = vld [vmem:[%s3083_s1 + $0x20] sm:$0xff]   ;;  %v2337_v48 = vld [vmem:[%s3083_s1 + $0x28] sm:$0xff]   ;;  %191 = vst [vmem:[#allocation2 + $0x10] sm:$0x1] %v2120_v58 }
  0x1a   :  { %351 = vmatpush.bf16.msra.mxu0 %v1862_v5  ;;  %v2259_v17 = vmul.f32 %v3113_v15, %v1888_v13  ;;  %v2263_v18 = vmul.f32 %v3112_v16, %v1889_v14  ;;  %v1896_v31 = vunpack.c.l.bf16 %v1948_v29  ;;  %v1897_v32 = vunpack.c.h.bf16 %v1948_v29  ;;  %v1951_v56 = vld [vmem:[%s3082_s0 + $0x30] sm:$0xff]   ;;  %210 = vst [vmem:[#allocation2 + $0x9] sm:$0x1] %v2120_v58  ;;  %v1952_v2 = vld [vmem:[%s3082_s0 + $0x38] sm:$0xff]   ;;  %v1868_v29 = vld [vmem:[%s3089_s7 + $0x20] sm:$0xff] }
  0x1b   :  { %v296_v10 = vpack.c.bf16 %v2242_v9, %v2238_v8  ;;  %v2280_v26 = vmul.f32 %v3111_v24, %v1892_v22  ;;  %v2284_v27 = vmul.f32 %v3110_v25, %v1893_v23  ;;  %v3109_v33 = vunpack.c.l.bf16 %v2295_v30  ;;  %v2358_v57 = vld [vmem:[%s3083_s1 + $0x30] sm:$0xff]   ;;  %183 = vst [vmem:[#allocation2 + $0xa0] sm:$0xff] %v2120_v58  ;;  %v2395_v3 = vld [vmem:[%s3083_s1 + $0x38] sm:$0xff]  }
  0x1c   :  { %v297_v19 = vpack.c.bf16 %v2263_v18, %v2259_v17  ;;  %v3108_v34 = vunpack.c.h.bf16 %v2295_v30  ;;  %v1900_v40 = vunpack.c.l.bf16 %v1949_v38  ;;  %v1901_v41 = vunpack.c.h.bf16 %v1949_v38  ;;  %184 = vst [vmem:[#allocation2 + $0xa8] sm:$0x3] %v2120_v58  ;;  %v1871_v14 = vld [vmem:[%s3089_s7 + $0x38] sm:$0xff]  ;;  %v1870_v23 = vld [vmem:[%s3089_s7 + $0x30] sm:$0xff] }
  0x1d   :  { %1774 = vmatmul.msk.bf16.vlgmr.msra.gmra.mxu0 %vm319_vm0, %v296_v10  ;;  %v298_v28 = vpack.c.bf16 %v2284_v27, %v2280_v26  ;;  %v2301_v35 = vmul.f32 %v3109_v33, %v1896_v31  ;;  %v3107_v42 = vunpack.c.l.bf16 %v2316_v39  ;;  %v3106_v43 = vunpack.c.h.bf16 %v2316_v39  ;;  %186 = vst [vmem:[#allocation2 + $0x90] sm:$0xff] %v2120_v58  ;;  %930 = vmatpush.bf16.msra.mxu1 %v1871_v14  ;;  %v1867_v31 = vld [vmem:[%s3089_s7 + $0x18] sm:$0xff]  ;;  %v1866_v38 = vld [vmem:[%s3089_s7 + $0x10] sm:$0xff] }
  0x1e   :  { %v2305_v36 = vmul.f32 %v3108_v34, %v1897_v32  ;;  %v1904_v49 = vunpack.c.l.bf16 %v1950_v47  ;;  %v1905_v50 = vunpack.c.h.bf16 %v1950_v47  ;;  %v3105_v51 = vunpack.c.l.bf16 %v2337_v48  ;;  %187 = vst [vmem:[#allocation2 + $0x98] sm:$0x3] %v2120_v58  ;;  %v235_v32 = vld [vmem:[#allocation6] sm:$0xff] }
  0x1f   :  { %v2322_v44 = vmul.f32 %v3107_v42, %v1900_v40  ;;  %v2326_v45 = vmul.f32 %v3106_v43, %v1901_v41  ;;  %v3104_v52 = vunpack.c.h.bf16 %v2337_v48  ;;  %v1908_v59 = vunpack.c.l.bf16 %v1951_v56  ;;  %188 = vst [vmem:[#allocation2 + $0x130] sm:$0xff] %v2120_v58  ;;  %v2506_v43 = vld [vmem:[#allocation6 + $0x8] ss:$0 sm:$0xff] }
  0x20   :  { %v299_v37 = vpack.c.bf16 %v2305_v36, %v2301_v35  ;;  %v2343_v53 = vmul.f32 %v3105_v51, %v1904_v49  ;;  %v1909_v60 = vunpack.c.h.bf16 %v1951_v56  ;;  %v3103_v61 = vunpack.c.l.bf16 %v2358_v57  ;;  %189 = vst [vmem:[#allocation2 + $0x138] sm:$0x3] %v2120_v58  ;;  %v443_v49 = vld [vmem:[#allocation2] sm:$0xff] }
  0x21   :  { %v300_v46 = vpack.c.bf16 %v2326_v45, %v2322_v44  ;;  %v2347_v54 = vmul.f32 %v3104_v52, %v1905_v50  ;;  %v3102_v62 = vunpack.c.h.bf16 %v2358_v57  ;;  %192 = vst [vmem:[#allocation2 + $0x20] sm:$0x1] %v2120_v58  ;;  %v1912_v5 = vunpack.c.l.bf16 %v1952_v2  ;;  %931 = vmatpush.bf16.msra.mxu1 %v1870_v23 }
  0x22   :  { %v2371_v63 = vmul.f32 %v3103_v61, %v1908_v59  ;;  %193 = vst [vmem:[#allocation2 + $0x30] sm:$0x1] %v2120_v58  ;;  %v1913_v10 = vunpack.c.h.bf16 %v1952_v2  ;;  %v3101_v11 = vunpack.c.l.bf16 %v2395_v3  ;;  %v3100_v13 = vunpack.c.h.bf16 %v2395_v3  ;;  %v1864_v2 = vld [vmem:[%s3089_s7] sm:$0xff] }
  0x23   :  { %v301_v55 = vpack.c.bf16 %v2347_v54, %v2343_v53  ;;  %v2375_v0 = vmul.f32 %v3102_v62, %v1909_v60  ;;  %194 = vst [vmem:[#allocation2 + $0x40] sm:$0x1] %v2120_v58  ;;  %v2461_v41 = vperm.slane %v235_v32, 0  ;;  %v2465_v47 = vperm.slane %v235_v32, 4  ;;  %v492_v60 = vld [vmem:[#allocation2 + $0x1] sm:$0xff] }
  0x24   :  { %195 = vst [vmem:[#allocation2 + $0x50] sm:$0x1] %v2120_v58  ;;  %v2415_v20 = vmul.f32 %v3100_v13, %v1913_v10  ;;  %v2481_v10 = vperm.slane %v235_v32, 2  ;;  %v2490_v13 = vperm.slane %v235_v32, 5 }
  0x25   :  { %v302_v1 = vpack.c.bf16 %v2375_v0, %v2371_v63  ;;  %196 = vst [vmem:[#allocation2 + $0x60] sm:$0x1] %v2120_v58  ;;  %v460_v56 = vmul.f32 %v2461_v41, %v443_v49 }
  0x26   :  { %3119 = vst [vmem:[#allocation16_spill] sm:$0xff] %v2395_v3 }
  0x27   :  { %197 = vst [vmem:[#allocation2 + $0x70] sm:$0x1] %v2120_v58 }
  0x28   :  { %198 = vst [vmem:[#allocation2 + $0x80] sm:$0x1] %v2120_v58 }
  0x29   :  { %201 = vst [vmem:[#allocation2 + $0xb0] sm:$0x1] %v2120_v58 }
  0x2a   :  { %202 = vst [vmem:[#allocation2 + $0xc0] sm:$0x1] %v2120_v58 }
  0x2b   :  { %203 = vst [vmem:[#allocation2 + $0xd0] sm:$0x1] %v2120_v58 }
  0x2c   :  { %204 = vst [vmem:[#allocation2 + $0xe0] sm:$0x1] %v2120_v58 }
  0x2d   :  { %1775 = vmatmul.msk.bf16.gmra.mxu0 %vm319_vm0, %v297_v19  ;;  %205 = vst [vmem:[#allocation2 + $0xf0] sm:$0x1] %v2120_v58  ;;  %v2411_v19 = vmul.f32 %v3101_v11, %v1912_v5 }
  0x2e   :  { %206 = vst [vmem:[#allocation2 + $0x100] sm:$0x1] %v2120_v58 }
  0x2f   :  { %207 = vst [vmem:[#allocation2 + $0x110] sm:$0x1] %v2120_v58  ;;  %v303_v22 = vpack.c.bf16 %v2415_v20, %v2411_v19 }
  0x30   :  { %208 = vst [vmem:[#allocation2 + $0x120] sm:$0x1] %v2120_v58 }
  0x31   :  { %211 = vst [vmem:[#allocation2 + $0x19] sm:$0x1] %v2120_v58 }
  0x32   :  { %212 = vst [vmem:[#allocation2 + $0x29] sm:$0x1] %v2120_v58 }
  0x33   :  { %213 = vst [vmem:[#allocation2 + $0x39] sm:$0x1] %v2120_v58 }
  0x34   :  { %214 = vst [vmem:[#allocation2 + $0x49] sm:$0x1] %v2120_v58 }
  0x35   :  { %215 = vst [vmem:[#allocation2 + $0x59] sm:$0x1] %v2120_v58 }
  0x36   :  { %216 = vst [vmem:[#allocation2 + $0x69] sm:$0x1] %v2120_v58 }
  0x37   :  { %217 = vst [vmem:[#allocation2 + $0x79] sm:$0x1] %v2120_v58 }
  0x38   :  { %218 = vst [vmem:[#allocation2 + $0x89] sm:$0x1] %v2120_v58 }
  0x39   :  { %221 = vst [vmem:[#allocation2 + $0xb9] sm:$0x1] %v2120_v58 }
  0x3a   :  { %222 = vst [vmem:[#allocation2 + $0xc9] sm:$0x1] %v2120_v58 }
  0x3b   :  { %223 = vst [vmem:[#allocation2 + $0xd9] sm:$0x1] %v2120_v58 }
  0x3c   :  { %224 = vst [vmem:[#allocation2 + $0xe9] sm:$0x1] %v2120_v58 }
  0x3d   :  { %1776 = vmatmul.msk.bf16.gmra.mxu0 %vm319_vm0, %v298_v28  ;;  %v1869_v28 = vld [vmem:[%s3089_s7 + $0x28] sm:$0xff]  ;;  %225 = vst [vmem:[#allocation2 + $0xf9] sm:$0x1] %v2120_v58 }
  0x3e   :  { %932 = vmatpush.bf16.msra.mxu1 %v1869_v28  ;;  %226 = vst [vmem:[#allocation2 + $0x109] sm:$0x1] %v2120_v58  ;;  %v2484_v28 = vperm.slane %v235_v32, 3 }
  0x3f   :  { %227 = vst [vmem:[#allocation2 + $0x119] sm:$0x1] %v2120_v58 }
  0x40   :  { %228 = vst [vmem:[#allocation2 + $0x129] sm:$0x1] %v2120_v58 }
  0x41   :  { %199 = vst [vmem:[#allocation2 + $0x90] sm:$0x1] %v2120_v58 }
  0x42   :  { %933 = vmatpush.bf16.msra.mxu1 %v1868_v29  ;;  %200 = vst [vmem:[#allocation2 + $0xa0] sm:$0x1] %v2120_v58 }
  0x43   :  { %209 = vst [vmem:[#allocation2 + $0x130] sm:$0x1] %v2120_v58 }
  0x44   :  { %219 = vst [vmem:[#allocation2 + $0x99] sm:$0x1] %v2120_v58 }
  0x45   :  { %220 = vst [vmem:[#allocation2 + $0xa9] sm:$0x1] %v2120_v58 }
  0x46   :  { %934 = vmatpush.bf16.msra.mxu1 %v1867_v31  ;;  %229 = vst [vmem:[#allocation2 + $0x139] sm:$0x1] %v2120_v58 }
  0x4a   :  { %935 = vmatpush.bf16.msra.mxu1 %v1866_v38 }
  0x4d   :  { %1777 = vmatmul.msk.bf16.gmra.mxu0 %vm319_vm0, %v299_v37  ;;  %v2453_v37 = vld [vmem:[%s3086_s4] ss:$0 sm:$0xff] }
  0x5d   :  { %1778 = vmatmul.msk.bf16.gmra.mxu0 %vm319_vm0, %v300_v46 }
  0x6d   :  { %1779 = vmatmul.msk.bf16.gmra.mxu0 %vm319_vm0, %v301_v55  ;;  %v1865_v55 = vld [vmem:[%s3089_s7 + $0x8] sm:$0xff] }
  0x6e   :  { %936 = vmatpush.bf16.msra.mxu1 %v1865_v55 }
  0x72   :  { %937 = vmatpush.bf16.msra.mxu1 %v1864_v2 }
  0x7d   :  { %1780 = vmatmul.msk.bf16.gmra.mxu0 %vm319_vm0, %v302_v1  ;;  %v2475_v1 = vperm.slane %v235_v32, 1 }
  0x7f   :  { %v509_v58 = vmul.f32 %v2475_v1, %v492_v60 }
  0x8d   :  { %1781 = vmatmul.msk.bf16.gmra.mxu0 %vm319_vm0, %v303_v22  ;;  %v541_v22 = vld [vmem:[#allocation2 + $0x2] sm:$0xff] }
  0x8e   :  { %v558_v38 = vmul.f32 %v2481_v10, %v541_v22 }
  0x9a   :  { %v353_v40 = vpop.f32.mrf.mxu0 }
  0x9b   :  { %v354_v46 = vadd.f32 %v2453_v37, %v353_v40 }
  0x9d   :  { %v393_v50 = vmax.f32 %v354_v46, 0.0 }
  0x9f   :  { %410 = vst [vmem:[#allocation2 + $0x11] sm:$0xff] %v393_v50  ;;  %v427_v59 = vmul.f32 %v2465_v47, %v393_v50 }
  0xa1   :  { %v476_v5 = vadd.f32 %v460_v56, %v427_v59 }
  0xa2   :  { %v355_v14 = vpop.f32.mrf.mxu0 }
  0xa3   :  { %v356_v23 = vadd.f32 %v2453_v37, %v355_v14  ;;  %v525_v31 = vadd.f32 %v509_v58, %v476_v5  ;;  %v510_v5 = vmul.f32 %v2475_v1, %v393_v50  ;;  %v2494_v58 = vperm.slane %v235_v32, 6 }
  0xa5   :  { %v394_v29 = vmax.f32 %v356_v23, 0.0  ;;  %v574_v56 = vadd.f32 %v558_v38, %v525_v31 }
  0xa6   :  { %v590_v40 = vld [vmem:[#allocation2 + $0x10] sm:$0xff] }
  0xa7   :  { %411 = vst [vmem:[#allocation2 + $0x21] sm:$0xff] %v394_v29  ;;  %v428_v46 = vmul.f32 %v2465_v47, %v394_v29  ;;  %v461_v49 = vmul.f32 %v590_v40, %v2461_v41  ;;  %v607_v55 = vmul.f32 %v2484_v28, %v590_v40  ;;  %v542_v2 = vld [vmem:[#allocation2 + $0x12] sm:$0xff]  ;;  %v2499_v40 = vperm.slane %v235_v32, 7 }
  0xa8   :  { %v656_v61 = vmul.f32 %v2490_v13, %v542_v2  ;;  %v511_v42 = vmul.f32 %v2475_v1, %v394_v29 }
  0xa9   :  { %v477_v59 = vadd.f32 %v461_v49, %v428_v46  ;;  %v623_v23 = vadd.f32 %v607_v55, %v574_v56  ;;  %v559_v46 = vmul.f32 %v2481_v10, %v542_v2  ;;  %v755_v51 = vmul.f32 %v2499_v40, %v394_v29 }
  0xaa   :  { %v358_v60 = vpop.f32.mrf.mxu0 }
  0xab   :  { %v359_v14 = vadd.f32 %v2453_v37, %v358_v60  ;;  %v526_v11 = vadd.f32 %v510_v5, %v477_v59  ;;  %v672_v55 = vadd.f32 %v656_v61, %v623_v23 }
  0xad   :  { %v395_v22 = vmax.f32 %v359_v14, 0.0  ;;  %v575_v56 = vadd.f32 %v559_v46, %v526_v11 }
  0xae   :  { %v591_v62 = vld [vmem:[#allocation2 + $0x20] sm:$0xff] }
  0xaf   :  { %412 = vst [vmem:[#allocation2 + $0x31] sm:$0xff] %v395_v22  ;;  %v429_v31 = vmul.f32 %v2465_v47, %v395_v22  ;;  %v462_v38 = vmul.f32 %v591_v62, %v2461_v41  ;;  %v608_v49 = vmul.f32 %v2484_v28, %v591_v62  ;;  %v706_v50 = vmul.f32 %v2494_v58, %v591_v62  ;;  %v543_v5 = vld [vmem:[#allocation2 + $0x22] sm:$0xff] }
  0xb0   :  { %v657_v62 = vmul.f32 %v2490_v13, %v543_v5 }
  0xb1   :  { %v478_v60 = vadd.f32 %v462_v38, %v429_v31  ;;  %v722_v14 = vadd.f32 %v706_v50, %v672_v55  ;;  %v624_v32 = vadd.f32 %v608_v49, %v575_v56  ;;  %v804_v31 = vmul.f32 %v2506_v43, %v543_v5 }
  0xb2   :  { %v360_v59 = vpop.f32.mrf.mxu0  ;;  %v560_v38 = vmul.f32 %v2481_v10, %v543_v5 }
  0xb3   :  { %v361_v52 = vadd.f32 %v2453_v37, %v360_v59  ;;  %v771_v34 = vadd.f32 %v755_v51, %v722_v14  ;;  %v527_v33 = vadd.f32 %v511_v42, %v478_v60  ;;  %v673_v49 = vadd.f32 %v657_v62, %v624_v32  ;;  %v2519_v42 = vld [vmem:[%s3088_s6] ss:$0 sm:$0xff]  ;;  %s1751_s6 = sshll.u32 %s3097_s15, 4  ;;  %s1752_s6 = int_to_ptr.hbm [resolvable:$true] %s1751_s6 }
  0xb4   :  { %v756_v59 = vmul.f32 %v2499_v40, %v395_v22  ;;  %v512_v32 = vmul.f32 %v2475_v1, %v395_v22 }
  0xb5   :  { %v396_v2 = vmax.f32 %v361_v52, 0.0  ;;  %v820_v51 = vadd.f32 %v804_v31, %v771_v34  ;;  %v576_v55 = vadd.f32 %v560_v38, %v527_v33 }
  0xb6   :  { %v592_v61 = vld [vmem:[#allocation2 + $0x30] sm:$0xff] }
  0xb7   :  { %413 = vst [vmem:[#allocation2 + $0x41] sm:$0xff] %v396_v2  ;;  %v430_v11 = vmul.f32 %v2465_v47, %v396_v2  ;;  %v463_v23 = vmul.f32 %v592_v61, %v2461_v41  ;;  %v609_v46 = vmul.f32 %v2484_v28, %v592_v61  ;;  %v707_v29 = vmul.f32 %v2494_v58, %v592_v61  ;;  %v544_v52 = vld [vmem:[#allocation2 + $0x32] sm:$0xff] }
  0xb8   :  { %v805_v61 = vmul.f32 %v2506_v43, %v544_v52  ;;  %v839_v31 = vadd.f32 %v2519_v42, %v820_v51  ;;  %v658_v33 = vmul.f32 %v2490_v13, %v544_v52 }
  0xb9   :  { %v479_v50 = vadd.f32 %v463_v23, %v430_v11  ;;  %v723_v60 = vadd.f32 %v707_v29, %v673_v49  ;;  %v625_v5 = vadd.f32 %v609_v46, %v576_v55  ;;  %v561_v11 = vmul.f32 %v2481_v10, %v544_v52 }
  0xba   :  { %v363_v56 = vpop.f32.mrf.mxu0  ;;  %v855_v51 = vmax.f32 %v839_v31, 0.0 }
  0xbb   :  { %v364_v14 = vadd.f32 %v2453_v37, %v363_v56  ;;  %v772_v62 = vadd.f32 %v756_v59, %v723_v60  ;;  %v528_v25 = vadd.f32 %v512_v32, %v479_v50  ;;  %v674_v49 = vadd.f32 %v658_v33, %v625_v5 }
  0xbc   :  { %v757_v32 = vmul.f32 %v2499_v40, %v396_v2 }
  0xbd   :  { %v397_v34 = vmax.f32 %v364_v14, 0.0  ;;  %v821_v16 = vadd.f32 %v805_v61, %v772_v62  ;;  %v577_v55 = vadd.f32 %v561_v11, %v528_v25  ;;  %v513_v61 = vmul.f32 %v2475_v1, %v396_v2 }
  0xbe   :  { %v593_v24 = vld [vmem:[#allocation2 + $0x40] sm:$0xff] }
  0xbf   :  { %414 = vst [vmem:[#allocation2 + $0x51] sm:$0xff] %v397_v34  ;;  %v431_v23 = vmul.f32 %v2465_v47, %v397_v34  ;;  %v464_v38 = vmul.f32 %v593_v24, %v2461_v41  ;;  %v610_v22 = vmul.f32 %v2484_v28, %v593_v24  ;;  %v840_v46 = vadd.f32 %v2519_v42, %v821_v16  ;;  %v545_v14 = vld [vmem:[#allocation2 + $0x42] sm:$0xff] }
  0xc0   :  { %v708_v29 = vmul.f32 %v2494_v58, %v593_v24  ;;  %v659_v24 = vmul.f32 %v2490_v13, %v545_v14  ;;  %v806_v11 = vmul.f32 %v2506_v43, %v545_v14 }
  0xc1   :  { %v480_v50 = vadd.f32 %v464_v38, %v431_v23  ;;  %v856_v60 = vmax.f32 %v840_v46, 0.0  ;;  %v626_v62 = vadd.f32 %v610_v22, %v577_v55  ;;  %v562_v23 = vmul.f32 %v2481_v10, %v545_v14 }
  0xc2   :  { %v365_v56 = vpop.f32.mrf.mxu0  ;;  %v724_v59 = vadd.f32 %v708_v29, %v674_v49 }
  0xc3   :  { %v366_v52 = vadd.f32 %v2453_v37, %v365_v56  ;;  %v871_v15 = vpack.c.bf16 %v856_v60, %v855_v51  ;;  %v529_v5 = vadd.f32 %v513_v61, %v480_v50  ;;  %v675_v2 = vadd.f32 %v659_v24, %v626_v62 }
  0xc4   :  { %v773_v16 = vadd.f32 %v757_v32, %v724_v59  ;;  %v758_v50 = vmul.f32 %v2499_v40, %v397_v34  ;;  %v514_v59 = vmul.f32 %v2475_v1, %v397_v34 }
  0xc5   :  { %v398_v7 = vmax.f32 %v366_v52, 0.0  ;;  %938 = vmatmul.bf16.vlgmr.msra.gmra.mxu1 %v871_v15  ;;  %v578_v29 = vadd.f32 %v562_v23, %v529_v5 }
  0xc6   :  { %v594_v33 = vld [vmem:[#allocation2 + $0x50] sm:$0xff]  ;;  %v822_v49 = vadd.f32 %v806_v11, %v773_v16 }
  0xc7   :  { %415 = vst [vmem:[#allocation2 + $0x61] sm:$0xff] %v398_v7  ;;  %v432_v25 = vmul.f32 %v2465_v47, %v398_v7  ;;  %v465_v31 = vmul.f32 %v594_v33, %v2461_v41  ;;  %v611_v38 = vmul.f32 %v2484_v28, %v594_v33  ;;  %v709_v22 = vmul.f32 %v2494_v58, %v594_v33  ;;  %v546_v46 = vld [vmem:[#allocation2 + $0x52] sm:$0xff] }
  0xc8   :  { %v807_v14 = vmul.f32 %v2506_v43, %v546_v46  ;;  %v841_v62 = vadd.f32 %v2519_v42, %v822_v49  ;;  %v660_v5 = vmul.f32 %v2490_v13, %v546_v46  ;;  %v563_v24 = vmul.f32 %v2481_v10, %v546_v46 }
  0xc9   :  { %v481_v15 = vadd.f32 %v465_v31, %v432_v25  ;;  %v725_v55 = vadd.f32 %v709_v22, %v675_v2  ;;  %v627_v60 = vadd.f32 %v611_v38, %v578_v29 }
  0xca   :  { %v368_v51 = vpop.f32.mrf.mxu0  ;;  %v857_v2 = vmax.f32 %v841_v62, 0.0 }
  0xcb   :  { %v369_v56 = vadd.f32 %v2453_v37, %v368_v51  ;;  %v774_v52 = vadd.f32 %v758_v50, %v725_v55  ;;  %v530_v61 = vadd.f32 %v514_v59, %v481_v15  ;;  %v676_v23 = vadd.f32 %v660_v5, %v627_v60 }
  0xcd   :  { %v399_v32 = vmax.f32 %v369_v56, 0.0  ;;  %v823_v16 = vadd.f32 %v807_v14, %v774_v52  ;;  %v579_v22 = vadd.f32 %v563_v24, %v530_v61  ;;  %v515_v56 = vmul.f32 %v2475_v1, %v398_v7 }
  0xce   :  { %v595_v33 = vld [vmem:[#allocation2 + $0x60] sm:$0xff]  ;;  %v759_v52 = vmul.f32 %v2499_v40, %v398_v7 }
  0xcf   :  { %416 = vst [vmem:[#allocation2 + $0x71] sm:$0xff] %v399_v32  ;;  %v433_v25 = vmul.f32 %v2465_v47, %v399_v32  ;;  %v466_v31 = vmul.f32 %v595_v33, %v2461_v41  ;;  %v612_v34 = vmul.f32 %v2484_v28, %v595_v33  ;;  %v842_v11 = vadd.f32 %v2519_v42, %v823_v16  ;;  %v547_v55 = vld [vmem:[#allocation2 + $0x62] sm:$0xff] }
  0xd0   :  { %v710_v38 = vmul.f32 %v2494_v58, %v595_v33  ;;  %v661_v62 = vmul.f32 %v2490_v13, %v547_v55  ;;  %v564_v33 = vmul.f32 %v2481_v10, %v547_v55  ;;  %v808_v7 = vmul.f32 %v2506_v43, %v547_v55 }
  0xd1   :  { %v482_v49 = vadd.f32 %v466_v31, %v433_v25  ;;  %v858_v15 = vmax.f32 %v842_v11, 0.0  ;;  %v628_v50 = vadd.f32 %v612_v34, %v579_v22 }
  0xd2   :  { %v370_v29 = vpop.f32.mrf.mxu0  ;;  %v726_v51 = vadd.f32 %v710_v38, %v676_v23  ;;  %v516_v23 = vmul.f32 %v2475_v1, %v399_v32 }
  0xd3   :  { %v371_v46 = vadd.f32 %v2453_v37, %v370_v29  ;;  %v872_v59 = vpack.c.bf16 %v858_v15, %v857_v2  ;;  %v531_v16 = vadd.f32 %v515_v56, %v482_v49  ;;  %v677_v31 = vadd.f32 %v661_v62, %v628_v50  ;;  %v451_v56 = vld [vmem:[#allocation2 + $0xa0] sm:$0xff] }
  0xd4   :  { %v775_v61 = vadd.f32 %v759_v52, %v726_v51  ;;  %v760_v29 = vmul.f32 %v2499_v40, %v399_v32  ;;  %v500_v62 = vld [vmem:[#allocation2 + $0xa1] sm:$0xff] }
  0xd5   :  { %v400_v14 = vmax.f32 %v371_v46, 0.0  ;;  %943 = vmatmul.bf16.gmra.mxu1 %v872_v59  ;;  %v580_v2 = vadd.f32 %v564_v33, %v531_v16  ;;  %v468_v16 = vmul.f32 %v2461_v41, %v451_v56 }
  0xd6   :  { %v596_v60 = vld [vmem:[#allocation2 + $0x70] sm:$0xff]  ;;  %v824_v15 = vadd.f32 %v808_v7, %v775_v61 }
  0xd7   :  { %417 = vst [vmem:[#allocation2 + $0x81] sm:$0xff] %v400_v14  ;;  %v434_v5 = vmul.f32 %v2465_v47, %v400_v14  ;;  %v467_v24 = vmul.f32 %v596_v60, %v2461_v41  ;;  %v613_v25 = vmul.f32 %v2484_v28, %v596_v60  ;;  %v711_v34 = vmul.f32 %v2494_v58, %v596_v60  ;;  %v548_v38 = vld [vmem:[#allocation2 + $0x72] sm:$0xff] }
  0xd8   :  { %v809_v52 = vmul.f32 %v2506_v43, %v548_v38  ;;  %v565_v55 = vmul.f32 %v2481_v10, %v548_v38  ;;  %v662_v61 = vmul.f32 %v2490_v13, %v548_v38  ;;  %v745_v38 = vld [vmem:[#allocation2 + $0x91] sm:$0xff] }
  0xd9   :  { %v483_v11 = vadd.f32 %v467_v24, %v434_v5  ;;  %v727_v49 = vadd.f32 %v711_v34, %v677_v31  ;;  %v629_v59 = vadd.f32 %v613_v25, %v580_v2  ;;  %v843_v24 = vadd.f32 %v2519_v42, %v824_v15  ;;  %v696_v31 = vld [vmem:[#allocation2 + $0x90] sm:$0xff] }
  0xda   :  { %v373_v22 = vpop.f32.mrf.mxu0  ;;  %v713_v15 = vmul.f32 %v2494_v58, %v696_v31 }
  0xdb   :  { %v532_v51 = vadd.f32 %v516_v23, %v483_v11  ;;  %v374_v46 = vadd.f32 %v2453_v37, %v373_v22  ;;  %v776_v50 = vadd.f32 %v760_v29, %v727_v49  ;;  %v678_v23 = vadd.f32 %v662_v61, %v629_v59  ;;  %v794_v59 = vld [vmem:[#allocation2 + $0x92] sm:$0xff] }
  0xdc   :  { %v517_v49 = vmul.f32 %v2475_v1, %v500_v62  ;;  %v859_v56 = vmax.f32 %v843_v24, 0.0  ;;  %v762_v62 = vmul.f32 %v2499_v40, %v745_v38 }
  0xdd   :  { %v401_v60 = vmax.f32 %v374_v46, 0.0  ;;  %v825_v33 = vadd.f32 %v809_v52, %v776_v50  ;;  %v581_v34 = vadd.f32 %v565_v55, %v532_v51  ;;  %v549_v55 = vld [vmem:[#allocation2 + $0xa2] sm:$0xff] }
  0xde   :  { %v597_v5 = vld [vmem:[#allocation2 + $0x80] sm:$0xff]  ;;  %v566_v31 = vmul.f32 %v2481_v10, %v549_v55 }
  0xdf   :  { %v646_v32 = vld [vmem:[#allocation2 + $0x82] sm:$0xff]  ;;  %v614_v25 = vmul.f32 %v2484_v28, %v597_v5  ;;  %418 = vst [vmem:[#allocation2 + $0xb1] sm:$0xff] %v401_v60  ;;  %v435_v7 = vmul.f32 %v2465_v47, %v401_v60  ;;  %v844_v11 = vadd.f32 %v2519_v42, %v825_v33  ;;  %v712_v2 = vmul.f32 %v2494_v58, %v597_v5 }
  0xe0   :  { %v663_v29 = vmul.f32 %v2490_v13, %v646_v32  ;;  %v761_v5 = vmul.f32 %v2499_v40, %v400_v14 }
  0xe1   :  { %v630_v22 = vadd.f32 %v614_v25, %v581_v34  ;;  %v484_v46 = vadd.f32 %v468_v16, %v435_v7  ;;  %v860_v50 = vmax.f32 %v844_v11, 0.0  ;;  %v728_v52 = vadd.f32 %v712_v2, %v678_v23 }
  0xe2   :  { %v375_v51 = vpop.f32.mrf.mxu0  ;;  %v811_v7 = vmul.f32 %v2506_v43, %v794_v59 }
  0xe3   :  { %v376_v6 = vadd.f32 %v2453_v37, %v375_v51  ;;  %v679_v33 = vadd.f32 %v663_v29, %v630_v22  ;;  %v873_v61 = vpack.c.bf16 %v860_v50, %v859_v56  ;;  %v533_v3 = vadd.f32 %v517_v49, %v484_v46 }
  0xe4   :  { %v777_v24 = vadd.f32 %v761_v5, %v728_v52  ;;  %v810_v22 = vmul.f32 %v2506_v43, %v646_v32  ;;  %v518_v50 = vmul.f32 %v2475_v1, %v401_v60 }
  0xe5   :  { %v402_v34 = vmax.f32 %v376_v6, 0.0  ;;  %v729_v25 = vadd.f32 %v713_v15, %v679_v33  ;;  %948 = vmatmul.bf16.gmra.mxu1 %v873_v61  ;;  %v582_v6 = vadd.f32 %v566_v31, %v533_v3 }
  0xe6   :  { %v598_v16 = vld [vmem:[#allocation2 + $0xb0] sm:$0xff]  ;;  %v826_v15 = vadd.f32 %v810_v22, %v777_v24 }
  0xe7   :  { %419 = vst [vmem:[#allocation2 + $0xc1] sm:$0xff] %v402_v34  ;;  %v436_v11 = vmul.f32 %v2465_v47, %v402_v34  ;;  %v469_v23 = vmul.f32 %v598_v16, %v2461_v41  ;;  %v615_v2 = vmul.f32 %v2484_v28, %v598_v16  ;;  %v778_v14 = vadd.f32 %v762_v62, %v729_v25  ;;  %v550_v46 = vld [vmem:[#allocation2 + $0xb2] sm:$0xff] }
  0xe8   :  { %v845_v61 = vadd.f32 %v2519_v42, %v826_v15  ;;  %v664_v32 = vmul.f32 %v2490_v13, %v550_v46  ;;  %v567_v3 = vmul.f32 %v2481_v10, %v550_v46 }
  0xe9   :  { %v485_v29 = vadd.f32 %v469_v23, %v436_v11  ;;  %v827_v38 = vadd.f32 %v811_v7, %v778_v14  ;;  %v631_v56 = vadd.f32 %v615_v2, %v582_v6  ;;  %v763_v6 = vmul.f32 %v2499_v40, %v402_v34 }
  0xea   :  { %v378_v49 = vpop.f32.mrf.mxu0  ;;  %v861_v23 = vmax.f32 %v845_v61, 0.0 }
  0xeb   :  { %v379_v51 = vadd.f32 %v2453_v37, %v378_v49  ;;  %v846_v52 = vadd.f32 %v2519_v42, %v827_v38  ;;  %v534_v33 = vadd.f32 %v518_v50, %v485_v29  ;;  %v680_v60 = vadd.f32 %v664_v32, %v631_v56 }
  0xec   :  { %v519_v49 = vmul.f32 %v2475_v1, %v402_v34 }
  0xed   :  { %v403_v55 = vmax.f32 %v379_v51, 0.0  ;;  %v862_v31 = vmax.f32 %v846_v52, 0.0  ;;  %v583_v24 = vadd.f32 %v567_v3, %v534_v33 }
  0xee   :  { %v599_v59 = vld [vmem:[#allocation2 + $0xc0] sm:$0xff] }
  0xef   :  { %420 = vst [vmem:[#allocation2 + $0xd1] sm:$0xff] %v403_v55  ;;  %v437_v5 = vmul.f32 %v2465_v47, %v403_v55  ;;  %v470_v62 = vmul.f32 %v599_v59, %v2461_v41  ;;  %v616_v25 = vmul.f32 %v2484_v28, %v599_v59  ;;  %v714_v16 = vmul.f32 %v2494_v58, %v599_v59  ;;  %v551_v14 = vld [vmem:[#allocation2 + $0xc2] sm:$0xff] }
  0xf0   :  { %v874_v15 = vpack.c.bf16 %v862_v31, %v861_v23  ;;  %v665_v50 = vmul.f32 %v2490_v13, %v551_v14  ;;  %v812_v59 = vmul.f32 %v2506_v43, %v551_v14  ;;  %v568_v61 = vmul.f32 %v2481_v10, %v551_v14 }
  0xf1   :  { %v486_v7 = vadd.f32 %v470_v62, %v437_v5  ;;  %v730_v2 = vadd.f32 %v714_v16, %v680_v60  ;;  %v632_v29 = vadd.f32 %v616_v25, %v583_v24  ;;  %v764_v24 = vmul.f32 %v2499_v40, %v403_v55 }
  0xf2   :  { %v380_v11 = vpop.f32.mrf.mxu0  ;;  %v520_v23 = vmul.f32 %v2475_v1, %v403_v55 }
  0xf3   :  { %v381_v22 = vadd.f32 %v2453_v37, %v380_v11  ;;  %v779_v46 = vadd.f32 %v763_v6, %v730_v2  ;;  %v535_v51 = vadd.f32 %v519_v49, %v486_v7  ;;  %v681_v34 = vadd.f32 %v665_v50, %v632_v29 }
  0xf5   :  { %v404_v38 = vmax.f32 %v381_v22, 0.0  ;;  %953 = vmatmul.bf16.gmra.mxu1 %v874_v15  ;;  %v828_v62 = vadd.f32 %v812_v59, %v779_v46  ;;  %v584_v25 = vadd.f32 %v568_v61, %v535_v51 }
  0xf6   :  { %v600_v56 = vld [vmem:[#allocation2 + $0xd0] sm:$0xff] }
  0xf7   :  { %421 = vst [vmem:[#allocation2 + $0xe1] sm:$0xff] %v404_v38  ;;  %v438_v52 = vmul.f32 %v2465_v47, %v404_v38  ;;  %v471_v33 = vmul.f32 %v600_v56, %v2461_v41  ;;  %v617_v32 = vmul.f32 %v2484_v28, %v600_v56  ;;  %v715_v3 = vmul.f32 %v2494_v58, %v600_v56  ;;  %v552_v5 = vld [vmem:[#allocation2 + $0xd2] sm:$0xff] }
  0xf8   :  { %v813_v14 = vmul.f32 %v2506_v43, %v552_v5  ;;  %v847_v6 = vadd.f32 %v2519_v42, %v828_v62  ;;  %v666_v46 = vmul.f32 %v2490_v13, %v552_v5  ;;  %v569_v51 = vmul.f32 %v2481_v10, %v552_v5 }
  0xf9   :  { %v487_v31 = vadd.f32 %v471_v33, %v438_v52  ;;  %v731_v16 = vadd.f32 %v715_v3, %v681_v34  ;;  %v633_v11 = vadd.f32 %v617_v32, %v584_v25 }
  0xfa   :  { %v383_v60 = vpop.f32.mrf.mxu0  ;;  %v863_v61 = vmax.f32 %v847_v6, 0.0 }
  0xfb   :  { %v384_v7 = vadd.f32 %v2453_v37, %v383_v60  ;;  %v780_v2 = vadd.f32 %v764_v24, %v731_v16  ;;  %v536_v29 = vadd.f32 %v520_v23, %v487_v31  ;;  %v682_v33 = vadd.f32 %v666_v46, %v633_v11 }
  0xfc   :  { %v765_v60 = vmul.f32 %v2499_v40, %v404_v38  ;;  %v521_v24 = vmul.f32 %v2475_v1, %v404_v38 }
  0xfd   :  { %v405_v22 = vmax.f32 %v384_v7, 0.0  ;;  %v829_v15 = vadd.f32 %v813_v14, %v780_v2  ;;  %v585_v32 = vadd.f32 %v569_v51, %v536_v29 }
  0xfe   :  { %v601_v49 = vld [vmem:[#allocation2 + $0xe0] sm:$0xff] }
  0xff   :  { %422 = vst [vmem:[#allocation2 + $0xf1] sm:$0xff] %v405_v22  ;;  %v439_v56 = vmul.f32 %v2465_v47, %v405_v22  ;;  %v472_v50 = vmul.f32 %v601_v49, %v2461_v41  ;;  %v618_v55 = vmul.f32 %v2484_v28, %v601_v49  ;;  %v848_v52 = vadd.f32 %v2519_v42, %v829_v15  ;;  %v553_v31 = vld [vmem:[#allocation2 + $0xe2] sm:$0xff] }
 0x100   :  { %v716_v59 = vmul.f32 %v2494_v58, %v601_v49  ;;  %v667_v6 = vmul.f32 %v2490_v13, %v553_v31  ;;  %v814_v15 = vmul.f32 %v2506_v43, %v553_v31  ;;  %v570_v46 = vmul.f32 %v2481_v10, %v553_v31 }
 0x101   :  { %v488_v34 = vadd.f32 %v472_v50, %v439_v56  ;;  %v864_v62 = vmax.f32 %v848_v52, 0.0  ;;  %v634_v16 = vadd.f32 %v618_v55, %v585_v32  ;;  %v766_v32 = vmul.f32 %v2499_v40, %v405_v22 }
 0x102   :  { %v385_v3 = vpop.f32.mrf.mxu0  ;;  %v732_v25 = vadd.f32 %v716_v59, %v682_v33 }
 0x103   :  { %v386_v5 = vadd.f32 %v2453_v37, %v385_v3  ;;  %v875_v7 = vpack.c.bf16 %v864_v62, %v863_v61  ;;  %v537_v11 = vadd.f32 %v521_v24, %v488_v34  ;;  %v683_v38 = vadd.f32 %v667_v6, %v634_v16 }
 0x104   :  { %v781_v2 = vadd.f32 %v765_v60, %v732_v25  ;;  %v522_v62 = vmul.f32 %v2475_v1, %v405_v22 }
 0x105   :  { %v406_v23 = vmax.f32 %v386_v5, 0.0  ;;  %958 = vmatmul.bf16.gmra.mxu1 %v875_v7  ;;  %v586_v52 = vadd.f32 %v570_v46, %v537_v11 }
 0x106   :  { %v602_v14 = vld [vmem:[#allocation2 + $0xf0] sm:$0xff]  ;;  %v830_v55 = vadd.f32 %v814_v15, %v781_v2 }
 0x107   :  { %423 = vst [vmem:[#allocation2 + $0x101] sm:$0xff] %v406_v23  ;;  %v440_v29 = vmul.f32 %v2465_v47, %v406_v23  ;;  %v473_v49 = vmul.f32 %v602_v14, %v2461_v41  ;;  %v619_v51 = vmul.f32 %v2484_v28, %v602_v14  ;;  %v717_v56 = vmul.f32 %v2494_v58, %v602_v14  ;;  %v554_v50 = vld [vmem:[#allocation2 + $0xf2] sm:$0xff] }
 0x108   :  { %v815_v31 = vmul.f32 %v2506_v43, %v554_v50  ;;  %v849_v60 = vadd.f32 %v2519_v42, %v830_v55  ;;  %v668_v2 = vmul.f32 %v2490_v13, %v554_v50  ;;  %v571_v11 = vmul.f32 %v2481_v10, %v554_v50 }
 0x109   :  { %v489_v33 = vadd.f32 %v473_v49, %v440_v29  ;;  %v733_v61 = vadd.f32 %v717_v56, %v683_v38  ;;  %v635_v3 = vadd.f32 %v619_v51, %v586_v52 }
 0x10a   :  { %v388_v59 = vpop.f32.mrf.mxu0  ;;  %v865_v46 = vmax.f32 %v849_v60, 0.0 }
 0x10b   :  { %v389_v34 = vadd.f32 %v2453_v37, %v388_v59  ;;  %v782_v25 = vadd.f32 %v766_v32, %v733_v61  ;;  %v538_v16 = vadd.f32 %v522_v62, %v489_v33  ;;  %v684_v49 = vadd.f32 %v668_v2, %v635_v3 }
 0x10c   :  { %v523_v61 = vmul.f32 %v2475_v1, %v406_v23 }
 0x10d   :  { %v407_v5 = vmax.f32 %v389_v34, 0.0  ;;  %v831_v7 = vadd.f32 %v815_v31, %v782_v25  ;;  %v587_v51 = vadd.f32 %v571_v11, %v538_v16  ;;  %v767_v34 = vmul.f32 %v2499_v40, %v406_v23 }
 0x10e   :  { %v603_v24 = vld [vmem:[#allocation2 + $0x100] sm:$0xff] }
 0x10f   :  { %424 = vst [vmem:[#allocation2 + $0x111] sm:$0xff] %v407_v5  ;;  %v441_v14 = vmul.f32 %v2465_v47, %v407_v5  ;;  %v474_v6 = vmul.f32 %v603_v24, %v2461_v41  ;;  %v620_v22 = vmul.f32 %v2484_v28, %v603_v24  ;;  %v850_v29 = vadd.f32 %v2519_v42, %v831_v7  ;;  %v555_v33 = vld [vmem:[#allocation2 + $0x102] sm:$0xff] }
 0x110   :  { %v718_v15 = vmul.f32 %v2494_v58, %v603_v24  ;;  %v669_v31 = vmul.f32 %v2490_v13, %v555_v33  ;;  %v572_v16 = vmul.f32 %v2481_v10, %v555_v33  ;;  %v816_v23 = vmul.f32 %v2506_v43, %v555_v33 }
 0x111   :  { %v490_v38 = vadd.f32 %v474_v6, %v441_v14  ;;  %v866_v55 = vmax.f32 %v850_v29, 0.0  ;;  %v636_v59 = vadd.f32 %v620_v22, %v587_v51  ;;  %v524_v6 = vmul.f32 %v2475_v1, %v407_v5 }
 0x112   :  { %v390_v56 = vpop.f32.mrf.mxu0  ;;  %v734_v52 = vadd.f32 %v718_v15, %v684_v49  ;;  %v768_v15 = vmul.f32 %v2499_v40, %v407_v5 }
 0x113   :  { %v391_v50 = vadd.f32 %v2453_v37, %v390_v56  ;;  %v876_v32 = vpack.c.bf16 %v866_v55, %v865_v46  ;;  %v539_v25 = vadd.f32 %v523_v61, %v490_v38  ;;  %v685_v2 = vadd.f32 %v669_v31, %v636_v59  ;;  %v704_v59 = vld [vmem:[#allocation2 + $0x130] sm:$0xff] }
 0x114   :  { %v783_v60 = vadd.f32 %v767_v34, %v734_v52 }
 0x115   :  { %v408_v62 = vmax.f32 %v391_v50, 0.0  ;;  %963 = vmatmul.bf16.gmra.mxu1 %v876_v32  ;;  %v588_v29 = vadd.f32 %v572_v16, %v539_v25 }
 0x116   :  { %v604_v3 = vld [vmem:[#allocation2 + $0x110] sm:$0xff]  ;;  %v832_v46 = vadd.f32 %v816_v23, %v783_v60  ;;  %v721_v60 = vmul.f32 %v2494_v58, %v704_v59 }
 0x117   :  { %425 = vst [vmem:[#allocation2 + $0x121] sm:$0xff] %v408_v62  ;;  %v442_v24 = vmul.f32 %v2465_v47, %v408_v62  ;;  %v475_v37 = vmul.f32 %v604_v3, %v2461_v41  ;;  %v621_v7 = vmul.f32 %v2484_v28, %v604_v3  ;;  %v719_v11 = vmul.f32 %v2494_v58, %v604_v3  ;;  %v556_v22 = vld [vmem:[#allocation2 + $0x112] sm:$0xff] }
 0x118   :  { %v817_v41 = vmul.f32 %v2506_v43, %v556_v22  ;;  %v573_v56 = vmul.f32 %v2481_v10, %v556_v22  ;;  %v851_v33 = vadd.f32 %v2519_v42, %v832_v46  ;;  %v670_v1 = vmul.f32 %v2490_v13, %v556_v22  ;;  %v753_v3 = vld [vmem:[#allocation2 + $0x131] sm:$0xff] }
 0x119   :  { %v491_v14 = vadd.f32 %v475_v37, %v442_v24  ;;  %v735_v49 = vadd.f32 %v719_v11, %v685_v2  ;;  %v637_v47 = vadd.f32 %v621_v7, %v588_v29  ;;  %v802_v7 = vld [vmem:[#allocation2 + $0x132] sm:$0xff]  ;;  %v770_v11 = vmul.f32 %v2499_v40, %v753_v3 }
 0x11a   :  { %v867_v16 = vmax.f32 %v851_v33, 0.0 }
 0x11b   :  { %v540_v51 = vadd.f32 %v524_v6, %v491_v14  ;;  %v784_v38 = vadd.f32 %v768_v15, %v735_v49  ;;  %v686_v25 = vadd.f32 %v670_v1, %v637_v47  ;;  %v819_v6 = vmul.f32 %v2506_v43, %v802_v7 }
 0x11c   :  { %v3123_v7 = vunpack.c.h.bf16 %v2253_v12 }
 0x11d   :  { %v833_v52 = vadd.f32 %v817_v41, %v784_v38  ;;  %v589_v61 = vadd.f32 %v573_v56, %v540_v51  ;;  %v1873_v51 = vld [vmem:[#allocation8 + $0x8] sm:$0xff]  ;;  %v1872_v41 = vld [vmem:[#allocation8] sm:$0xff] }
 0x11e   :  { %v605_v55 = vld [vmem:[#allocation2 + $0x120] sm:$0xff]  ;;  %1086 = vmatpush.bf16.msra.mxu2 %v1873_v51 }
 0x11f   :  { %v654_v50 = vld [vmem:[#allocation2 + $0x122] sm:$0xff]  ;;  %v622_v32 = vmul.f32 %v2484_v28, %v605_v55  ;;  %v720_v5 = vmul.f32 %v2494_v58, %v605_v55  ;;  %v852_v34 = vadd.f32 %v2519_v42, %v833_v52  ;;  %v769_v28 = vmul.f32 %v2499_v40, %v408_v62  ;;  %v2673_v62 = vld [vmem:[%s3090_s8] ss:$0 sm:$0xff] }
 0x120   :  { %v671_v10 = vmul.f32 %v2490_v13, %v654_v50  ;;  %v818_v13 = vmul.f32 %v2506_v43, %v654_v50  ;;  %v1976_v52 = vld [vmem:[#allocation3] ss:$0 sm:$0xff] }
 0x121   :  { %v638_v31 = vadd.f32 %v622_v32, %v589_v61  ;;  %v868_v24 = vmax.f32 %v852_v34, 0.0  ;;  %v736_v37 = vadd.f32 %v720_v5, %v686_v25  ;;  %v3120_v61 = vunpack.c.l.bf16 %v2229_v4 }
 0x122   :  { %1087 = vmatpush.bf16.msra.mxu2 %v1872_v41  ;;  %v3121_v5 = vunpack.c.h.bf16 %v2229_v4  ;;  %v3122_v4 = vunpack.c.l.bf16 %v2253_v12  ;;  %v3124_v12 = vunpack.c.l.bf16 %v2274_v21 }
 0x123   :  { %v687_v2 = vadd.f32 %v671_v10, %v638_v31  ;;  %v877_v23 = vpack.c.bf16 %v868_v24, %v867_v16  ;;  %v785_v22 = vadd.f32 %v769_v28, %v736_v37 }
 0x125   :  { %v737_v14 = vadd.f32 %v721_v60, %v687_v2  ;;  %968 = vmatmul.bf16.gmra.mxu1 %v877_v23  ;;  %v834_v58 = vadd.f32 %v818_v13, %v785_v22 }
 0x127   :  { %v786_v29 = vadd.f32 %v770_v11, %v737_v14  ;;  %v853_v46 = vadd.f32 %v2519_v42, %v834_v58 }
 0x129   :  { %v835_v49 = vadd.f32 %v819_v6, %v786_v29  ;;  %v869_v38 = vmax.f32 %v853_v46, 0.0 }
 0x12b   :  { %v854_v15 = vadd.f32 %v2519_v42, %v835_v49  ;;  %v3125_v49 = vunpack.c.h.bf16 %v2274_v21  ;;  %v3126_v21 = vunpack.c.l.bf16 %v2295_v30 }
 0x12d   :  { %v870_v47 = vmax.f32 %v854_v15, 0.0 }
 0x12f   :  { %v878_v40 = vpack.c.bf16 %v870_v47, %v869_v38 }
 0x135   :  { %973 = vmatmul.bf16.gmra.mxu1 %v878_v40 }
 0x142   :  { %v939_v43 = vpop.f32.mrf.mxu1 }
 0x143   :  { %v940_v56 = vadd.f32 %v2673_v62, %v939_v43 }
 0x145   :  { %v979_v55 = vadd.f32 %v940_v56, %v2238_v8  ;;  %v3127_v56 = vunpack.c.h.bf16 %v2295_v30 }
 0x147   :  { %v1001_v50 = vmul.f32 %v1976_v52, %v979_v55 }
 0x149   :  { %v2681_v32 = vmul.f32 %v3120_v61, %v1001_v50 }
 0x14a   :  { %v941_v42 = vpop.f32.mrf.mxu1 }
 0x14b   :  { %v942_v33 = vadd.f32 %v2673_v62, %v941_v42 }
 0x14d   :  { %v980_v1 = vadd.f32 %v942_v33, %v2242_v9 }
 0x14f   :  { %v1002_v59 = vmul.f32 %v1976_v52, %v980_v1 }
 0x151   :  { %v2685_v34 = vmul.f32 %v3121_v5, %v1002_v59  ;;  %v3128_v5 = vunpack.c.l.bf16 %v2316_v39 }
 0x152   :  { %v944_v25 = vpop.f32.mrf.mxu1 }
 0x153   :  { %v1033_v8 = vpack.c.bf16 %v2685_v34, %v2681_v32  ;;  %v945_v3 = vadd.f32 %v2673_v62, %v944_v25 }
 0x155   :  { %1822 = vmatmul.msk.bf16.vlgmr.msra.gmra.mxu2 %vm319_vm0, %v1033_v8  ;;  %v981_v31 = vadd.f32 %v945_v3, %v2259_v17  ;;  %v3129_v8 = vunpack.c.h.bf16 %v2316_v39  ;;  %v3130_v39 = vunpack.c.l.bf16 %v2337_v48 }
 0x157   :  { %v1003_v60 = vmul.f32 %v1976_v52, %v981_v31 }
 0x159   :  { %v2696_v37 = vmul.f32 %v3122_v4, %v1003_v60 }
 0x15a   :  { %v946_v9 = vpop.f32.mrf.mxu1 }
 0x15b   :  { %v947_v10 = vadd.f32 %v2673_v62, %v946_v9 }
 0x15d   :  { %v982_v16 = vadd.f32 %v947_v10, %v2263_v18 }
 0x15f   :  { %v1004_v24 = vmul.f32 %v1976_v52, %v982_v16 }
 0x161   :  { %v2700_v2 = vmul.f32 %v3123_v7, %v1004_v24 }
 0x162   :  { %v949_v11 = vpop.f32.mrf.mxu1 }
 0x163   :  { %v1034_v23 = vpack.c.bf16 %v2700_v2, %v2696_v37  ;;  %v950_v17 = vadd.f32 %v2673_v62, %v949_v11  ;;  %v3131_v11 = vunpack.c.h.bf16 %v2337_v48  ;;  %v3132_v48 = vunpack.c.l.bf16 %v2358_v57 }
 0x165   :  { %1823 = vmatmul.msk.bf16.gmra.mxu2 %vm319_vm0, %v1034_v23  ;;  %v983_v28 = vadd.f32 %v950_v17, %v2280_v26 }
 0x167   :  { %v1005_v6 = vmul.f32 %v1976_v52, %v983_v28 }
 0x169   :  { %v2711_v13 = vmul.f32 %v3124_v12, %v1005_v6 }
 0x16a   :  { %v951_v18 = vpop.f32.mrf.mxu1 }
 0x16b   :  { %v952_v14 = vadd.f32 %v2673_v62, %v951_v18 }
 0x16d   :  { %v984_v22 = vadd.f32 %v952_v14, %v2284_v27 }
 0x16f   :  { %v1006_v29 = vmul.f32 %v1976_v52, %v984_v22 }
 0x171   :  { %v2715_v58 = vmul.f32 %v3125_v49, %v1006_v29  ;;  %v3133_v49 = vunpack.c.h.bf16 %v2358_v57  ;;  %v3134_v57 = vld [vmem:[#allocation16_spill] sm:$0xff] }
 0x172   :  { %v954_v15 = vpop.f32.mrf.mxu1 }
 0x173   :  { %v1035_v46 = vpack.c.bf16 %v2715_v58, %v2711_v13  ;;  %v955_v26 = vadd.f32 %v2673_v62, %v954_v15 }
 0x175   :  { %1824 = vmatmul.msk.bf16.gmra.mxu2 %vm319_vm0, %v1035_v46  ;;  %v985_v51 = vadd.f32 %v955_v26, %v2301_v35 }
 0x177   :  { %v1007_v38 = vmul.f32 %v1976_v52, %v985_v51 }
 0x179   :  { %v2726_v43 = vmul.f32 %v3126_v21, %v1007_v38 }
 0x17a   :  { %v956_v27 = vpop.f32.mrf.mxu1 }
 0x17b   :  { %v957_v47 = vadd.f32 %v2673_v62, %v956_v27 }
 0x17d   :  { %v986_v41 = vadd.f32 %v957_v47, %v2305_v36  ;;  %v1977_v36 = vld [vmem:[#allocation3 + $0x1] ss:$0 sm:$0xff] }
 0x17f   :  { %v1008_v40 = vmul.f32 %v1976_v52, %v986_v41 }
 0x181   :  { %v2730_v55 = vmul.f32 %v3127_v56, %v1008_v40  ;;  %v3135_v40 = vunpack.c.l.bf16 %v3134_v57  ;;  %v3136_v56 = vunpack.c.h.bf16 %v3134_v57 }
 0x182   :  { %v959_v42 = vpop.f32.mrf.mxu1 }
 0x183   :  { %v1036_v33 = vpack.c.bf16 %v2730_v55, %v2726_v43  ;;  %v960_v35 = vadd.f32 %v2673_v62, %v959_v42 }
 0x185   :  { %1825 = vmatmul.msk.bf16.gmra.mxu2 %vm319_vm0, %v1036_v33  ;;  %v987_v50 = vadd.f32 %v960_v35, %v2322_v44  ;;  %v1878_v35 = vld [vmem:[%s3095_s13 + $0x20] sm:$0xff] }
 0x187   :  { %v1009_v59 = vmul.f32 %v1977_v36, %v987_v50  ;;  %v1877_v50 = vld [vmem:[%s3095_s13 + $0x18] sm:$0xff] }
 0x189   :  { %v2741_v25 = vmul.f32 %v3128_v5, %v1009_v59 }
 0x18a   :  { %v961_v52 = vpop.f32.mrf.mxu1 }
 0x18b   :  { %v962_v1 = vadd.f32 %v2673_v62, %v961_v52  ;;  %v2813_v52 = vld [vmem:[%s3092_s10] ss:$0 sm:$0xff] }
 0x18d   :  { %v988_v61 = vadd.f32 %v962_v1, %v2326_v45  ;;  %v1876_v1 = vld [vmem:[%s3095_s13 + $0x10] sm:$0xff] }
 0x18f   :  { %v1010_v30 = vmul.f32 %v1977_v36, %v988_v61 }
 0x191   :  { %v2745_v3 = vmul.f32 %v3129_v8, %v1010_v30  ;;  %v1178_v8 = vld [vmem:[#allocation2] sm:$0xff] }
 0x192   :  { %v964_v31 = vpop.f32.mrf.mxu1 }
 0x193   :  { %v1037_v44 = vpack.c.bf16 %v2745_v3, %v2741_v25  ;;  %v965_v9 = vadd.f32 %v2673_v62, %v964_v31 }
 0x195   :  { %1826 = vmatmul.msk.bf16.gmra.mxu2 %vm319_vm0, %v1037_v44  ;;  %v989_v10 = vadd.f32 %v965_v9, %v2343_v53  ;;  %v1875_v44 = vld [vmem:[%s3095_s13 + $0x8] sm:$0xff] }
 0x197   :  { %v1011_v16 = vmul.f32 %v1977_v36, %v989_v10 }
 0x199   :  { %v2756_v7 = vmul.f32 %v3130_v39, %v1011_v16  ;;  %v1874_v16 = vld [vmem:[%s3095_s13] sm:$0xff] }
 0x19a   :  { %v966_v45 = vpop.f32.mrf.mxu1 }
 0x19b   :  { %v967_v60 = vadd.f32 %v2673_v62, %v966_v45  ;;  %v1227_v45 = vld [vmem:[#allocation2 + $0x1] sm:$0xff] }
 0x19d   :  { %v990_v24 = vadd.f32 %v967_v60, %v2347_v54 }
 0x19f   :  { %v1012_v4 = vmul.f32 %v1977_v36, %v990_v24 }
 0x1a1   :  { %v2760_v23 = vmul.f32 %v3131_v11, %v1012_v4 }
 0x1a2   :  { %v969_v17 = vpop.f32.mrf.mxu1 }
 0x1a3   :  { %v1038_v28 = vpack.c.bf16 %v2760_v23, %v2756_v7  ;;  %v970_v53 = vadd.f32 %v2673_v62, %v969_v17  ;;  %v1276_v17 = vld [vmem:[#allocation2 + $0x2] sm:$0xff] }
 0x1a5   :  { %1827 = vmatmul.msk.bf16.gmra.mxu2 %vm319_vm0, %v1038_v28  ;;  %v991_v18 = vadd.f32 %v970_v53, %v2371_v63 }
 0x1a7   :  { %v1013_v6 = vmul.f32 %v1977_v36, %v991_v18 }
 0x1a9   :  { %v2771_v12 = vmul.f32 %v3132_v48, %v1013_v6 }
 0x1aa   :  { %v971_v54 = vpop.f32.mrf.mxu1 }
 0x1ab   :  { %v972_v14 = vadd.f32 %v2673_v62, %v971_v54 }
 0x1ad   :  { %v992_v22 = vadd.f32 %v972_v14, %v2375_v0 }
 0x1af   :  { %v1014_v29 = vmul.f32 %v1977_v36, %v992_v22 }
 0x1b1   :  { %v2775_v15 = vmul.f32 %v3133_v49, %v1014_v29 }
 0x1b2   :  { %v974_v46 = vpop.f32.mrf.mxu1 }
 0x1b3   :  { %v1039_v26 = vpack.c.bf16 %v2775_v15, %v2771_v12  ;;  %v975_v63 = vadd.f32 %v2673_v62, %v974_v46 }
 0x1b5   :  { %1828 = vmatmul.msk.bf16.gmra.mxu2 %vm319_vm0, %v1039_v26  ;;  %v993_v51 = vadd.f32 %v975_v63, %v2411_v19  ;;  %v1881_v19 = vld [vmem:[%s3095_s13 + $0x38] sm:$0xff] }
 0x1b6   :  { %1664 = vmatpush.bf16.msra.mxu3 %v1881_v19 }
 0x1b7   :  { %v1015_v47 = vmul.f32 %v1977_v36, %v993_v51 }
 0x1b9   :  { %v2786_v21 = vmul.f32 %v3135_v40, %v1015_v47 }
 0x1ba   :  { %v976_v0 = vpop.f32.mrf.mxu1 }
 0x1bb   :  { %v977_v27 = vadd.f32 %v2673_v62, %v976_v0  ;;  %v1879_v62 = vld [vmem:[%s3095_s13 + $0x28] sm:$0xff] }
 0x1bd   :  { %v994_v38 = vadd.f32 %v977_v27, %v2415_v20  ;;  %v1880_v20 = vld [vmem:[%s3095_s13 + $0x30] sm:$0xff] }
 0x1be   :  { %1665 = vmatpush.bf16.msra.mxu3 %v1880_v20 }
 0x1bf   :  { %v1016_v41 = vmul.f32 %v1977_v36, %v994_v38  ;;  %v260_v36 = vld [vmem:[#allocation9] sm:$0xff] }
 0x1c0   :  { %v2818_v61 = vperm.slane %v260_v36, 0  ;;  %v2821_v5 = vperm.slane %v260_v36, 4  ;;  %v2828_v60 = vperm.slane %v260_v36, 1  ;;  %v2834_v39 = vperm.slane %v260_v36, 2 }
 0x1c1   :  { %v2790_v42 = vmul.f32 %v3136_v56, %v1016_v41  ;;  %v2837_v53 = vperm.slane %v260_v36, 3  ;;  %v2843_v63 = vperm.slane %v260_v36, 5  ;;  %v2847_v38 = vperm.slane %v260_v36, 6 }
 0x1c2   :  { %1666 = vmatpush.bf16.msra.mxu3 %v1879_v62  ;;  %v1195_v9 = vmul.f32 %v2818_v61, %v1178_v8  ;;  %v1244_v4 = vmul.f32 %v2828_v60, %v1227_v45  ;;  %v1293_v14 = vmul.f32 %v2834_v39, %v1276_v17  ;;  %v2852_v20 = vperm.slane %v260_v36, 7  ;;  %v2859_v45 = vld [vmem:[#allocation9 + $0x8] ss:$0 sm:$0xff] }
 0x1c3   :  { %v1040_v33 = vpack.c.bf16 %v2790_v42, %v2786_v21 }
 0x1c5   :  { %1829 = vmatmul.msk.bf16.gmra.mxu2 %vm319_vm0, %v1040_v33 }
 0x1c6   :  { %1667 = vmatpush.bf16.msra.mxu3 %v1878_v35 }
 0x1ca   :  { %1668 = vmatpush.bf16.msra.mxu3 %v1877_v50 }
 0x1ce   :  { %1669 = vmatpush.bf16.msra.mxu3 %v1876_v1 }
 0x1d2   :  { %1670 = vmatpush.bf16.msra.mxu3 %v1875_v44 }
 0x1d6   :  { %1671 = vmatpush.bf16.msra.mxu3 %v1874_v16 }
 0x1d8   :  { %v1089_v59 = vpop.f32.mrf.mxu2 }
 0x1d9   :  { %v1090_v30 = vadd.f32 %v2813_v52, %v1089_v59 }
 0x1db   :  { %v1129_v31 = vmax.f32 %v1090_v30, 0.0 }
 0x1dd   :  { %1145 = vst [vmem:[#allocation2 + $0x11] sm:$0xff] %v1129_v31  ;;  %v1162_v10 = vmul.f32 %v2821_v5, %v1129_v31  ;;  %v1245_v47 = vmul.f32 %v2828_v60, %v1129_v31 }
 0x1df   :  { %v1211_v24 = vadd.f32 %v1195_v9, %v1162_v10 }
 0x1e0   :  { %v1091_v11 = vpop.f32.mrf.mxu2 }
 0x1e1   :  { %v1092_v28 = vadd.f32 %v2813_v52, %v1091_v11  ;;  %v1260_v54 = vadd.f32 %v1244_v4, %v1211_v24 }
 0x1e3   :  { %v1130_v18 = vmax.f32 %v1092_v28, 0.0  ;;  %v1309_v49 = vadd.f32 %v1293_v14, %v1260_v54 }
 0x1e4   :  { %v1325_v6 = vld [vmem:[#allocation2 + $0x10] sm:$0xff] }
 0x1e5   :  { %1146 = vst [vmem:[#allocation2 + $0x21] sm:$0xff] %v1130_v18  ;;  %v1163_v22 = vmul.f32 %v2821_v5, %v1130_v18  ;;  %v1196_v29 = vmul.f32 %v1325_v6, %v2818_v61  ;;  %v1342_v48 = vmul.f32 %v2837_v53, %v1325_v6  ;;  %v1277_v51 = vld [vmem:[#allocation2 + $0x12] sm:$0xff]  ;;  %v1489_v10 = vmul.f32 %v2852_v20, %v1130_v18 }
 0x1e6   :  { %v1391_v56 = vmul.f32 %v2843_v63, %v1277_v51  ;;  %v1294_v62 = vmul.f32 %v2834_v39, %v1277_v51  ;;  %v1246_v16 = vmul.f32 %v2828_v60, %v1130_v18 }
 0x1e7   :  { %v1212_v46 = vadd.f32 %v1196_v29, %v1163_v22  ;;  %v1358_v27 = vadd.f32 %v1342_v48, %v1309_v49 }
 0x1e8   :  { %v1094_v26 = vpop.f32.mrf.mxu2 }
 0x1e9   :  { %v1095_v0 = vadd.f32 %v2813_v52, %v1094_v26  ;;  %v1261_v57 = vadd.f32 %v1245_v47, %v1212_v46  ;;  %v1407_v50 = vadd.f32 %v1391_v56, %v1358_v27  ;;  %v2872_v26 = vld [vmem:[%s3094_s12] ss:$0 sm:$0xff] }
 0x1eb   :  { %v1131_v41 = vmax.f32 %v1095_v0, 0.0  ;;  %v1310_v59 = vadd.f32 %v1294_v62, %v1261_v57 }
 0x1ec   :  { %v1326_v40 = vld [vmem:[#allocation2 + $0x20] sm:$0xff] }
 0x1ed   :  { %1147 = vst [vmem:[#allocation2 + $0x31] sm:$0xff] %v1131_v41  ;;  %v1164_v33 = vmul.f32 %v2821_v5, %v1131_v41  ;;  %v1197_v19 = vmul.f32 %v1326_v40, %v2818_v61  ;;  %v1343_v35 = vmul.f32 %v2837_v53, %v1326_v40  ;;  %v1440_v1 = vmul.f32 %v2847_v38, %v1326_v40  ;;  %v1278_v44 = vld [vmem:[#allocation2 + $0x22] sm:$0xff] }
 0x1ee   :  { %v1392_v28 = vmul.f32 %v2843_v63, %v1278_v44  ;;  %v1538_v6 = vmul.f32 %v2859_v45, %v1278_v44  ;;  %v1295_v22 = vmul.f32 %v2834_v39, %v1278_v44  ;;  %v1490_v57 = vmul.f32 %v2852_v20, %v1131_v41 }
 0x1ef   :  { %v1213_v30 = vadd.f32 %v1197_v19, %v1164_v33  ;;  %v1456_v31 = vadd.f32 %v1440_v1, %v1407_v50  ;;  %v1359_v36 = vadd.f32 %v1343_v35, %v1310_v59  ;;  %v1247_v33 = vmul.f32 %v2828_v60, %v1131_v41 }
 0x1f0   :  { %v1096_v8 = vpop.f32.mrf.mxu2 }
 0x1f1   :  { %v1097_v9 = vadd.f32 %v2813_v52, %v1096_v8  ;;  %v1505_v4 = vadd.f32 %v1489_v10, %v1456_v31  ;;  %v1262_v11 = vadd.f32 %v1246_v16, %v1213_v30  ;;  %v1408_v48 = vadd.f32 %v1392_v28, %v1359_v36 }
 0x1f3   :  { %v1132_v24 = vmax.f32 %v1097_v9, 0.0  ;;  %v1554_v46 = vadd.f32 %v1538_v6, %v1505_v4  ;;  %v1311_v51 = vadd.f32 %v1295_v22, %v1262_v11 }
 0x1f4   :  { %v1327_v17 = vld [vmem:[#allocation2 + $0x30] sm:$0xff] }
 0x1f5   :  { %1148 = vst [vmem:[#allocation2 + $0x41] sm:$0xff] %v1132_v24  ;;  %v1165_v54 = vmul.f32 %v2821_v5, %v1132_v24  ;;  %v1198_v14 = vmul.f32 %v1327_v17, %v2818_v61  ;;  %v1344_v29 = vmul.f32 %v2837_v53, %v1327_v17  ;;  %v1441_v18 = vmul.f32 %v2847_v38, %v1327_v17  ;;  %v1279_v49 = vld [vmem:[#allocation2 + $0x32] sm:$0xff] }
 0x1f6   :  { %v1539_v62 = vmul.f32 %v2859_v45, %v1279_v49  ;;  %v1573_v50 = vadd.f32 %v2872_v26, %v1554_v46  ;;  %v1393_v8 = vmul.f32 %v2843_v63, %v1279_v49  ;;  %v1296_v31 = vmul.f32 %v2834_v39, %v1279_v49 }
 0x1f7   :  { %v1214_v0 = vadd.f32 %v1198_v14, %v1165_v54  ;;  %v1457_v47 = vadd.f32 %v1441_v18, %v1408_v48  ;;  %v1360_v56 = vadd.f32 %v1344_v29, %v1311_v51  ;;  %v1491_v29 = vmul.f32 %v2852_v20, %v1132_v24 }
 0x1f8   :  { %v1099_v27 = vpop.f32.mrf.mxu2  ;;  %v1589_v4 = vmax.f32 %v1573_v50, 0.0  ;;  %v1248_v18 = vmul.f32 %v2828_v60, %v1132_v24 }
 0x1f9   :  { %v1100_v40 = vadd.f32 %v2813_v52, %v1099_v27  ;;  %v1506_v19 = vadd.f32 %v1490_v57, %v1457_v47  ;;  %v1263_v1 = vadd.f32 %v1247_v33, %v1214_v0  ;;  %v1409_v36 = vadd.f32 %v1393_v8, %v1360_v56 }
 0x1fb   :  { %v1133_v35 = vmax.f32 %v1100_v40, 0.0  ;;  %v1555_v30 = vadd.f32 %v1539_v62, %v1506_v19  ;;  %v1312_v11 = vadd.f32 %v1296_v31, %v1263_v1 }
 0x1fc   :  { %v1328_v59 = vld [vmem:[#allocation2 + $0x40] sm:$0xff] }
 0x1fd   :  { %1149 = vst [vmem:[#allocation2 + $0x51] sm:$0xff] %v1133_v35  ;;  %v1166_v44 = vmul.f32 %v2821_v5, %v1133_v35  ;;  %v1199_v9 = vmul.f32 %v1328_v59, %v2818_v61  ;;  %v1345_v41 = vmul.f32 %v2837_v53, %v1328_v59  ;;  %v1574_v10 = vadd.f32 %v2872_v26, %v1555_v30  ;;  %v1280_v6 = vld [vmem:[#allocation2 + $0x42] sm:$0xff] }
 0x1fe   :  { %v1442_v16 = vmul.f32 %v2847_v38, %v1328_v59  ;;  %v1394_v47 = vmul.f32 %v2843_v63, %v1280_v6  ;;  %v1540_v56 = vmul.f32 %v2859_v45, %v1280_v6  ;;  %v1297_v33 = vmul.f32 %v2834_v39, %v1280_v6 }
 0x1ff   :  { %v1215_v17 = vadd.f32 %v1199_v9, %v1166_v44  ;;  %v1590_v54 = vmax.f32 %v1574_v10, 0.0  ;;  %v1361_v48 = vadd.f32 %v1345_v41, %v1312_v11  ;;  %v1492_v44 = vmul.f32 %v2852_v20, %v1133_v35 }
 0x200   :  { %v1101_v28 = vpop.f32.mrf.mxu2  ;;  %v1458_v14 = vadd.f32 %v1442_v16, %v1409_v36  ;;  %v1249_v10 = vmul.f32 %v2828_v60, %v1133_v35 }
 0x201   :  { %v1102_v22 = vadd.f32 %v2813_v52, %v1101_v28  ;;  %v1605_v49 = vpack.c.bf16 %v1590_v54, %v1589_v4  ;;  %v1264_v0 = vadd.f32 %v1248_v18, %v1215_v17  ;;  %v1410_v24 = vadd.f32 %v1394_v47, %v1361_v48 }
 0x202   :  { %v1507_v51 = vadd.f32 %v1491_v29, %v1458_v14 }
 0x203   :  { %v1134_v46 = vmax.f32 %v1102_v22, 0.0  ;;  %1672 = vmatmul.bf16.vlgmr.msra.gmra.mxu3 %v1605_v49  ;;  %v1313_v59 = vadd.f32 %v1297_v33, %v1264_v0 }
 0x204   :  { %v1329_v27 = vld [vmem:[#allocation2 + $0x50] sm:$0xff]  ;;  %v1556_v1 = vadd.f32 %v1540_v56, %v1507_v51 }
 0x205   :  { %1150 = vst [vmem:[#allocation2 + $0x61] sm:$0xff] %v1134_v46  ;;  %v1167_v57 = vmul.f32 %v2821_v5, %v1134_v46  ;;  %v1200_v40 = vmul.f32 %v1329_v27, %v2818_v61  ;;  %v1346_v19 = vmul.f32 %v2837_v53, %v1329_v27  ;;  %v1443_v62 = vmul.f32 %v2847_v38, %v1329_v27  ;;  %v1281_v50 = vld [vmem:[#allocation2 + $0x52] sm:$0xff] }
 0x206   :  { %v1541_v16 = vmul.f32 %v2859_v45, %v1281_v50  ;;  %v1575_v11 = vadd.f32 %v2872_v26, %v1556_v1  ;;  %v1395_v14 = vmul.f32 %v2843_v63, %v1281_v50  ;;  %v1298_v6 = vmul.f32 %v2834_v39, %v1281_v50 }
 0x207   :  { %v1216_v30 = vadd.f32 %v1200_v40, %v1167_v57  ;;  %v1459_v31 = vadd.f32 %v1443_v62, %v1410_v24  ;;  %v1362_v41 = vadd.f32 %v1346_v19, %v1313_v59  ;;  %v1250_v24 = vmul.f32 %v2828_v60, %v1134_v46 }
 0x208   :  { %v1104_v8 = vpop.f32.mrf.mxu2  ;;  %v1591_v51 = vmax.f32 %v1575_v11, 0.0  ;;  %v1493_v50 = vmul.f32 %v2852_v20, %v1134_v46 }
 0x209   :  { %v1105_v9 = vadd.f32 %v2813_v52, %v1104_v8  ;;  %v1508_v36 = vadd.f32 %v1492_v44, %v1459_v31  ;;  %v1265_v17 = vadd.f32 %v1249_v10, %v1216_v30  ;;  %v1411_v18 = vadd.f32 %v1395_v14, %v1362_v41 }
 0x20b   :  { %v1135_v4 = vmax.f32 %v1105_v9, 0.0  ;;  %v1557_v54 = vadd.f32 %v1541_v16, %v1508_v36  ;;  %v1314_v0 = vadd.f32 %v1298_v6, %v1265_v17 }
 0x20c   :  { %v1330_v28 = vld [vmem:[#allocation2 + $0x60] sm:$0xff] }
 0x20d   :  { %1151 = vst [vmem:[#allocation2 + $0x71] sm:$0xff] %v1135_v4  ;;  %v1168_v22 = vmul.f32 %v2821_v5, %v1135_v4  ;;  %v1201_v29 = vmul.f32 %v1330_v28, %v2818_v61  ;;  %v1347_v35 = vmul.f32 %v2837_v53, %v1330_v28  ;;  %v1576_v48 = vadd.f32 %v2872_v26, %v1557_v54  ;;  %v1282_v56 = vld [vmem:[#allocation2 + $0x62] sm:$0xff] }
 0x20e   :  { %v1444_v49 = vmul.f32 %v2847_v38, %v1330_v28  ;;  %v1396_v8 = vmul.f32 %v2843_v63, %v1282_v56  ;;  %v1299_v44 = vmul.f32 %v2834_v39, %v1282_v56  ;;  %v1542_v46 = vmul.f32 %v2859_v45, %v1282_v56 }
 0x20f   :  { %v1217_v27 = vadd.f32 %v1201_v29, %v1168_v22  ;;  %v1592_v57 = vmax.f32 %v1576_v48, 0.0  ;;  %v1363_v19 = vadd.f32 %v1347_v35, %v1314_v0  ;;  %v1251_v17 = vmul.f32 %v2828_v60, %v1135_v4 }
 0x210   :  { %v1106_v47 = vpop.f32.mrf.mxu2  ;;  %v1460_v40 = vadd.f32 %v1444_v49, %v1411_v18  ;;  %v1494_v22 = vmul.f32 %v2852_v20, %v1135_v4  ;;  %v1186_v18 = vld [vmem:[#allocation2 + $0xa0] sm:$0xff] }
 0x211   :  { %v1107_v33 = vadd.f32 %v2813_v52, %v1106_v47  ;;  %v1606_v62 = vpack.c.bf16 %v1592_v57, %v1591_v51  ;;  %v1266_v59 = vadd.f32 %v1250_v24, %v1217_v27  ;;  %v1412_v36 = vadd.f32 %v1396_v8, %v1363_v19  ;;  %v1235_v57 = vld [vmem:[#allocation2 + $0xa1] sm:$0xff] }
 0x212   :  { %v1509_v31 = vadd.f32 %v1493_v50, %v1460_v40  ;;  %v1203_v56 = vmul.f32 %v2818_v61, %v1186_v18 }
 0x213   :  { %v1136_v1 = vmax.f32 %v1107_v33, 0.0  ;;  %1677 = vmatmul.bf16.gmra.mxu3 %v1606_v62  ;;  %v1315_v54 = vadd.f32 %v1299_v44, %v1266_v59  ;;  %v1430_v62 = vld [vmem:[#allocation2 + $0x90] sm:$0xff] }
 0x214   :  { %v1331_v30 = vld [vmem:[#allocation2 + $0x70] sm:$0xff]  ;;  %v1558_v29 = vadd.f32 %v1542_v46, %v1509_v31 }
 0x215   :  { %1152 = vst [vmem:[#allocation2 + $0x81] sm:$0xff] %v1136_v1  ;;  %v1169_v9 = vmul.f32 %v2821_v5, %v1136_v1  ;;  %v1202_v41 = vmul.f32 %v1331_v30, %v2818_v61  ;;  %v1348_v10 = vmul.f32 %v2837_v53, %v1331_v30  ;;  %v1445_v16 = vmul.f32 %v2847_v38, %v1331_v30  ;;  %v1283_v28 = vld [vmem:[#allocation2 + $0x72] sm:$0xff] }
 0x216   :  { %v1543_v0 = vmul.f32 %v2859_v45, %v1283_v28  ;;  %v1300_v27 = vmul.f32 %v2834_v39, %v1283_v28  ;;  %v1577_v19 = vadd.f32 %v2872_v26, %v1558_v29  ;;  %v1397_v24 = vmul.f32 %v2843_v63, %v1283_v28  ;;  %v1528_v29 = vld [vmem:[#allocation2 + $0x92] sm:$0xff] }
 0x217   :  { %v1218_v11 = vadd.f32 %v1202_v41, %v1169_v9  ;;  %v1461_v6 = vadd.f32 %v1445_v16, %v1412_v36  ;;  %v1364_v49 = vadd.f32 %v1348_v10, %v1315_v54  ;;  %v1252_v41 = vmul.f32 %v2828_v60, %v1235_v57  ;;  %v1479_v16 = vld [vmem:[#allocation2 + $0x91] sm:$0xff] }
 0x218   :  { %v1109_v14 = vpop.f32.mrf.mxu2  ;;  %v1447_v36 = vmul.f32 %v2847_v38, %v1430_v62  ;;  %v1496_v18 = vmul.f32 %v2852_v20, %v1479_v16 }
 0x219   :  { %v1267_v35 = vadd.f32 %v1251_v17, %v1218_v11  ;;  %v1110_v48 = vadd.f32 %v2813_v52, %v1109_v14  ;;  %v1510_v51 = vadd.f32 %v1494_v22, %v1461_v6  ;;  %v1413_v31 = vadd.f32 %v1397_v24, %v1364_v49  ;;  %v1284_v14 = vld [vmem:[#allocation2 + $0xa2] sm:$0xff] }
 0x21a   :  { %v1593_v17 = vmax.f32 %v1577_v19, 0.0 }
 0x21b   :  { %v1137_v47 = vmax.f32 %v1110_v48, 0.0  ;;  %v1559_v33 = vadd.f32 %v1543_v0, %v1510_v51  ;;  %v1316_v50 = vadd.f32 %v1300_v27, %v1267_v35  ;;  %v1495_v48 = vmul.f32 %v2852_v20, %v1136_v1 }
 0x21c   :  { %v1332_v40 = vld [vmem:[#allocation2 + $0x80] sm:$0xff]  ;;  %v1301_v27 = vmul.f32 %v2834_v39, %v1284_v14 }
 0x21d   :  { %v1381_v4 = vld [vmem:[#allocation2 + $0x82] sm:$0xff]  ;;  %v1349_v59 = vmul.f32 %v2837_v53, %v1332_v40  ;;  %1153 = vst [vmem:[#allocation2 + $0xb1] sm:$0xff] %v1137_v47  ;;  %v1170_v30 = vmul.f32 %v2821_v5, %v1137_v47  ;;  %v1578_v8 = vadd.f32 %v2872_v26, %v1559_v33  ;;  %v1446_v44 = vmul.f32 %v2847_v38, %v1332_v40 }
 0x21e   :  { %v1398_v10 = vmul.f32 %v2843_v63, %v1381_v4  ;;  %v1544_v62 = vmul.f32 %v2859_v45, %v1381_v4 }
 0x21f   :  { %v1365_v9 = vadd.f32 %v1349_v59, %v1316_v50  ;;  %v1219_v46 = vadd.f32 %v1203_v56, %v1170_v30  ;;  %v1594_v28 = vmax.f32 %v1578_v8, 0.0  ;;  %v1462_v54 = vadd.f32 %v1446_v44, %v1413_v31 }
 0x220   :  { %v1111_v11 = vpop.f32.mrf.mxu2  ;;  %v1545_v56 = vmul.f32 %v2859_v45, %v1528_v29 }
 0x221   :  { %v1112_v6 = vadd.f32 %v2813_v52, %v1111_v11  ;;  %v1414_v22 = vadd.f32 %v1398_v10, %v1365_v9  ;;  %v1607_v35 = vpack.c.bf16 %v1594_v28, %v1593_v17  ;;  %v1268_v0 = vadd.f32 %v1252_v41, %v1219_v46 }
 0x222   :  { %v1511_v40 = vadd.f32 %v1495_v48, %v1462_v54  ;;  %v1253_v10 = vmul.f32 %v2828_v60, %v1137_v47 }
 0x223   :  { %v1138_v49 = vmax.f32 %v1112_v6, 0.0  ;;  %v1463_v51 = vadd.f32 %v1447_v36, %v1414_v22  ;;  %1682 = vmatmul.bf16.gmra.mxu3 %v1607_v35  ;;  %v1317_v50 = vadd.f32 %v1301_v27, %v1268_v0 }
 0x224   :  { %v1333_v57 = vld [vmem:[#allocation2 + $0xb0] sm:$0xff]  ;;  %v1560_v8 = vadd.f32 %v1544_v62, %v1511_v40 }
 0x225   :  { %1154 = vst [vmem:[#allocation2 + $0xc1] sm:$0xff] %v1138_v49  ;;  %v1171_v33 = vmul.f32 %v2821_v5, %v1138_v49  ;;  %v1204_v19 = vmul.f32 %v1333_v57, %v2818_v61  ;;  %v1350_v24 = vmul.f32 %v2837_v53, %v1333_v57  ;;  %v1512_v1 = vadd.f32 %v1496_v18, %v1463_v51  ;;  %v1285_v44 = vld [vmem:[#allocation2 + $0xb2] sm:$0xff] }
 0x226   :  { %v1579_v17 = vadd.f32 %v2872_v26, %v1560_v8  ;;  %v1399_v4 = vmul.f32 %v2843_v63, %v1285_v44  ;;  %v1302_v28 = vmul.f32 %v2834_v39, %v1285_v44  ;;  %v1497_v40 = vmul.f32 %v2852_v20, %v1138_v49 }
 0x227   :  { %v1220_v59 = vadd.f32 %v1204_v19, %v1171_v33  ;;  %v1561_v31 = vadd.f32 %v1545_v56, %v1512_v1  ;;  %v1366_v41 = vadd.f32 %v1350_v24, %v1317_v50  ;;  %v1254_v33 = vmul.f32 %v2828_v60, %v1138_v49 }
 0x228   :  { %v1114_v30 = vpop.f32.mrf.mxu2  ;;  %v1595_v51 = vmax.f32 %v1579_v17, 0.0 }
 0x229   :  { %v1115_v9 = vadd.f32 %v2813_v52, %v1114_v30  ;;  %v1580_v36 = vadd.f32 %v2872_v26, %v1561_v31  ;;  %v1269_v46 = vadd.f32 %v1253_v10, %v1220_v59  ;;  %v1415_v47 = vadd.f32 %v1399_v4, %v1366_v41 }
 0x22b   :  { %v1139_v16 = vmax.f32 %v1115_v9, 0.0  ;;  %v1596_v22 = vmax.f32 %v1580_v36, 0.0  ;;  %v1318_v35 = vadd.f32 %v1302_v28, %v1269_v46 }
 0x22c   :  { %v1334_v11 = vld [vmem:[#allocation2 + $0xc0] sm:$0xff] }
 0x22d   :  { %1155 = vst [vmem:[#allocation2 + $0xd1] sm:$0xff] %v1139_v16  ;;  %v1172_v54 = vmul.f32 %v2821_v5, %v1139_v16  ;;  %v1205_v14 = vmul.f32 %v1334_v11, %v2818_v61  ;;  %v1351_v6 = vmul.f32 %v2837_v53, %v1334_v11  ;;  %v1448_v29 = vmul.f32 %v2847_v38, %v1334_v11  ;;  %v1286_v27 = vld [vmem:[#allocation2 + $0xc2] sm:$0xff] }
 0x22e   :  { %v1608_v19 = vpack.c.bf16 %v1596_v22, %v1595_v51  ;;  %v1400_v59 = vmul.f32 %v2843_v63, %v1286_v27  ;;  %v1546_v31 = vmul.f32 %v2859_v45, %v1286_v27  ;;  %v1303_v44 = vmul.f32 %v2834_v39, %v1286_v27 }
 0x22f   :  { %v1221_v48 = vadd.f32 %v1205_v14, %v1172_v54  ;;  %v1464_v0 = vadd.f32 %v1448_v29, %v1415_v47  ;;  %v1367_v56 = vadd.f32 %v1351_v6, %v1318_v35  ;;  %v1498_v28 = vmul.f32 %v2852_v20, %v1139_v16 }
 0x230   :  { %v1116_v18 = vpop.f32.mrf.mxu2  ;;  %v1255_v6 = vmul.f32 %v2828_v60, %v1139_v16 }
 0x231   :  { %v1117_v57 = vadd.f32 %v2813_v52, %v1116_v18  ;;  %v1513_v1 = vadd.f32 %v1497_v40, %v1464_v0  ;;  %v1270_v62 = vadd.f32 %v1254_v33, %v1221_v48  ;;  %v1416_v49 = vadd.f32 %v1400_v59, %v1367_v56 }
 0x233   :  { %v1140_v24 = vmax.f32 %v1117_v57, 0.0  ;;  %1687 = vmatmul.bf16.gmra.mxu3 %v1608_v19  ;;  %v1562_v36 = vadd.f32 %v1546_v31, %v1513_v1  ;;  %v1319_v46 = vadd.f32 %v1303_v44, %v1270_v62 }
 0x234   :  { %v1335_v50 = vld [vmem:[#allocation2 + $0xd0] sm:$0xff] }
 0x235   :  { %1156 = vst [vmem:[#allocation2 + $0xe1] sm:$0xff] %v1140_v24  ;;  %v1173_v30 = vmul.f32 %v2821_v5, %v1140_v24  ;;  %v1206_v8 = vmul.f32 %v1335_v50, %v2818_v61  ;;  %v1352_v9 = vmul.f32 %v2837_v53, %v1335_v50  ;;  %v1449_v41 = vmul.f32 %v2847_v38, %v1335_v50  ;;  %v1287_v10 = vld [vmem:[#allocation2 + $0xd2] sm:$0xff] }
 0x236   :  { %v1547_v47 = vmul.f32 %v2859_v45, %v1287_v10  ;;  %v1581_v35 = vadd.f32 %v2872_v26, %v1562_v36  ;;  %v1401_v0 = vmul.f32 %v2843_v63, %v1287_v10  ;;  %v1304_v27 = vmul.f32 %v2834_v39, %v1287_v10 }
 0x237   :  { %v1222_v11 = vadd.f32 %v1206_v8, %v1173_v30  ;;  %v1465_v4 = vadd.f32 %v1449_v41, %v1416_v49  ;;  %v1368_v14 = vadd.f32 %v1352_v9, %v1319_v46  ;;  %v1499_v9 = vmul.f32 %v2852_v20, %v1140_v24 }
 0x238   :  { %v1119_v17 = vpop.f32.mrf.mxu2  ;;  %v1597_v1 = vmax.f32 %v1581_v35, 0.0  ;;  %v1256_v41 = vmul.f32 %v2828_v60, %v1140_v24 }
 0x239   :  { %v1120_v54 = vadd.f32 %v2813_v52, %v1119_v17  ;;  %v1514_v22 = vadd.f32 %v1498_v28, %v1465_v4  ;;  %v1271_v48 = vadd.f32 %v1255_v6, %v1222_v11  ;;  %v1417_v33 = vadd.f32 %v1401_v0, %v1368_v14 }
 0x23b   :  { %v1141_v29 = vmax.f32 %v1120_v54, 0.0  ;;  %v1563_v51 = vadd.f32 %v1547_v47, %v1514_v22  ;;  %v1320_v62 = vadd.f32 %v1304_v27, %v1271_v48 }
 0x23c   :  { %v1336_v18 = vld [vmem:[#allocation2 + $0xe0] sm:$0xff] }
 0x23d   :  { %1157 = vst [vmem:[#allocation2 + $0xf1] sm:$0xff] %v1141_v29  ;;  %v1174_v57 = vmul.f32 %v2821_v5, %v1141_v29  ;;  %v1207_v40 = vmul.f32 %v1336_v18, %v2818_v61  ;;  %v1353_v16 = vmul.f32 %v2837_v53, %v1336_v18  ;;  %v1582_v56 = vadd.f32 %v2872_v26, %v1563_v51  ;;  %v1288_v31 = vld [vmem:[#allocation2 + $0xe2] sm:$0xff] }
 0x23e   :  { %v1450_v19 = vmul.f32 %v2847_v38, %v1336_v18  ;;  %v1402_v4 = vmul.f32 %v2843_v63, %v1288_v31  ;;  %v1548_v14 = vmul.f32 %v2859_v45, %v1288_v31  ;;  %v1305_v6 = vmul.f32 %v2834_v39, %v1288_v31 }
 0x23f   :  { %v1223_v50 = vadd.f32 %v1207_v40, %v1174_v57  ;;  %v1598_v30 = vmax.f32 %v1582_v56, 0.0  ;;  %v1369_v49 = vadd.f32 %v1353_v16, %v1320_v62  ;;  %v1500_v57 = vmul.f32 %v2852_v20, %v1141_v29 }
 0x240   :  { %v1121_v59 = vpop.f32.mrf.mxu2  ;;  %v1466_v8 = vadd.f32 %v1450_v19, %v1417_v33  ;;  %v1257_v56 = vmul.f32 %v2828_v60, %v1141_v29 }
 0x241   :  { %v1122_v44 = vadd.f32 %v2813_v52, %v1121_v59  ;;  %v1609_v10 = vpack.c.bf16 %v1598_v30, %v1597_v1  ;;  %v1272_v11 = vadd.f32 %v1256_v41, %v1223_v50  ;;  %v1418_v24 = vadd.f32 %v1402_v4, %v1369_v49 }
 0x242   :  { %v1515_v46 = vadd.f32 %v1499_v9, %v1466_v8 }
 0x243   :  { %v1142_v36 = vmax.f32 %v1122_v44, 0.0  ;;  %1692 = vmatmul.bf16.gmra.mxu3 %v1609_v10  ;;  %v1321_v18 = vadd.f32 %v1305_v6, %v1272_v11 }
 0x244   :  { %v1337_v17 = vld [vmem:[#allocation2 + $0xf0] sm:$0xff]  ;;  %v1564_v48 = vadd.f32 %v1548_v14, %v1515_v46 }
 0x245   :  { %1158 = vst [vmem:[#allocation2 + $0x101] sm:$0xff] %v1142_v36  ;;  %v1175_v28 = vmul.f32 %v2821_v5, %v1142_v36  ;;  %v1208_v54 = vmul.f32 %v1337_v17, %v2818_v61  ;;  %v1354_v22 = vmul.f32 %v2837_v53, %v1337_v17  ;;  %v1451_v47 = vmul.f32 %v2847_v38, %v1337_v17  ;;  %v1289_v35 = vld [vmem:[#allocation2 + $0xf2] sm:$0xff] }
 0x246   :  { %v1549_v19 = vmul.f32 %v2859_v45, %v1289_v35  ;;  %v1583_v62 = vadd.f32 %v2872_v26, %v1564_v48  ;;  %v1403_v8 = vmul.f32 %v2843_v63, %v1289_v35  ;;  %v1306_v31 = vmul.f32 %v2834_v39, %v1289_v35 }
 0x247   :  { %v1224_v51 = vadd.f32 %v1208_v54, %v1175_v28  ;;  %v1467_v27 = vadd.f32 %v1451_v47, %v1418_v24  ;;  %v1370_v16 = vadd.f32 %v1354_v22, %v1321_v18  ;;  %v1258_v24 = vmul.f32 %v2828_v60, %v1142_v36 }
 0x248   :  { %v1124_v0 = vpop.f32.mrf.mxu2  ;;  %v1599_v46 = vmax.f32 %v1583_v62, 0.0  ;;  %v1501_v35 = vmul.f32 %v2852_v20, %v1142_v36 }
 0x249   :  { %v1125_v40 = vadd.f32 %v2813_v52, %v1124_v0  ;;  %v1516_v33 = vadd.f32 %v1500_v57, %v1467_v27  ;;  %v1273_v50 = vadd.f32 %v1257_v56, %v1224_v51  ;;  %v1419_v41 = vadd.f32 %v1403_v8, %v1370_v16 }
 0x24b   :  { %v1143_v1 = vmax.f32 %v1125_v40, 0.0  ;;  %v1565_v30 = vadd.f32 %v1549_v19, %v1516_v33  ;;  %v1322_v11 = vadd.f32 %v1306_v31, %v1273_v50 }
 0x24c   :  { %v1338_v59 = vld [vmem:[#allocation2 + $0x100] sm:$0xff] }
 0x24d   :  { %1159 = vst [vmem:[#allocation2 + $0x111] sm:$0xff] %v1143_v1  ;;  %v1176_v44 = vmul.f32 %v2821_v5, %v1143_v1  ;;  %v1209_v9 = vmul.f32 %v1338_v59, %v2818_v61  ;;  %v1355_v29 = vmul.f32 %v2837_v53, %v1338_v59  ;;  %v1584_v49 = vadd.f32 %v2872_v26, %v1565_v30  ;;  %v1290_v14 = vld [vmem:[#allocation2 + $0x102] sm:$0xff] }
 0x24e   :  { %v1452_v10 = vmul.f32 %v2847_v38, %v1338_v59  ;;  %v1404_v0 = vmul.f32 %v2843_v63, %v1290_v14  ;;  %v1307_v57 = vmul.f32 %v2834_v39, %v1290_v14  ;;  %v1550_v36 = vmul.f32 %v2859_v45, %v1290_v14  ;;  %v1487_v14 = vld [vmem:[#allocation2 + $0x131] sm:$0xff] }
 0x24f   :  { %v1225_v17 = vadd.f32 %v1209_v9, %v1176_v44  ;;  %v1600_v28 = vmax.f32 %v1584_v49, 0.0  ;;  %v1371_v22 = vadd.f32 %v1355_v29, %v1322_v11  ;;  %v1259_v62 = vmul.f32 %v2828_v60, %v1143_v1  ;;  %v1438_v11 = vld [vmem:[#allocation2 + $0x130] sm:$0xff] }
 0x250   :  { %v1126_v4 = vpop.f32.mrf.mxu2  ;;  %v1468_v54 = vadd.f32 %v1452_v10, %v1419_v41  ;;  %v1502_v8 = vmul.f32 %v2852_v20, %v1143_v1 }
 0x251   :  { %v1127_v6 = vadd.f32 %v2813_v52, %v1126_v4  ;;  %v1610_v47 = vpack.c.bf16 %v1600_v28, %v1599_v46  ;;  %v1274_v18 = vadd.f32 %v1258_v24, %v1225_v17  ;;  %v1420_v56 = vadd.f32 %v1404_v0, %v1371_v22 }
 0x252   :  { %v1517_v27 = vadd.f32 %v1501_v35, %v1468_v54  ;;  %v1455_v22 = vmul.f32 %v2847_v38, %v1438_v11  ;;  %v1504_v0 = vmul.f32 %v2852_v20, %v1487_v14 }
 0x253   :  { %v1144_v48 = vmax.f32 %v1127_v6, 0.0  ;;  %1697 = vmatmul.bf16.gmra.mxu3 %v1610_v47  ;;  %v1323_v59 = vadd.f32 %v1307_v57, %v1274_v18  ;;  %v1536_v18 = vld [vmem:[#allocation2 + $0x132] sm:$0xff] }
 0x254   :  { %v1339_v51 = vld [vmem:[#allocation2 + $0x110] sm:$0xff]  ;;  %v1566_v31 = vadd.f32 %v1550_v36, %v1517_v27 }
 0x255   :  { %1160 = vst [vmem:[#allocation2 + $0x121] sm:$0xff] %v1144_v48  ;;  %v1177_v40 = vmul.f32 %v2821_v5, %v1144_v48  ;;  %v1210_v52 = vmul.f32 %v1339_v51, %v2818_v61  ;;  %v1356_v16 = vmul.f32 %v2837_v53, %v1339_v51  ;;  %v1453_v33 = vmul.f32 %v2847_v38, %v1339_v51  ;;  %v1291_v50 = vld [vmem:[#allocation2 + $0x112] sm:$0xff] }
 0x256   :  { %v1551_v61 = vmul.f32 %v2859_v45, %v1291_v50  ;;  %v1308_v29 = vmul.f32 %v2834_v39, %v1291_v50  ;;  %v1585_v10 = vadd.f32 %v2872_v26, %v1566_v31  ;;  %v1405_v60 = vmul.f32 %v2843_v63, %v1291_v50 }
 0x257   :  { %v1226_v19 = vadd.f32 %v1210_v52, %v1177_v40  ;;  %v1469_v30 = vadd.f32 %v1453_v33, %v1420_v56  ;;  %v1372_v5 = vadd.f32 %v1356_v16, %v1323_v59  ;;  %v1553_v40 = vmul.f32 %v2859_v45, %v1536_v18 }
 0x258   :  { %v1601_v24 = vmax.f32 %v1585_v10, 0.0 }
 0x259   :  { %v1275_v44 = vadd.f32 %v1259_v62, %v1226_v19  ;;  %v1518_v9 = vadd.f32 %v1502_v8, %v1469_v30  ;;  %v1421_v54 = vadd.f32 %v1405_v60, %v1372_v5 }
 0x25b   :  { %v1567_v41 = vadd.f32 %v1551_v61, %v1518_v9  ;;  %v1324_v17 = vadd.f32 %v1308_v29, %v1275_v44 }
 0x25c   :  { %v1340_v49 = vld [vmem:[#allocation2 + $0x120] sm:$0xff] }
 0x25d   :  { %v1389_v46 = vld [vmem:[#allocation2 + $0x122] sm:$0xff]  ;;  %v1357_v4 = vmul.f32 %v2837_v53, %v1340_v49  ;;  %v1454_v1 = vmul.f32 %v2847_v38, %v1340_v49  ;;  %v1586_v28 = vadd.f32 %v2872_v26, %v1567_v41  ;;  %v1503_v53 = vmul.f32 %v2852_v20, %v1144_v48  ;;  %v3026_v20 = vld [vmem:[%s3096_s14] ss:$0 sm:$0xff]  ;;  %s2121_s14 = smov [#allocation11]  }
 0x25e   :  { %v1406_v39 = vmul.f32 %v2843_v63, %v1389_v46  ;;  %v1552_v63 = vmul.f32 %v2859_v45, %v1389_v46  ;;  %s1749_s24 = sshll.u32 %s2121_s14, 4  ;;  %s1750_s24 = int_to_ptr.vmem [resolvable:$true] %s1749_s24 }
 0x25f   :  { %v1373_v6 = vadd.f32 %v1357_v4, %v1324_v17  ;;  %v1602_v47 = vmax.f32 %v1586_v28, 0.0  ;;  %v1470_v35 = vadd.f32 %v1454_v1, %v1421_v54 }
 0x261   :  { %v1422_v51 = vadd.f32 %v1406_v39, %v1373_v6  ;;  %v1611_v27 = vpack.c.bf16 %v1602_v47, %v1601_v24  ;;  %v1519_v52 = vadd.f32 %v1503_v53, %v1470_v35 }
 0x263   :  { %v1471_v57 = vadd.f32 %v1455_v22, %v1422_v51  ;;  %1702 = vmatmul.bf16.gmra.mxu3 %v1611_v27  ;;  %v1568_v38 = vadd.f32 %v1552_v63, %v1519_v52 }
 0x265   :  { %v1520_v16 = vadd.f32 %v1504_v0, %v1471_v57  ;;  %v1587_v36 = vadd.f32 %v2872_v26, %v1568_v38 }
 0x267   :  { %v1569_v56 = vadd.f32 %v1553_v40, %v1520_v16  ;;  %v1603_v62 = vmax.f32 %v1587_v36, 0.0 }
 0x269   :  { %v1588_v33 = vadd.f32 %v2872_v26, %v1569_v56 }
 0x26b   :  { %v1604_v19 = vmax.f32 %v1588_v33, 0.0 }
 0x26d   :  { %v1612_v50 = vpack.c.bf16 %v1604_v19, %v1603_v62 }
 0x273   :  { %1707 = vmatmul.bf16.gmra.mxu3 %v1612_v50 }
 0x286   :  { %v1673_v48 = vpop.f32.mrf.mxu3 }
 0x287   :  { %v1674_v59 = vadd.f32 %v3026_v20, %v1673_v48 }
 0x289   :  { %v1713_v45 = vadd.f32 %v1674_v59, %v2681_v32 }
 0x28b   :  { %1729 = vst.msk [vmem:[#allocation11] sm:$0xff] %vm319_vm0, %v1713_v45 }
 0x28e   :  { %v1675_v30 = vpop.f32.mrf.mxu3 }
 0x28f   :  { %v1676_v8 = vadd.f32 %v3026_v20, %v1675_v30 }
 0x291   :  { %v1714_v26 = vadd.f32 %v1676_v8, %v2685_v34 }
 0x293   :  { %1730 = vst.msk [vmem:[#allocation11 + $0x8] sm:$0xff] %vm319_vm0, %v1714_v26 }
 0x296   :  { %v1678_v31 = vpop.f32.mrf.mxu3 }
 0x297   :  { %v1679_v44 = vadd.f32 %v3026_v20, %v1678_v31 }
 0x299   :  { %v1715_v5 = vadd.f32 %v1679_v44, %v2696_v37 }
 0x29b   :  { %1731 = vst.msk [vmem:[#allocation11 + $0x10] sm:$0xff] %vm319_vm0, %v1715_v5 }
 0x29e   :  { %v1680_v9 = vpop.f32.mrf.mxu3 }
 0x29f   :  { %v1681_v61 = vadd.f32 %v3026_v20, %v1680_v9 }
 0x2a1   :  { %v1716_v32 = vadd.f32 %v1681_v61, %v2700_v2 }
 0x2a3   :  { %1732 = vst.msk [vmem:[#allocation11 + $0x18] sm:$0xff] %vm319_vm0, %v1716_v32 }
 0x2a6   :  { %v1683_v29 = vpop.f32.mrf.mxu3 }
 0x2a7   :  { %v1684_v49 = vadd.f32 %v3026_v20, %v1683_v29 }
 0x2a9   :  { %v1717_v34 = vadd.f32 %v1684_v49, %v2711_v13 }
 0x2ab   :  { %1733 = vst.msk [vmem:[#allocation11 + $0x20] sm:$0xff] %vm319_vm0, %v1717_v34 }
 0x2ae   :  { %v1685_v41 = vpop.f32.mrf.mxu3 }
 0x2af   :  { %v1686_v10 = vadd.f32 %v3026_v20, %v1685_v41 }
 0x2b1   :  { %v1718_v37 = vadd.f32 %v1686_v10, %v2715_v58 }
 0x2b3   :  { %1734 = vst.msk [vmem:[#allocation11 + $0x28] sm:$0xff] %vm319_vm0, %v1718_v37 }
 0x2b6   :  { %v1688_v46 = vpop.f32.mrf.mxu3 }
 0x2b7   :  { %v1689_v60 = vadd.f32 %v3026_v20, %v1688_v46 }
 0x2b9   :  { %v1719_v2 = vadd.f32 %v1689_v60, %v2726_v43 }
 0x2bb   :  { %1735 = vst.msk [vmem:[#allocation11 + $0x30] sm:$0xff] %vm319_vm0, %v1719_v2 }
 0x2be   :  { %v1690_v11 = vpop.f32.mrf.mxu3 }
 0x2bf   :  { %v1691_v17 = vadd.f32 %v3026_v20, %v1690_v11 }
 0x2c1   :  { %v1720_v13 = vadd.f32 %v1691_v17, %v2730_v55 }
 0x2c3   :  { %1736 = vst.msk [vmem:[#allocation11 + $0x38] sm:$0xff] %vm319_vm0, %v1720_v13 }
 0x2c6   :  { %v1693_v4 = vpop.f32.mrf.mxu3 }
 0x2c7   :  { %v1694_v1 = vadd.f32 %v3026_v20, %v1693_v4 }
 0x2c9   :  { %v1721_v58 = vadd.f32 %v1694_v1, %v2741_v25 }
 0x2cb   :  { %1737 = vst.msk [vmem:[#allocation11 + $0x40] sm:$0xff] %vm319_vm0, %v1721_v58 }
 0x2ce   :  { %v1695_v28 = vpop.f32.mrf.mxu3 }
 0x2cf   :  { %v1696_v54 = vadd.f32 %v3026_v20, %v1695_v28 }
 0x2d1   :  { %v1722_v43 = vadd.f32 %v1696_v54, %v2745_v3 }
 0x2d3   :  { %1738 = vst.msk [vmem:[#allocation11 + $0x48] sm:$0xff] %vm319_vm0, %v1722_v43 }
 0x2d6   :  { %v1698_v14 = vpop.f32.mrf.mxu3 }
 0x2d7   :  { %v1699_v6 = vadd.f32 %v3026_v20, %v1698_v14 }
 0x2d9   :  { %v1723_v55 = vadd.f32 %v1699_v6, %v2756_v7 }
 0x2db   :  { %1739 = vst.msk [vmem:[#allocation11 + $0x50] sm:$0xff] %vm319_vm0, %v1723_v55 }
 0x2de   :  { %v1700_v39 = vpop.f32.mrf.mxu3 }
 0x2df   :  { %v1701_v22 = vadd.f32 %v3026_v20, %v1700_v39 }
 0x2e1   :  { %v1724_v25 = vadd.f32 %v1701_v22, %v2760_v23 }
 0x2e3   :  { %1740 = vst.msk [vmem:[#allocation11 + $0x58] sm:$0xff] %vm319_vm0, %v1724_v25 }
 0x2e6   :  { %v1703_v24 = vpop.f32.mrf.mxu3 }
 0x2e7   :  { %v1704_v47 = vadd.f32 %v3026_v20, %v1703_v24 }
 0x2e9   :  { %v1725_v3 = vadd.f32 %v1704_v47, %v2771_v12 }
 0x2eb   :  { %1741 = vst.msk [vmem:[#allocation11 + $0x60] sm:$0xff] %vm319_vm0, %v1725_v3 }
 0x2ee   :  { %v1705_v35 = vpop.f32.mrf.mxu3 }
 0x2ef   :  { %v1706_v18 = vadd.f32 %v3026_v20, %v1705_v35 }
 0x2f1   :  { %v1726_v7 = vadd.f32 %v1706_v18, %v2775_v15 }
 0x2f3   :  { %1742 = vst.msk [vmem:[#allocation11 + $0x68] sm:$0xff] %vm319_vm0, %v1726_v7 }
 0x2f6   :  { %v1708_v51 = vpop.f32.mrf.mxu3 }
 0x2f7   :  { %v1709_v0 = vadd.f32 %v3026_v20, %v1708_v51 }
 0x2f9   :  { %v1727_v23 = vadd.f32 %v1709_v0, %v2786_v21 }
 0x2fb   :  { %1743 = vst.msk [vmem:[#allocation11 + $0x70] sm:$0xff] %vm319_vm0, %v1727_v23 }
 0x2fe   :  { %v1710_v27 = vpop.f32.mrf.mxu3 }
 0x2ff   :  { %v1711_v12 = vadd.f32 %v3026_v20, %v1710_v27 }
 0x301   :  { %v1728_v15 = vadd.f32 %v1711_v12, %v2790_v42 }
 0x303   :  { %1744 = vst.msk [vmem:[#allocation11 + $0x78] sm:$0xff] %vm319_vm0, %v1728_v15 }
 0x304   :  { %1757 = dma.vmem_to_hbm [thread:$0]  %s1750_s24, 2048, %s1752_s6, [#allocation5], %s3118_s25, %s3118_s25, %s2112_s27  }
 0x305   :  { %2108 = dma.done.wait [#allocation5], 2048  }
 0x306   :  { %2109 = vsyncadd [#allocation5], 4294965248 }
 0x307   :  { %1762 = vsyncpa [#allocation4], 1 }
 0x308   :  { %1763 = vsyncpa [#allocation7], 1 }
 0x309   :  { %1764 = vsyncpa [#allocation10], 1 }
 0x30a   :  { %1765 = vsyncpa [#allocation5], 1 }

// kernel: tpu_custom_call.1
= control target key start
LH: loop header
LB: loop body
LE: loop exit
PB: predicated region body
PF: predicated region fallthrough
CT: control target
= control target key end

     0   :  { %20 = vsyncpa [#allocation4], 0  ;;  %s3082_s0 = inlined_call_operand.vmem [shape: bf16[2,8,8,32], index: 0, kind: input, shape index: {}]   ;;  %s3083_s1 = inlined_call_operand.vmem [shape: bf16[2,8,8,32], index: 1, kind: input, shape index: {}]   ;;  %s3084_s2 = inlined_call_operand.hbm [shape: f32[2,1,1,32], index: 2, kind: input, shape index: {}]   ;;  %s3085_s3 = inlined_call_operand.vmem [shape: bf16[32,128], index: 3, kind: input, shape index: {}]   ;;  %s3086_s4 = inlined_call_operand.vmem [shape: f32[1,128], index: 4, kind: input, shape index: {}]   ;;  %s3087_s5 = inlined_call_operand.hbm [shape: f32[9,128], index: 5, kind: input, shape index: {}]   ;;  %s3088_s6 = inlined_call_operand.vmem [shape: f32[1,128], index: 6, kind: input, shape index: {}]   ;;  %s3089_s7 = inlined_call_operand.vmem [shape: bf16[128,32], index: 7, kind: input, shape index: {}]   ;;  %s3090_s8 = inlined_call_operand.vmem [shape: f32[1,32], index: 8, kind: input, shape index: {}]   ;;  %s3091_s9 = inlined_call_operand.hbm [shape: bf16[32,128], index: 9, kind: input, shape index: {}]   ;;  %s3092_s10 = inlined_call_operand.vmem [shape: f32[1,128], index: 10, kind: input, shape index: {}]   ;;  %s3093_s11 = inlined_call_operand.hbm [shape: f32[9,128], index: 11, kind: input, shape index: {}]   ;;  %s3094_s12 = inlined_call_operand.vmem [shape: f32[1,128], index: 12, kind: input, shape index: {}]   ;;  %s3095_s13 = inlined_call_operand.vmem [shape: bf16[128,32], index: 13, kind: input, shape index: {}]   ;;  %s3096_s14 = inlined_call_operand.vmem [shape: f32[1,32], index: 14, kind: input, shape index: {}]   ;;  %s3097_s15 = inlined_call_operand.hbm [shape: f32[2,8,8,32], index: 15, kind: output, shape index: {}]  }
   0x1   :  { %21 = vsyncpa [#allocation7], 0 }
   0x2   :  { %22 = vsyncpa [#allocation10], 0  ;;  %s49_s20 = sshll.u32 %s3087_s5, 4  ;;  %s50_s20 = int_to_ptr.hbm [resolvable:$true] %s49_s20 }
   0x3   :  { %23 = vsyncpa [#allocation5], 0  ;;  %s2110_s21 = smov [#allocation6]   ;;  %s32_s25 = sshll.u32 %s3084_s2, 4  ;;  %s33_s25 = int_to_ptr.hbm [resolvable:$true] %s32_s25 }
   0x4   :  { %s51_s22 = sshll.u32 %s2110_s21, 4  ;;  %s3098_s26 = smov 128   ;;  %s52_s22 = int_to_ptr.vmem [resolvable:$true] %s51_s22 }
   0x5   :  { %s2112_s27 = smov 8   ;;  %s2113_s28 = smov [#allocation3]  }
   0x6   :  { %57 = dma.hbm_to_vmem [thread:$0]  %s50_s20, 256, %s52_s22, [#allocation7], %s3098_s26, %s3098_s26, %s2112_s27  }
   0x7   :  { %s34_s29 = sshll.u32 %s2113_s28, 4  ;;  %s2114_s5 = smov 16   ;;  %s35_s29 = int_to_ptr.vmem [resolvable:$true] %s34_s29 }
   0x8   :  { %s2115_s30 = smov 1   ;;  %s68_s18 = sshll.u32 %s3091_s9, 4  ;;  %s69_s18 = int_to_ptr.hbm [resolvable:$true] %s68_s18 }
   0x9   :  { %40 = dma.hbm_to_vmem [thread:$0]  %s33_s25, 32, %s35_s29, [#allocation4], %s2114_s5, %s2114_s5, %s2115_s30  }
   0xa   :  { %s2116_s19 = smov [#allocation8]   ;;  %s83_s24 = sshll.u32 %s3093_s11, 4  ;;  %s84_s24 = int_to_ptr.hbm [resolvable:$true] %s83_s24 }
   0xb   :  { %s70_s2 = sshll.u32 %s2116_s19, 4  ;;  %s2117_s20 = smov 64   ;;  %s71_s2 = int_to_ptr.vmem [resolvable:$true] %s70_s2 }
   0xc   :  { %s2118_s22 = smov 4   ;;  %s2119_s28 = smov [#allocation9]  }
   0xd   :  { %76 = dma.hbm_to_vmem [thread:$0]  %s69_s18, 256, %s71_s2, [#allocation7], %s2117_s20, %s2117_s20, %s2118_s22  }
   0xe   :  { %s85_s26 = sshll.u32 %s2119_s28, 4  ;;  %s3118_s25 = smov 128   ;;  %s86_s26 = int_to_ptr.vmem [resolvable:$true] %s85_s26 }
   0xf   :  { %91 = dma.hbm_to_vmem [thread:$0]  %s84_s24, 256, %s86_s26, [#allocation10], %s3118_s25, %s3118_s25, %s2112_s27  }
  0x10   :  { %2102 = dma.done.wait [#allocation4], 32  }
  0x11   :  { %2103 = vsyncadd [#allocation4], 4294967264 }
  0x12   :  { %2104 = dma.done.wait [#allocation7], 512  }
  0x13   :  { %2105 = vsyncadd [#allocation7], 4294966784 }
  0x14   :  { %2106 = dma.done.wait [#allocation10], 256  }
  0x15   :  { %2107 = vsyncadd [#allocation10], 4294967040  ;;  %v1863_v0 = vld [vmem:[%s3085_s3 + $0x8] sm:$0xff]  ;;  %v1883_v1 = vld [vmem:[%s3082_s0] sm:$0xff]   ;;  %vm319_vm0 = vcmask 261120   ;;  %v2120_v58 = vmov 0.0  }
  0x16   :  { %v1884_v2 = vunpack.c.l.bf16 %v1883_v1  ;;  %v1885_v3 = vunpack.c.h.bf16 %v1883_v1  ;;  %v2229_v4 = vld [vmem:[%s3083_s1] sm:$0xff]   ;;  %350 = vmatpush.bf16.msra.mxu0 %v1863_v0  ;;  %v1946_v11 = vld [vmem:[%s3082_s0 + $0x8] sm:$0xff]   ;;  %v1947_v20 = vld [vmem:[%s3082_s0 + $0x10] sm:$0xff]   ;;  %181 = vst [vmem:[#allocation2] sm:$0xff] %v2120_v58 }
  0x17   :  { %v1862_v5 = vld [vmem:[%s3085_s3] sm:$0xff]  ;;  %v3115_v6 = vunpack.c.l.bf16 %v2229_v4  ;;  %v3114_v7 = vunpack.c.h.bf16 %v2229_v4  ;;  %v2253_v12 = vld [vmem:[%s3083_s1 + $0x8] sm:$0xff]   ;;  %v1888_v13 = vunpack.c.l.bf16 %v1946_v11  ;;  %v1889_v14 = vunpack.c.h.bf16 %v1946_v11  ;;  %v2274_v21 = vld [vmem:[%s3083_s1 + $0x10] sm:$0xff]   ;;  %182 = vst [vmem:[#allocation2 + $0x8] sm:$0x3] %v2120_v58 }
  0x18   :  { %v3113_v15 = vunpack.c.l.bf16 %v2253_v12  ;;  %v3112_v16 = vunpack.c.h.bf16 %v2253_v12  ;;  %v1892_v22 = vunpack.c.l.bf16 %v1947_v20  ;;  %v1893_v23 = vunpack.c.h.bf16 %v1947_v20  ;;  %v1948_v29 = vld [vmem:[%s3082_s0 + $0x18] sm:$0xff]   ;;  %v1949_v38 = vld [vmem:[%s3082_s0 + $0x20] sm:$0xff]   ;;  %v1950_v47 = vld [vmem:[%s3082_s0 + $0x28] sm:$0xff]   ;;  %190 = vst [vmem:[#allocation2] sm:$0x1] %v2120_v58 }
  0x19   :  { %v2238_v8 = vmul.f32 %v3115_v6, %v1884_v2  ;;  %v2242_v9 = vmul.f32 %v3114_v7, %v1885_v3  ;;  %v3111_v24 = vunpack.c.l.bf16 %v2274_v21  ;;  %v3110_v25 = vunpack.c.h.bf16 %v2274_v21  ;;  %v2295_v30 = vld [vmem:[%s3083_s1 + $0x18] sm:$0xff]   ;;  %v2316_v39 = vld [vmem:[%s3083_s1 + $0x20] sm:$0xff]   ;;  %v2337_v48 = vld [vmem:[%s3083_s1 + $0x28] sm:$0xff]   ;;  %191 = vst [vmem:[#allocation2 + $0x10] sm:$0x1] %v2120_v58 }
  0x1a   :  { %351 = vmatpush.bf16.msra.mxu0 %v1862_v5  ;;  %v2259_v17 = vmul.f32 %v3113_v15, %v1888_v13  ;;  %v2263_v18 = vmul.f32 %v3112_v16, %v1889_v14  ;;  %v1896_v31 = vunpack.c.l.bf16 %v1948_v29  ;;  %v1897_v32 = vunpack.c.h.bf16 %v1948_v29  ;;  %v1951_v56 = vld [vmem:[%s3082_s0 + $0x30] sm:$0xff]   ;;  %210 = vst [vmem:[#allocation2 + $0x9] sm:$0x1] %v2120_v58  ;;  %v1952_v2 = vld [vmem:[%s3082_s0 + $0x38] sm:$0xff]   ;;  %v1868_v29 = vld [vmem:[%s3089_s7 + $0x20] sm:$0xff] }
  0x1b   :  { %v296_v10 = vpack.c.bf16 %v2242_v9, %v2238_v8  ;;  %v2280_v26 = vmul.f32 %v3111_v24, %v1892_v22  ;;  %v2284_v27 = vmul.f32 %v3110_v25, %v1893_v23  ;;  %v3109_v33 = vunpack.c.l.bf16 %v2295_v30  ;;  %v2358_v57 = vld [vmem:[%s3083_s1 + $0x30] sm:$0xff]   ;;  %183 = vst [vmem:[#allocation2 + $0xa0] sm:$0xff] %v2120_v58  ;;  %v2395_v3 = vld [vmem:[%s3083_s1 + $0x38] sm:$0xff]  }
  0x1c   :  { %v297_v19 = vpack.c.bf16 %v2263_v18, %v2259_v17  ;;  %v3108_v34 = vunpack.c.h.bf16 %v2295_v30  ;;  %v1900_v40 = vunpack.c.l.bf16 %v1949_v38  ;;  %v1901_v41 = vunpack.c.h.bf16 %v1949_v38  ;;  %184 = vst [vmem:[#allocation2 + $0xa8] sm:$0x3] %v2120_v58  ;;  %v1871_v14 = vld [vmem:[%s3089_s7 + $0x38] sm:$0xff]  ;;  %v1870_v23 = vld [vmem:[%s3089_s7 + $0x30] sm:$0xff] }
  0x1d   :  { %1774 = vmatmul.msk.bf16.vlgmr.msra.gmra.mxu0 %vm319_vm0, %v296_v10  ;;  %v298_v28 = vpack.c.bf16 %v2284_v27, %v2280_v26  ;;  %v2301_v35 = vmul.f32 %v3109_v33, %v1896_v31  ;;  %v3107_v42 = vunpack.c.l.bf16 %v2316_v39  ;;  %v3106_v43 = vunpack.c.h.bf16 %v2316_v39  ;;  %186 = vst [vmem:[#allocation2 + $0x90] sm:$0xff] %v2120_v58  ;;  %930 = vmatpush.bf16.msra.mxu1 %v1871_v14  ;;  %v1867_v31 = vld [vmem:[%s3089_s7 + $0x18] sm:$0xff]  ;;  %v1866_v38 = vld [vmem:[%s3089_s7 + $0x10] sm:$0xff] }
  0x1e   :  { %v2305_v36 = vmul.f32 %v3108_v34, %v1897_v32  ;;  %v1904_v49 = vunpack.c.l.bf16 %v1950_v47  ;;  %v1905_v50 = vunpack.c.h.bf16 %v1950_v47  ;;  %v3105_v51 = vunpack.c.l.bf16 %v2337_v48  ;;  %187 = vst [vmem:[#allocation2 + $0x98] sm:$0x3] %v2120_v58  ;;  %v235_v32 = vld [vmem:[#allocation6] sm:$0xff] }
  0x1f   :  { %v2322_v44 = vmul.f32 %v3107_v42, %v1900_v40  ;;  %v2326_v45 = vmul.f32 %v3106_v43, %v1901_v41  ;;  %v3104_v52 = vunpack.c.h.bf16 %v2337_v48  ;;  %v1908_v59 = vunpack.c.l.bf16 %v1951_v56  ;;  %188 = vst [vmem:[#allocation2 + $0x130] sm:$0xff] %v2120_v58  ;;  %v2506_v43 = vld [vmem:[#allocation6 + $0x8] ss:$0 sm:$0xff] }
  0x20   :  { %v299_v37 = vpack.c.bf16 %v2305_v36, %v2301_v35  ;;  %v2343_v53 = vmul.f32 %v3105_v51, %v1904_v49  ;;  %v1909_v60 = vunpack.c.h.bf16 %v1951_v56  ;;  %v3103_v61 = vunpack.c.l.bf16 %v2358_v57  ;;  %189 = vst [vmem:[#allocation2 + $0x138] sm:$0x3] %v2120_v58  ;;  %v443_v49 = vld [vmem:[#allocation2] sm:$0xff] }
  0x21   :  { %v300_v46 = vpack.c.bf16 %v2326_v45, %v2322_v44  ;;  %v2347_v54 = vmul.f32 %v3104_v52, %v1905_v50  ;;  %v3102_v62 = vunpack.c.h.bf16 %v2358_v57  ;;  %192 = vst [vmem:[#allocation2 + $0x20] sm:$0x1] %v2120_v58  ;;  %v1912_v5 = vunpack.c.l.bf16 %v1952_v2  ;;  %931 = vmatpush.bf16.msra.mxu1 %v1870_v23 }
  0x22   :  { %v2371_v63 = vmul.f32 %v3103_v61, %v1908_v59  ;;  %193 = vst [vmem:[#allocation2 + $0x30] sm:$0x1] %v2120_v58  ;;  %v1913_v10 = vunpack.c.h.bf16 %v1952_v2  ;;  %v3101_v11 = vunpack.c.l.bf16 %v2395_v3  ;;  %v3100_v13 = vunpack.c.h.bf16 %v2395_v3  ;;  %v1864_v2 = vld [vmem:[%s3089_s7] sm:$0xff] }
  0x23   :  { %v301_v55 = vpack.c.bf16 %v2347_v54, %v2343_v53  ;;  %v2375_v0 = vmul.f32 %v3102_v62, %v1909_v60  ;;  %194 = vst [vmem:[#allocation2 + $0x40] sm:$0x1] %v2120_v58  ;;  %v2461_v41 = vperm.slane %v235_v32, 0  ;;  %v2465_v47 = vperm.slane %v235_v32, 4  ;;  %v492_v60 = vld [vmem:[#allocation2 + $0x1] sm:$0xff] }
  0x24   :  { %195 = vst [vmem:[#allocation2 + $0x50] sm:$0x1] %v2120_v58  ;;  %v2415_v20 = vmul.f32 %v3100_v13, %v1913_v10  ;;  %v2481_v10 = vperm.slane %v235_v32, 2  ;;  %v2490_v13 = vperm.slane %v235_v32, 5 }
  0x25   :  { %v302_v1 = vpack.c.bf16 %v2375_v0, %v2371_v63  ;;  %196 = vst [vmem:[#allocation2 + $0x60] sm:$0x1] %v2120_v58  ;;  %v460_v56 = vmul.f32 %v2461_v41, %v443_v49 }
  0x26   :  { %3119 = vst [vmem:[#allocation16_spill] sm:$0xff] %v2395_v3 }
  0x27   :  { %197 = vst [vmem:[#allocation2 + $0x70] sm:$0x1] %v2120_v58 }
  0x28   :  { %198 = vst [vmem:[#allocation2 + $0x80] sm:$0x1] %v2120_v58 }
  0x29   :  { %201 = vst [vmem:[#allocation2 + $0xb0] sm:$0x1] %v2120_v58 }
  0x2a   :  { %202 = vst [vmem:[#allocation2 + $0xc0] sm:$0x1] %v2120_v58 }
  0x2b   :  { %203 = vst [vmem:[#allocation2 + $0xd0] sm:$0x1] %v2120_v58 }
  0x2c   :  { %204 = vst [vmem:[#allocation2 + $0xe0] sm:$0x1] %v2120_v58 }
  0x2d   :  { %1775 = vmatmul.msk.bf16.gmra.mxu0 %vm319_vm0, %v297_v19  ;;  %205 = vst [vmem:[#allocation2 + $0xf0] sm:$0x1] %v2120_v58  ;;  %v2411_v19 = vmul.f32 %v3101_v11, %v1912_v5 }
  0x2e   :  { %206 = vst [vmem:[#allocation2 + $0x100] sm:$0x1] %v2120_v58 }
  0x2f   :  { %207 = vst [vmem:[#allocation2 + $0x110] sm:$0x1] %v2120_v58  ;;  %v303_v22 = vpack.c.bf16 %v2415_v20, %v2411_v19 }
  0x30   :  { %208 = vst [vmem:[#allocation2 + $0x120] sm:$0x1] %v2120_v58 }
  0x31   :  { %211 = vst [vmem:[#allocation2 + $0x19] sm:$0x1] %v2120_v58 }
  0x32   :  { %212 = vst [vmem:[#allocation2 + $0x29] sm:$0x1] %v2120_v58 }
  0x33   :  { %213 = vst [vmem:[#allocation2 + $0x39] sm:$0x1] %v2120_v58 }
  0x34   :  { %214 = vst [vmem:[#allocation2 + $0x49] sm:$0x1] %v2120_v58 }
  0x35   :  { %215 = vst [vmem:[#allocation2 + $0x59] sm:$0x1] %v2120_v58 }
  0x36   :  { %216 = vst [vmem:[#allocation2 + $0x69] sm:$0x1] %v2120_v58 }
  0x37   :  { %217 = vst [vmem:[#allocation2 + $0x79] sm:$0x1] %v2120_v58 }
  0x38   :  { %218 = vst [vmem:[#allocation2 + $0x89] sm:$0x1] %v2120_v58 }
  0x39   :  { %221 = vst [vmem:[#allocation2 + $0xb9] sm:$0x1] %v2120_v58 }
  0x3a   :  { %222 = vst [vmem:[#allocation2 + $0xc9] sm:$0x1] %v2120_v58 }
  0x3b   :  { %223 = vst [vmem:[#allocation2 + $0xd9] sm:$0x1] %v2120_v58 }
  0x3c   :  { %224 = vst [vmem:[#allocation2 + $0xe9] sm:$0x1] %v2120_v58 }
  0x3d   :  { %1776 = vmatmul.msk.bf16.gmra.mxu0 %vm319_vm0, %v298_v28  ;;  %v1869_v28 = vld [vmem:[%s3089_s7 + $0x28] sm:$0xff]  ;;  %225 = vst [vmem:[#allocation2 + $0xf9] sm:$0x1] %v2120_v58 }
  0x3e   :  { %932 = vmatpush.bf16.msra.mxu1 %v1869_v28  ;;  %226 = vst [vmem:[#allocation2 + $0x109] sm:$0x1] %v2120_v58  ;;  %v2484_v28 = vperm.slane %v235_v32, 3 }
  0x3f   :  { %227 = vst [vmem:[#allocation2 + $0x119] sm:$0x1] %v2120_v58 }
  0x40   :  { %228 = vst [vmem:[#allocation2 + $0x129] sm:$0x1] %v2120_v58 }
  0x41   :  { %199 = vst [vmem:[#allocation2 + $0x90] sm:$0x1] %v2120_v58 }
  0x42   :  { %933 = vmatpush.bf16.msra.mxu1 %v1868_v29  ;;  %200 = vst [vmem:[#allocation2 + $0xa0] sm:$0x1] %v2120_v58 }
  0x43   :  { %209 = vst [vmem:[#allocation2 + $0x130] sm:$0x1] %v2120_v58 }
  0x44   :  { %219 = vst [vmem:[#allocation2 + $0x99] sm:$0x1] %v2120_v58 }
  0x45   :  { %220 = vst [vmem:[#allocation2 + $0xa9] sm:$0x1] %v2120_v58 }
  0x46   :  { %934 = vmatpush.bf16.msra.mxu1 %v1867_v31  ;;  %229 = vst [vmem:[#allocation2 + $0x139] sm:$0x1] %v2120_v58 }
  0x4a   :  { %935 = vmatpush.bf16.msra.mxu1 %v1866_v38 }
  0x4d   :  { %1777 = vmatmul.msk.bf16.gmra.mxu0 %vm319_vm0, %v299_v37  ;;  %v2453_v37 = vld [vmem:[%s3086_s4] ss:$0 sm:$0xff] }
  0x5d   :  { %1778 = vmatmul.msk.bf16.gmra.mxu0 %vm319_vm0, %v300_v46 }
  0x6d   :  { %1779 = vmatmul.msk.bf16.gmra.mxu0 %vm319_vm0, %v301_v55  ;;  %v1865_v55 = vld [vmem:[%s3089_s7 + $0x8] sm:$0xff] }
  0x6e   :  { %936 = vmatpush.bf16.msra.mxu1 %v1865_v55 }
  0x72   :  { %937 = vmatpush.bf16.msra.mxu1 %v1864_v2 }
  0x7d   :  { %1780 = vmatmul.msk.bf16.gmra.mxu0 %vm319_vm0, %v302_v1  ;;  %v2475_v1 = vperm.slane %v235_v32, 1 }
  0x7f   :  { %v509_v58 = vmul.f32 %v2475_v1, %v492_v60 }
  0x8d   :  { %1781 = vmatmul.msk.bf16.gmra.mxu0 %vm319_vm0, %v303_v22  ;;  %v541_v22 = vld [vmem:[#allocation2 + $0x2] sm:$0xff] }
  0x8e   :  { %v558_v38 = vmul.f32 %v2481_v10, %v541_v22 }
  0x9a   :  { %v353_v40 = vpop.f32.mrf.mxu0 }
  0x9b   :  { %v354_v46 = vadd.f32 %v2453_v37, %v353_v40 }
  0x9d   :  { %v393_v50 = vmax.f32 %v354_v46, 0.0 }
  0x9f   :  { %410 = vst [vmem:[#allocation2 + $0x11] sm:$0xff] %v393_v50  ;;  %v427_v59 = vmul.f32 %v2465_v47, %v393_v50 }
  0xa1   :  { %v476_v5 = vadd.f32 %v460_v56, %v427_v59 }
  0xa2   :  { %v355_v14 = vpop.f32.mrf.mxu0 }
  0xa3   :  { %v356_v23 = vadd.f32 %v2453_v37, %v355_v14  ;;  %v525_v31 = vadd.f32 %v509_v58, %v476_v5  ;;  %v510_v5 = vmul.f32 %v2475_v1, %v393_v50  ;;  %v2494_v58 = vperm.slane %v235_v32, 6 }
  0xa5   :  { %v394_v29 = vmax.f32 %v356_v23, 0.0  ;;  %v574_v56 = vadd.f32 %v558_v38, %v525_v31 }
  0xa6   :  { %v590_v40 = vld [vmem:[#allocation2 + $0x10] sm:$0xff] }
  0xa7   :  { %411 = vst [vmem:[#allocation2 + $0x21] sm:$0xff] %v394_v29  ;;  %v428_v46 = vmul.f32 %v2465_v47, %v394_v29  ;;  %v461_v49 = vmul.f32 %v590_v40, %v2461_v41  ;;  %v607_v55 = vmul.f32 %v2484_v28, %v590_v40  ;;  %v542_v2 = vld [vmem:[#allocation2 + $0x12] sm:$0xff]  ;;  %v2499_v40 = vperm.slane %v235_v32, 7 }
  0xa8   :  { %v656_v61 = vmul.f32 %v2490_v13, %v542_v2  ;;  %v511_v42 = vmul.f32 %v2475_v1, %v394_v29 }
  0xa9   :  { %v477_v59 = vadd.f32 %v461_v49, %v428_v46  ;;  %v623_v23 = vadd.f32 %v607_v55, %v574_v56  ;;  %v559_v46 = vmul.f32 %v2481_v10, %v542_v2  ;;  %v755_v51 = vmul.f32 %v2499_v40, %v394_v29 }
  0xaa   :  { %v358_v60 = vpop.f32.mrf.mxu0 }
  0xab   :  { %v359_v14 = vadd.f32 %v2453_v37, %v358_v60  ;;  %v526_v11 = vadd.f32 %v510_v5, %v477_v59  ;;  %v672_v55 = vadd.f32 %v656_v61, %v623_v23 }
  0xad   :  { %v395_v22 = vmax.f32 %v359_v14, 0.0  ;;  %v575_v56 = vadd.f32 %v559_v46, %v526_v11 }
  0xae   :  { %v591_v62 = vld [vmem:[#allocation2 + $0x20] sm:$0xff] }
  0xaf   :  { %412 = vst [vmem:[#allocation2 + $0x31] sm:$0xff] %v395_v22  ;;  %v429_v31 = vmul.f32 %v2465_v47, %v395_v22  ;;  %v462_v38 = vmul.f32 %v591_v62, %v2461_v41  ;;  %v608_v49 = vmul.f32 %v2484_v28, %v591_v62  ;;  %v706_v50 = vmul.f32 %v2494_v58, %v591_v62  ;;  %v543_v5 = vld [vmem:[#allocation2 + $0x22] sm:$0xff] }
  0xb0   :  { %v657_v62 = vmul.f32 %v2490_v13, %v543_v5 }
  0xb1   :  { %v478_v60 = vadd.f32 %v462_v38, %v429_v31  ;;  %v722_v14 = vadd.f32 %v706_v50, %v672_v55  ;;  %v624_v32 = vadd.f32 %v608_v49, %v575_v56  ;;  %v804_v31 = vmul.f32 %v2506_v43, %v543_v5 }
  0xb2   :  { %v360_v59 = vpop.f32.mrf.mxu0  ;;  %v560_v38 = vmul.f32 %v2481_v10, %v543_v5 }
  0xb3   :  { %v361_v52 = vadd.f32 %v2453_v37, %v360_v59  ;;  %v771_v34 = vadd.f32 %v755_v51, %v722_v14  ;;  %v527_v33 = vadd.f32 %v511_v42, %v478_v60  ;;  %v673_v49 = vadd.f32 %v657_v62, %v624_v32  ;;  %v2519_v42 = vld [vmem:[%s3088_s6] ss:$0 sm:$0xff]  ;;  %s1751_s6 = sshll.u32 %s3097_s15, 4  ;;  %s1752_s6 = int_to_ptr.hbm [resolvable:$true] %s1751_s6 }
  0xb4   :  { %v756_v59 = vmul.f32 %v2499_v40, %v395_v22  ;;  %v512_v32 = vmul.f32 %v2475_v1, %v395_v22 }
  0xb5   :  { %v396_v2 = vmax.f32 %v361_v52, 0.0  ;;  %v820_v51 = vadd.f32 %v804_v31, %v771_v34  ;;  %v576_v55 = vadd.f32 %v560_v38, %v527_v33 }
  0xb6   :  { %v592_v61 = vld [vmem:[#allocation2 + $0x30] sm:$0xff] }
  0xb7   :  { %413 = vst [vmem:[#allocation2 + $0x41] sm:$0xff] %v396_v2  ;;  %v430_v11 = vmul.f32 %v2465_v47, %v396_v2  ;;  %v463_v23 = vmul.f32 %v592_v61, %v2461_v41  ;;  %v609_v46 = vmul.f32 %v2484_v28, %v592_v61  ;;  %v707_v29 = vmul.f32 %v2494_v58, %v592_v61  ;;  %v544_v52 = vld [vmem:[#allocation2 + $0x32] sm:$0xff] }
  0xb8   :  { %v805_v61 = vmul.f32 %v2506_v43, %v544_v52  ;;  %v839_v31 = vadd.f32 %v2519_v42, %v820_v51  ;;  %v658_v33 = vmul.f32 %v2490_v13, %v544_v52 }
  0xb9   :  { %v479_v50 = vadd.f32 %v463_v23, %v430_v11  ;;  %v723_v60 = vadd.f32 %v707_v29, %v673_v49  ;;  %v625_v5 = vadd.f32 %v609_v46, %v576_v55  ;;  %v561_v11 = vmul.f32 %v2481_v10, %v544_v52 }
  0xba   :  { %v363_v56 = vpop.f32.mrf.mxu0  ;;  %v855_v51 = vmax.f32 %v839_v31, 0.0 }
  0xbb   :  { %v364_v14 = vadd.f32 %v2453_v37, %v363_v56  ;;  %v772_v62 = vadd.f32 %v756_v59, %v723_v60  ;;  %v528_v25 = vadd.f32 %v512_v32, %v479_v50  ;;  %v674_v49 = vadd.f32 %v658_v33, %v625_v5 }
  0xbc   :  { %v757_v32 = vmul.f32 %v2499_v40, %v396_v2 }
  0xbd   :  { %v397_v34 = vmax.f32 %v364_v14, 0.0  ;;  %v821_v16 = vadd.f32 %v805_v61, %v772_v62  ;;  %v577_v55 = vadd.f32 %v561_v11, %v528_v25  ;;  %v513_v61 = vmul.f32 %v2475_v1, %v396_v2 }
  0xbe   :  { %v593_v24 = vld [vmem:[#allocation2 + $0x40] sm:$0xff] }
  0xbf   :  { %414 = vst [vmem:[#allocation2 + $0x51] sm:$0xff] %v397_v34  ;;  %v431_v23 = vmul.f32 %v2465_v47, %v397_v34  ;;  %v464_v38 = vmul.f32 %v593_v24, %v2461_v41  ;;  %v610_v22 = vmul.f32 %v2484_v28, %v593_v24  ;;  %v840_v46 = vadd.f32 %v2519_v42, %v821_v16  ;;  %v545_v14 = vld [vmem:[#allocation2 + $0x42] sm:$0xff] }
  0xc0   :  { %v708_v29 = vmul.f32 %v2494_v58, %v593_v24  ;;  %v659_v24 = vmul.f32 %v2490_v13, %v545_v14  ;;  %v806_v11 = vmul.f32 %v2506_v43, %v545_v14 }
  0xc1   :  { %v480_v50 = vadd.f32 %v464_v38, %v431_v23  ;;  %v856_v60 = vmax.f32 %v840_v46, 0.0  ;;  %v626_v62 = vadd.f32 %v610_v22, %v577_v55  ;;  %v562_v23 = vmul.f32 %v2481_v10, %v545_v14 }
  0xc2   :  { %v365_v56 = vpop.f32.mrf.mxu0  ;;  %v724_v59 = vadd.f32 %v708_v29, %v674_v49 }
  0xc3   :  { %v366_v52 = vadd.f32 %v2453_v37, %v365_v56  ;;  %v871_v15 = vpack.c.bf16 %v856_v60, %v855_v51  ;;  %v529_v5 = vadd.f32 %v513_v61, %v480_v50  ;;  %v675_v2 = vadd.f32 %v659_v24, %v626_v62 }
  0xc4   :  { %v773_v16 = vadd.f32 %v757_v32, %v724_v59  ;;  %v758_v50 = vmul.f32 %v2499_v40, %v397_v34  ;;  %v514_v59 = vmul.f32 %v2475_v1, %v397_v34 }
  0xc5   :  { %v398_v7 = vmax.f32 %v366_v52, 0.0  ;;  %938 = vmatmul.bf16.vlgmr.msra.gmra.mxu1 %v871_v15  ;;  %v578_v29 = vadd.f32 %v562_v23, %v529_v5 }
  0xc6   :  { %v594_v33 = vld [vmem:[#allocation2 + $0x50] sm:$0xff]  ;;  %v822_v49 = vadd.f32 %v806_v11, %v773_v16 }
  0xc7   :  { %415 = vst [vmem:[#allocation2 + $0x61] sm:$0xff] %v398_v7  ;;  %v432_v25 = vmul.f32 %v2465_v47, %v398_v7  ;;  %v465_v31 = vmul.f32 %v594_v33, %v2461_v41  ;;  %v611_v38 = vmul.f32 %v2484_v28, %v594_v33  ;;  %v709_v22 = vmul.f32 %v2494_v58, %v594_v33  ;;  %v546_v46 = vld [vmem:[#allocation2 + $0x52] sm:$0xff] }
  0xc8   :  { %v807_v14 = vmul.f32 %v2506_v43, %v546_v46  ;;  %v841_v62 = vadd.f32 %v2519_v42, %v822_v49  ;;  %v660_v5 = vmul.f32 %v2490_v13, %v546_v46  ;;  %v563_v24 = vmul.f32 %v2481_v10, %v546_v46 }
  0xc9   :  { %v481_v15 = vadd.f32 %v465_v31, %v432_v25  ;;  %v725_v55 = vadd.f32 %v709_v22, %v675_v2  ;;  %v627_v60 = vadd.f32 %v611_v38, %v578_v29 }
  0xca   :  { %v368_v51 = vpop.f32.mrf.mxu0  ;;  %v857_v2 = vmax.f32 %v841_v62, 0.0 }
  0xcb   :  { %v369_v56 = vadd.f32 %v2453_v37, %v368_v51  ;;  %v774_v52 = vadd.f32 %v758_v50, %v725_v55  ;;  %v530_v61 = vadd.f32 %v514_v59, %v481_v15  ;;  %v676_v23 = vadd.f32 %v660_v5, %v627_v60 }
  0xcd   :  { %v399_v32 = vmax.f32 %v369_v56, 0.0  ;;  %v823_v16 = vadd.f32 %v807_v14, %v774_v52  ;;  %v579_v22 = vadd.f32 %v563_v24, %v530_v61  ;;  %v515_v56 = vmul.f32 %v2475_v1, %v398_v7 }
  0xce   :  { %v595_v33 = vld [vmem:[#allocation2 + $0x60] sm:$0xff]  ;;  %v759_v52 = vmul.f32 %v2499_v40, %v398_v7 }
  0xcf   :  { %416 = vst [vmem:[#allocation2 + $0x71] sm:$0xff] %v399_v32  ;;  %v433_v25 = vmul.f32 %v2465_v47, %v399_v32  ;;  %v466_v31 = vmul.f32 %v595_v33, %v2461_v41  ;;  %v612_v34 = vmul.f32 %v2484_v28, %v595_v33  ;;  %v842_v11 = vadd.f32 %v2519_v42, %v823_v16  ;;  %v547_v55 = vld [vmem:[#allocation2 + $0x62] sm:$0xff] }
  0xd0   :  { %v710_v38 = vmul.f32 %v2494_v58, %v595_v33  ;;  %v661_v62 = vmul.f32 %v2490_v13, %v547_v55  ;;  %v564_v33 = vmul.f32 %v2481_v10, %v547_v55  ;;  %v808_v7 = vmul.f32 %v2506_v43, %v547_v55 }
  0xd1   :  { %v482_v49 = vadd.f32 %v466_v31, %v433_v25  ;;  %v858_v15 = vmax.f32 %v842_v11, 0.0  ;;  %v628_v50 = vadd.f32 %v612_v34, %v579_v22 }
  0xd2   :  { %v370_v29 = vpop.f32.mrf.mxu0  ;;  %v726_v51 = vadd.f32 %v710_v38, %v676_v23  ;;  %v516_v23 = vmul.f32 %v2475_v1, %v399_v32 }
  0xd3   :  { %v371_v46 = vadd.f32 %v2453_v37, %v370_v29  ;;  %v872_v59 = vpack.c.bf16 %v858_v15, %v857_v2  ;;  %v531_v16 = vadd.f32 %v515_v56, %v482_v49  ;;  %v677_v31 = vadd.f32 %v661_v62, %v628_v50  ;;  %v451_v56 = vld [vmem:[#allocation2 + $0xa0] sm:$0xff] }
  0xd4   :  { %v775_v61 = vadd.f32 %v759_v52, %v726_v51  ;;  %v760_v29 = vmul.f32 %v2499_v40, %v399_v32  ;;  %v500_v62 = vld [vmem:[#allocation2 + $0xa1] sm:$0xff] }
  0xd5   :  { %v400_v14 = vmax.f32 %v371_v46, 0.0  ;;  %943 = vmatmul.bf16.gmra.mxu1 %v872_v59  ;;  %v580_v2 = vadd.f32 %v564_v33, %v531_v16  ;;  %v468_v16 = vmul.f32 %v2461_v41, %v451_v56 }
  0xd6   :  { %v596_v60 = vld [vmem:[#allocation2 + $0x70] sm:$0xff]  ;;  %v824_v15 = vadd.f32 %v808_v7, %v775_v61 }
  0xd7   :  { %417 = vst [vmem:[#allocation2 + $0x81] sm:$0xff] %v400_v14  ;;  %v434_v5 = vmul.f32 %v2465_v47, %v400_v14  ;;  %v467_v24 = vmul.f32 %v596_v60, %v2461_v41  ;;  %v613_v25 = vmul.f32 %v2484_v28, %v596_v60  ;;  %v711_v34 = vmul.f32 %v2494_v58, %v596_v60  ;;  %v548_v38 = vld [vmem:[#allocation2 + $0x72] sm:$0xff] }
  0xd8   :  { %v809_v52 = vmul.f32 %v2506_v43, %v548_v38  ;;  %v565_v55 = vmul.f32 %v2481_v10, %v548_v38  ;;  %v662_v61 = vmul.f32 %v2490_v13, %v548_v38  ;;  %v745_v38 = vld [vmem:[#allocation2 + $0x91] sm:$0xff] }
  0xd9   :  { %v483_v11 = vadd.f32 %v467_v24, %v434_v5  ;;  %v727_v49 = vadd.f32 %v711_v34, %v677_v31  ;;  %v629_v59 = vadd.f32 %v613_v25, %v580_v2  ;;  %v843_v24 = vadd.f32 %v2519_v42, %v824_v15  ;;  %v696_v31 = vld [vmem:[#allocation2 + $0x90] sm:$0xff] }
  0xda   :  { %v373_v22 = vpop.f32.mrf.mxu0  ;;  %v713_v15 = vmul.f32 %v2494_v58, %v696_v31 }
  0xdb   :  { %v532_v51 = vadd.f32 %v516_v23, %v483_v11  ;;  %v374_v46 = vadd.f32 %v2453_v37, %v373_v22  ;;  %v776_v50 = vadd.f32 %v760_v29, %v727_v49  ;;  %v678_v23 = vadd.f32 %v662_v61, %v629_v59  ;;  %v794_v59 = vld [vmem:[#allocation2 + $0x92] sm:$0xff] }
  0xdc   :  { %v517_v49 = vmul.f32 %v2475_v1, %v500_v62  ;;  %v859_v56 = vmax.f32 %v843_v24, 0.0  ;;  %v762_v62 = vmul.f32 %v2499_v40, %v745_v38 }
  0xdd   :  { %v401_v60 = vmax.f32 %v374_v46, 0.0  ;;  %v825_v33 = vadd.f32 %v809_v52, %v776_v50  ;;  %v581_v34 = vadd.f32 %v565_v55, %v532_v51  ;;  %v549_v55 = vld [vmem:[#allocation2 + $0xa2] sm:$0xff] }
  0xde   :  { %v597_v5 = vld [vmem:[#allocation2 + $0x80] sm:$0xff]  ;;  %v566_v31 = vmul.f32 %v2481_v10, %v549_v55 }
  0xdf   :  { %v646_v32 = vld [vmem:[#allocation2 + $0x82] sm:$0xff]  ;;  %v614_v25 = vmul.f32 %v2484_v28, %v597_v5  ;;  %418 = vst [vmem:[#allocation2 + $0xb1] sm:$0xff] %v401_v60  ;;  %v435_v7 = vmul.f32 %v2465_v47, %v401_v60  ;;  %v844_v11 = vadd.f32 %v2519_v42, %v825_v33  ;;  %v712_v2 = vmul.f32 %v2494_v58, %v597_v5 }
  0xe0   :  { %v663_v29 = vmul.f32 %v2490_v13, %v646_v32  ;;  %v761_v5 = vmul.f32 %v2499_v40, %v400_v14 }
  0xe1   :  { %v630_v22 = vadd.f32 %v614_v25, %v581_v34  ;;  %v484_v46 = vadd.f32 %v468_v16, %v435_v7  ;;  %v860_v50 = vmax.f32 %v844_v11, 0.0  ;;  %v728_v52 = vadd.f32 %v712_v2, %v678_v23 }
  0xe2   :  { %v375_v51 = vpop.f32.mrf.mxu0  ;;  %v811_v7 = vmul.f32 %v2506_v43, %v794_v59 }
  0xe3   :  { %v376_v6 = vadd.f32 %v2453_v37, %v375_v51  ;;  %v679_v33 = vadd.f32 %v663_v29, %v630_v22  ;;  %v873_v61 = vpack.c.bf16 %v860_v50, %v859_v56  ;;  %v533_v3 = vadd.f32 %v517_v49, %v484_v46 }
  0xe4   :  { %v777_v24 = vadd.f32 %v761_v5, %v728_v52  ;;  %v810_v22 = vmul.f32 %v2506_v43, %v646_v32  ;;  %v518_v50 = vmul.f32 %v2475_v1, %v401_v60 }
  0xe5   :  { %v402_v34 = vmax.f32 %v376_v6, 0.0  ;;  %v729_v25 = vadd.f32 %v713_v15, %v679_v33  ;;  %948 = vmatmul.bf16.gmra.mxu1 %v873_v61  ;;  %v582_v6 = vadd.f32 %v566_v31, %v533_v3 }
  0xe6   :  { %v598_v16 = vld [vmem:[#allocation2 + $0xb0] sm:$0xff]  ;;  %v826_v15 = vadd.f32 %v810_v22, %v777_v24 }
  0xe7   :  { %419 = vst [vmem:[#allocation2 + $0xc1] sm:$0xff] %v402_v34  ;;  %v436_v11 = vmul.f32 %v2465_v47, %v402_v34  ;;  %v469_v23 = vmul.f32 %v598_v16, %v2461_v41  ;;  %v615_v2 = vmul.f32 %v2484_v28, %v598_v16  ;;  %v778_v14 = vadd.f32 %v762_v62, %v729_v25  ;;  %v550_v46 = vld [vmem:[#allocation2 + $0xb2] sm:$0xff] }
  0xe8   :  { %v845_v61 = vadd.f32 %v2519_v42, %v826_v15  ;;  %v664_v32 = vmul.f32 %v2490_v13, %v550_v46  ;;  %v567_v3 = vmul.f32 %v2481_v10, %v550_v46 }
  0xe9   :  { %v485_v29 = vadd.f32 %v469_v23, %v436_v11  ;;  %v827_v38 = vadd.f32 %v811_v7, %v778_v14  ;;  %v631_v56 = vadd.f32 %v615_v2, %v582_v6  ;;  %v763_v6 = vmul.f32 %v2499_v40, %v402_v34 }
  0xea   :  { %v378_v49 = vpop.f32.mrf.mxu0  ;;  %v861_v23 = vmax.f32 %v845_v61, 0.0 }
  0xeb   :  { %v379_v51 = vadd.f32 %v2453_v37, %v378_v49  ;;  %v846_v52 = vadd.f32 %v2519_v42, %v827_v38  ;;  %v534_v33 = vadd.f32 %v518_v50, %v485_v29  ;;  %v680_v60 = vadd.f32 %v664_v32, %v631_v56 }
  0xec   :  { %v519_v49 = vmul.f32 %v2475_v1, %v402_v34 }
  0xed   :  { %v403_v55 = vmax.f32 %v379_v51, 0.0  ;;  %v862_v31 = vmax.f32 %v846_v52, 0.0  ;;  %v583_v24 = vadd.f32 %v567_v3, %v534_v33 }
  0xee   :  { %v599_v59 = vld [vmem:[#allocation2 + $0xc0] sm:$0xff] }
  0xef   :  { %420 = vst [vmem:[#allocation2 + $0xd1] sm:$0xff] %v403_v55  ;;  %v437_v5 = vmul.f32 %v2465_v47, %v403_v55  ;;  %v470_v62 = vmul.f32 %v599_v59, %v2461_v41  ;;  %v616_v25 = vmul.f32 %v2484_v28, %v599_v59  ;;  %v714_v16 = vmul.f32 %v2494_v58, %v599_v59  ;;  %v551_v14 = vld [vmem:[#allocation2 + $0xc2] sm:$0xff] }
  0xf0   :  { %v874_v15 = vpack.c.bf16 %v862_v31, %v861_v23  ;;  %v665_v50 = vmul.f32 %v2490_v13, %v551_v14  ;;  %v812_v59 = vmul.f32 %v2506_v43, %v551_v14  ;;  %v568_v61 = vmul.f32 %v2481_v10, %v551_v14 }
  0xf1   :  { %v486_v7 = vadd.f32 %v470_v62, %v437_v5  ;;  %v730_v2 = vadd.f32 %v714_v16, %v680_v60  ;;  %v632_v29 = vadd.f32 %v616_v25, %v583_v24  ;;  %v764_v24 = vmul.f32 %v2499_v40, %v403_v55 }
  0xf2   :  { %v380_v11 = vpop.f32.mrf.mxu0  ;;  %v520_v23 = vmul.f32 %v2475_v1, %v403_v55 }
  0xf3   :  { %v381_v22 = vadd.f32 %v2453_v37, %v380_v11  ;;  %v779_v46 = vadd.f32 %v763_v6, %v730_v2  ;;  %v535_v51 = vadd.f32 %v519_v49, %v486_v7  ;;  %v681_v34 = vadd.f32 %v665_v50, %v632_v29 }
  0xf5   :  { %v404_v38 = vmax.f32 %v381_v22, 0.0  ;;  %953 = vmatmul.bf16.gmra.mxu1 %v874_v15  ;;  %v828_v62 = vadd.f32 %v812_v59, %v779_v46  ;;  %v584_v25 = vadd.f32 %v568_v61, %v535_v51 }
  0xf6   :  { %v600_v56 = vld [vmem:[#allocation2 + $0xd0] sm:$0xff] }
  0xf7   :  { %421 = vst [vmem:[#allocation2 + $0xe1] sm:$0xff] %v404_v38  ;;  %v438_v52 = vmul.f32 %v2465_v47, %v404_v38  ;;  %v471_v33 = vmul.f32 %v600_v56, %v2461_v41  ;;  %v617_v32 = vmul.f32 %v2484_v28, %v600_v56  ;;  %v715_v3 = vmul.f32 %v2494_v58, %v600_v56  ;;  %v552_v5 = vld [vmem:[#allocation2 + $0xd2] sm:$0xff] }
  0xf8   :  { %v813_v14 = vmul.f32 %v2506_v43, %v552_v5  ;;  %v847_v6 = vadd.f32 %v2519_v42, %v828_v62  ;;  %v666_v46 = vmul.f32 %v2490_v13, %v552_v5  ;;  %v569_v51 = vmul.f32 %v2481_v10, %v552_v5 }
  0xf9   :  { %v487_v31 = vadd.f32 %v471_v33, %v438_v52  ;;  %v731_v16 = vadd.f32 %v715_v3, %v681_v34  ;;  %v633_v11 = vadd.f32 %v617_v32, %v584_v25 }
  0xfa   :  { %v383_v60 = vpop.f32.mrf.mxu0  ;;  %v863_v61 = vmax.f32 %v847_v6, 0.0 }
  0xfb   :  { %v384_v7 = vadd.f32 %v2453_v37, %v383_v60  ;;  %v780_v2 = vadd.f32 %v764_v24, %v731_v16  ;;  %v536_v29 = vadd.f32 %v520_v23, %v487_v31  ;;  %v682_v33 = vadd.f32 %v666_v46, %v633_v11 }
  0xfc   :  { %v765_v60 = vmul.f32 %v2499_v40, %v404_v38  ;;  %v521_v24 = vmul.f32 %v2475_v1, %v404_v38 }
  0xfd   :  { %v405_v22 = vmax.f32 %v384_v7, 0.0  ;;  %v829_v15 = vadd.f32 %v813_v14, %v780_v2  ;;  %v585_v32 = vadd.f32 %v569_v51, %v536_v29 }
  0xfe   :  { %v601_v49 = vld [vmem:[#allocation2 + $0xe0] sm:$0xff] }
  0xff   :  { %422 = vst [vmem:[#allocation2 + $0xf1] sm:$0xff] %v405_v22  ;;  %v439_v56 = vmul.f32 %v2465_v47, %v405_v22  ;;  %v472_v50 = vmul.f32 %v601_v49, %v2461_v41  ;;  %v618_v55 = vmul.f32 %v2484_v28, %v601_v49  ;;  %v848_v52 = vadd.f32 %v2519_v42, %v829_v15  ;;  %v553_v31 = vld [vmem:[#allocation2 + $0xe2] sm:$0xff] }
 0x100   :  { %v716_v59 = vmul.f32 %v2494_v58, %v601_v49  ;;  %v667_v6 = vmul.f32 %v2490_v13, %v553_v31  ;;  %v814_v15 = vmul.f32 %v2506_v43, %v553_v31  ;;  %v570_v46 = vmul.f32 %v2481_v10, %v553_v31 }
 0x101   :  { %v488_v34 = vadd.f32 %v472_v50, %v439_v56  ;;  %v864_v62 = vmax.f32 %v848_v52, 0.0  ;;  %v634_v16 = vadd.f32 %v618_v55, %v585_v32  ;;  %v766_v32 = vmul.f32 %v2499_v40, %v405_v22 }
 0x102   :  { %v385_v3 = vpop.f32.mrf.mxu0  ;;  %v732_v25 = vadd.f32 %v716_v59, %v682_v33 }
 0x103   :  { %v386_v5 = vadd.f32 %v2453_v37, %v385_v3  ;;  %v875_v7 = vpack.c.bf16 %v864_v62, %v863_v61  ;;  %v537_v11 = vadd.f32 %v521_v24, %v488_v34  ;;  %v683_v38 = vadd.f32 %v667_v6, %v634_v16 }
 0x104   :  { %v781_v2 = vadd.f32 %v765_v60, %v732_v25  ;;  %v522_v62 = vmul.f32 %v2475_v1, %v405_v22 }
 0x105   :  { %v406_v23 = vmax.f32 %v386_v5, 0.0  ;;  %958 = vmatmul.bf16.gmra.mxu1 %v875_v7  ;;  %v586_v52 = vadd.f32 %v570_v46, %v537_v11 }
 0x106   :  { %v602_v14 = vld [vmem:[#allocation2 + $0xf0] sm:$0xff]  ;;  %v830_v55 = vadd.f32 %v814_v15, %v781_v2 }
 0x107   :  { %423 = vst [vmem:[#allocation2 + $0x101] sm:$0xff] %v406_v23  ;;  %v440_v29 = vmul.f32 %v2465_v47, %v406_v23  ;;  %v473_v49 = vmul.f32 %v602_v14, %v2461_v41  ;;  %v619_v51 = vmul.f32 %v2484_v28, %v602_v14  ;;  %v717_v56 = vmul.f32 %v2494_v58, %v602_v14  ;;  %v554_v50 = vld [vmem:[#allocation2 + $0xf2] sm:$0xff] }
 0x108   :  { %v815_v31 = vmul.f32 %v2506_v43, %v554_v50  ;;  %v849_v60 = vadd.f32 %v2519_v42, %v830_v55  ;;  %v668_v2 = vmul.f32 %v2490_v13, %v554_v50  ;;  %v571_v11 = vmul.f32 %v2481_v10, %v554_v50 }
 0x109   :  { %v489_v33 = vadd.f32 %v473_v49, %v440_v29  ;;  %v733_v61 = vadd.f32 %v717_v56, %v683_v38  ;;  %v635_v3 = vadd.f32 %v619_v51, %v586_v52 }
 0x10a   :  { %v388_v59 = vpop.f32.mrf.mxu0  ;;  %v865_v46 = vmax.f32 %v849_v60, 0.0 }
 0x10b   :  { %v389_v34 = vadd.f32 %v2453_v37, %v388_v59  ;;  %v782_v25 = vadd.f32 %v766_v32, %v733_v61  ;;  %v538_v16 = vadd.f32 %v522_v62, %v489_v33  ;;  %v684_v49 = vadd.f32 %v668_v2, %v635_v3 }
 0x10c   :  { %v523_v61 = vmul.f32 %v2475_v1, %v406_v23 }
 0x10d   :  { %v407_v5 = vmax.f32 %v389_v34, 0.0  ;;  %v831_v7 = vadd.f32 %v815_v31, %v782_v25  ;;  %v587_v51 = vadd.f32 %v571_v11, %v538_v16  ;;  %v767_v34 = vmul.f32 %v2499_v40, %v406_v23 }
 0x10e   :  { %v603_v24 = vld [vmem:[#allocation2 + $0x100] sm:$0xff] }
 0x10f   :  { %424 = vst [vmem:[#allocation2 + $0x111] sm:$0xff] %v407_v5  ;;  %v441_v14 = vmul.f32 %v2465_v47, %v407_v5  ;;  %v474_v6 = vmul.f32 %v603_v24, %v2461_v41  ;;  %v620_v22 = vmul.f32 %v2484_v28, %v603_v24  ;;  %v850_v29 = vadd.f32 %v2519_v42, %v831_v7  ;;  %v555_v33 = vld [vmem:[#allocation2 + $0x102] sm:$0xff] }
 0x110   :  { %v718_v15 = vmul.f32 %v2494_v58, %v603_v24  ;;  %v669_v31 = vmul.f32 %v2490_v13, %v555_v33  ;;  %v572_v16 = vmul.f32 %v2481_v10, %v555_v33  ;;  %v816_v23 = vmul.f32 %v2506_v43, %v555_v33 }
 0x111   :  { %v490_v38 = vadd.f32 %v474_v6, %v441_v14  ;;  %v866_v55 = vmax.f32 %v850_v29, 0.0  ;;  %v636_v59 = vadd.f32 %v620_v22, %v587_v51  ;;  %v524_v6 = vmul.f32 %v2475_v1, %v407_v5 }
 0x112   :  { %v390_v56 = vpop.f32.mrf.mxu0  ;;  %v734_v52 = vadd.f32 %v718_v15, %v684_v49  ;;  %v768_v15 = vmul.f32 %v2499_v40, %v407_v5 }
 0x113   :  { %v391_v50 = vadd.f32 %v2453_v37, %v390_v56  ;;  %v876_v32 = vpack.c.bf16 %v866_v55, %v865_v46  ;;  %v539_v25 = vadd.f32 %v523_v61, %v490_v38  ;;  %v685_v2 = vadd.f32 %v669_v31, %v636_v59  ;;  %v704_v59 = vld [vmem:[#allocation2 + $0x130] sm:$0xff] }
 0x114   :  { %v783_v60 = vadd.f32 %v767_v34, %v734_v52 }
 0x115   :  { %v408_v62 = vmax.f32 %v391_v50, 0.0  ;;  %963 = vmatmul.bf16.gmra.mxu1 %v876_v32  ;;  %v588_v29 = vadd.f32 %v572_v16, %v539_v25 }
 0x116   :  { %v604_v3 = vld [vmem:[#allocation2 + $0x110] sm:$0xff]  ;;  %v832_v46 = vadd.f32 %v816_v23, %v783_v60  ;;  %v721_v60 = vmul.f32 %v2494_v58, %v704_v59 }
 0x117   :  { %425 = vst [vmem:[#allocation2 + $0x121] sm:$0xff] %v408_v62  ;;  %v442_v24 = vmul.f32 %v2465_v47, %v408_v62  ;;  %v475_v37 = vmul.f32 %v604_v3, %v2461_v41  ;;  %v621_v7 = vmul.f32 %v2484_v28, %v604_v3  ;;  %v719_v11 = vmul.f32 %v2494_v58, %v604_v3  ;;  %v556_v22 = vld [vmem:[#allocation2 + $0x112] sm:$0xff] }
 0x118   :  { %v817_v41 = vmul.f32 %v2506_v43, %v556_v22  ;;  %v573_v56 = vmul.f32 %v2481_v10, %v556_v22  ;;  %v851_v33 = vadd.f32 %v2519_v42, %v832_v46  ;;  %v670_v1 = vmul.f32 %v2490_v13, %v556_v22  ;;  %v753_v3 = vld [vmem:[#allocation2 + $0x131] sm:$0xff] }
 0x119   :  { %v491_v14 = vadd.f32 %v475_v37, %v442_v24  ;;  %v735_v49 = vadd.f32 %v719_v11, %v685_v2  ;;  %v637_v47 = vadd.f32 %v621_v7, %v588_v29  ;;  %v802_v7 = vld [vmem:[#allocation2 + $0x132] sm:$0xff]  ;;  %v770_v11 = vmul.f32 %v2499_v40, %v753_v3 }
 0x11a   :  { %v867_v16 = vmax.f32 %v851_v33, 0.0 }
 0x11b   :  { %v540_v51 = vadd.f32 %v524_v6, %v491_v14  ;;  %v784_v38 = vadd.f32 %v768_v15, %v735_v49  ;;  %v686_v25 = vadd.f32 %v670_v1, %v637_v47  ;;  %v819_v6 = vmul.f32 %v2506_v43, %v802_v7 }
 0x11c   :  { %v3123_v7 = vunpack.c.h.bf16 %v2253_v12 }
 0x11d   :  { %v833_v52 = vadd.f32 %v817_v41, %v784_v38  ;;  %v589_v61 = vadd.f32 %v573_v56, %v540_v51  ;;  %v1873_v51 = vld [vmem:[#allocation8 + $0x8] sm:$0xff]  ;;  %v1872_v41 = vld [vmem:[#allocation8] sm:$0xff] }
 0x11e   :  { %v605_v55 = vld [vmem:[#allocation2 + $0x120] sm:$0xff]  ;;  %1086 = vmatpush.bf16.msra.mxu2 %v1873_v51 }
 0x11f   :  { %v654_v50 = vld [vmem:[#allocation2 + $0x122] sm:$0xff]  ;;  %v622_v32 = vmul.f32 %v2484_v28, %v605_v55  ;;  %v720_v5 = vmul.f32 %v2494_v58, %v605_v55  ;;  %v852_v34 = vadd.f32 %v2519_v42, %v833_v52  ;;  %v769_v28 = vmul.f32 %v2499_v40, %v408_v62  ;;  %v2673_v62 = vld [vmem:[%s3090_s8] ss:$0 sm:$0xff] }
 0x120   :  { %v671_v10 = vmul.f32 %v2490_v13, %v654_v50  ;;  %v818_v13 = vmul.f32 %v2506_v43, %v654_v50  ;;  %v1976_v52 = vld [vmem:[#allocation3] ss:$0 sm:$0xff] }
 0x121   :  { %v638_v31 = vadd.f32 %v622_v32, %v589_v61  ;;  %v868_v24 = vmax.f32 %v852_v34, 0.0  ;;  %v736_v37 = vadd.f32 %v720_v5, %v686_v25  ;;  %v3120_v61 = vunpack.c.l.bf16 %v2229_v4 }
 0x122   :  { %1087 = vmatpush.bf16.msra.mxu2 %v1872_v41  ;;  %v3121_v5 = vunpack.c.h.bf16 %v2229_v4  ;;  %v3122_v4 = vunpack.c.l.bf16 %v2253_v12  ;;  %v3124_v12 = vunpack.c.l.bf16 %v2274_v21 }
 0x123   :  { %v687_v2 = vadd.f32 %v671_v10, %v638_v31  ;;  %v877_v23 = vpack.c.bf16 %v868_v24, %v867_v16  ;;  %v785_v22 = vadd.f32 %v769_v28, %v736_v37 }
 0x125   :  { %v737_v14 = vadd.f32 %v721_v60, %v687_v2  ;;  %968 = vmatmul.bf16.gmra.mxu1 %v877_v23  ;;  %v834_v58 = vadd.f32 %v818_v13, %v785_v22 }
 0x127   :  { %v786_v29 = vadd.f32 %v770_v11, %v737_v14  ;;  %v853_v46 = vadd.f32 %v2519_v42, %v834_v58 }
 0x129   :  { %v835_v49 = vadd.f32 %v819_v6, %v786_v29  ;;  %v869_v38 = vmax.f32 %v853_v46, 0.0 }
 0x12b   :  { %v854_v15 = vadd.f32 %v2519_v42, %v835_v49  ;;  %v3125_v49 = vunpack.c.h.bf16 %v2274_v21  ;;  %v3126_v21 = vunpack.c.l.bf16 %v2295_v30 }
 0x12d   :  { %v870_v47 = vmax.f32 %v854_v15, 0.0 }
 0x12f   :  { %v878_v40 = vpack.c.bf16 %v870_v47, %v869_v38 }
 0x135   :  { %973 = vmatmul.bf16.gmra.mxu1 %v878_v40 }
 0x142   :  { %v939_v43 = vpop.f32.mrf.mxu1 }
 0x143   :  { %v940_v56 = vadd.f32 %v2673_v62, %v939_v43 }
 0x145   :  { %v979_v55 = vadd.f32 %v940_v56, %v2238_v8  ;;  %v3127_v56 = vunpack.c.h.bf16 %v2295_v30 }
 0x147   :  { %v1001_v50 = vmul.f32 %v1976_v52, %v979_v55 }
 0x149   :  { %v2681_v32 = vmul.f32 %v3120_v61, %v1001_v50 }
 0x14a   :  { %v941_v42 = vpop.f32.mrf.mxu1 }
 0x14b   :  { %v942_v33 = vadd.f32 %v2673_v62, %v941_v42 }
 0x14d   :  { %v980_v1 = vadd.f32 %v942_v33, %v2242_v9 }
 0x14f   :  { %v1002_v59 = vmul.f32 %v1976_v52, %v980_v1 }
 0x151   :  { %v2685_v34 = vmul.f32 %v3121_v5, %v1002_v59  ;;  %v3128_v5 = vunpack.c.l.bf16 %v2316_v39 }
 0x152   :  { %v944_v25 = vpop.f32.mrf.mxu1 }
 0x153   :  { %v1033_v8 = vpack.c.bf16 %v2685_v34, %v2681_v32  ;;  %v945_v3 = vadd.f32 %v2673_v62, %v944_v25 }
 0x155   :  { %1822 = vmatmul.msk.bf16.vlgmr.msra.gmra.mxu2 %vm319_vm0, %v1033_v8  ;;  %v981_v31 = vadd.f32 %v945_v3, %v2259_v17  ;;  %v3129_v8 = vunpack.c.h.bf16 %v2316_v39  ;;  %v3130_v39 = vunpack.c.l.bf16 %v2337_v48 }
 0x157   :  { %v1003_v60 = vmul.f32 %v1976_v52, %v981_v31 }
 0x159   :  { %v2696_v37 = vmul.f32 %v3122_v4, %v1003_v60 }
 0x15a   :  { %v946_v9 = vpop.f32.mrf.mxu1 }
 0x15b   :  { %v947_v10 = vadd.f32 %v2673_v62, %v946_v9 }
 0x15d   :  { %v982_v16 = vadd.f32 %v947_v10, %v2263_v18 }
 0x15f   :  { %v1004_v24 = vmul.f32 %v1976_v52, %v982_v16 }
 0x161   :  { %v2700_v2 = vmul.f32 %v3123_v7, %v1004_v24 }
 0x162   :  { %v949_v11 = vpop.f32.mrf.mxu1 }
 0x163   :  { %v1034_v23 = vpack.c.bf16 %v2700_v2, %v2696_v37  ;;  %v950_v17 = vadd.f32 %v2673_v62, %v949_v11  ;;  %v3131_v11 = vunpack.c.h.bf16 %v2337_v48  ;;  %v3132_v48 = vunpack.c.l.bf16 %v2358_v57 }
 0x165   :  { %1823 = vmatmul.msk.bf16.gmra.mxu2 %vm319_vm0, %v1034_v23  ;;  %v983_v28 = vadd.f32 %v950_v17, %v2280_v26 }
 0x167   :  { %v1005_v6 = vmul.f32 %v1976_v52, %v983_v28 }
 0x169   :  { %v2711_v13 = vmul.f32 %v3124_v12, %v1005_v6 }
 0x16a   :  { %v951_v18 = vpop.f32.mrf.mxu1 }
 0x16b   :  { %v952_v14 = vadd.f32 %v2673_v62, %v951_v18 }
 0x16d   :  { %v984_v22 = vadd.f32 %v952_v14, %v2284_v27 }
 0x16f   :  { %v1006_v29 = vmul.f32 %v1976_v52, %v984_v22 }
 0x171   :  { %v2715_v58 = vmul.f32 %v3125_v49, %v1006_v29  ;;  %v3133_v49 = vunpack.c.h.bf16 %v2358_v57  ;;  %v3134_v57 = vld [vmem:[#allocation16_spill] sm:$0xff] }
 0x172   :  { %v954_v15 = vpop.f32.mrf.mxu1 }
 0x173   :  { %v1035_v46 = vpack.c.bf16 %v2715_v58, %v2711_v13  ;;  %v955_v26 = vadd.f32 %v2673_v62, %v954_v15 }
 0x175   :  { %1824 = vmatmul.msk.bf16.gmra.mxu2 %vm319_vm0, %v1035_v46  ;;  %v985_v51 = vadd.f32 %v955_v26, %v2301_v35 }
 0x177   :  { %v1007_v38 = vmul.f32 %v1976_v52, %v985_v51 }
 0x179   :  { %v2726_v43 = vmul.f32 %v3126_v21, %v1007_v38 }
 0x17a   :  { %v956_v27 = vpop.f32.mrf.mxu1 }
 0x17b   :  { %v957_v47 = vadd.f32 %v2673_v62, %v956_v27 }
 0x17d   :  { %v986_v41 = vadd.f32 %v957_v47, %v2305_v36  ;;  %v1977_v36 = vld [vmem:[#allocation3 + $0x1] ss:$0 sm:$0xff] }
 0x17f   :  { %v1008_v40 = vmul.f32 %v1976_v52, %v986_v41 }
 0x181   :  { %v2730_v55 = vmul.f32 %v3127_v56, %v1008_v40  ;;  %v3135_v40 = vunpack.c.l.bf16 %v3134_v57  ;;  %v3136_v56 = vunpack.c.h.bf16 %v3134_v57 }
 0x182   :  { %v959_v42 = vpop.f32.mrf.mxu1 }
 0x183   :  { %v1036_v33 = vpack.c.bf16 %v2730_v55, %v2726_v43  ;;  %v960_v35 = vadd.f32 %v2673_v62, %v959_v42 }
 0x185   :  { %1825 = vmatmul.msk.bf16.gmra.mxu2 %vm319_vm0, %v1036_v33  ;;  %v987_v50 = vadd.f32 %v960_v35, %v2322_v44  ;;  %v1878_v35 = vld [vmem:[%s3095_s13 + $0x20] sm:$0xff] }
 0x187   :  { %v1009_v59 = vmul.f32 %v1977_v36, %v987_v50  ;;  %v1877_v50 = vld [vmem:[%s3095_s13 + $0x18] sm:$0xff] }
 0x189   :  { %v2741_v25 = vmul.f32 %v3128_v5, %v1009_v59 }
 0x18a   :  { %v961_v52 = vpop.f32.mrf.mxu1 }
 0x18b   :  { %v962_v1 = vadd.f32 %v2673_v62, %v961_v52  ;;  %v2813_v52 = vld [vmem:[%s3092_s10] ss:$0 sm:$0xff] }
 0x18d   :  { %v988_v61 = vadd.f32 %v962_v1, %v2326_v45  ;;  %v1876_v1 = vld [vmem:[%s3095_s13 + $0x10] sm:$0xff] }
 0x18f   :  { %v1010_v30 = vmul.f32 %v1977_v36, %v988_v61 }
 0x191   :  { %v2745_v3 = vmul.f32 %v3129_v8, %v1010_v30  ;;  %v1178_v8 = vld [vmem:[#allocation2] sm:$0xff] }
 0x192   :  { %v964_v31 = vpop.f32.mrf.mxu1 }
 0x193   :  { %v1037_v44 = vpack.c.bf16 %v2745_v3, %v2741_v25  ;;  %v965_v9 = vadd.f32 %v2673_v62, %v964_v31 }
 0x195   :  { %1826 = vmatmul.msk.bf16.gmra.mxu2 %vm319_vm0, %v1037_v44  ;;  %v989_v10 = vadd.f32 %v965_v9, %v2343_v53  ;;  %v1875_v44 = vld [vmem:[%s3095_s13 + $0x8] sm:$0xff] }
 0x197   :  { %v1011_v16 = vmul.f32 %v1977_v36, %v989_v10 }
 0x199   :  { %v2756_v7 = vmul.f32 %v3130_v39, %v1011_v16  ;;  %v1874_v16 = vld [vmem:[%s3095_s13] sm:$0xff] }
 0x19a   :  { %v966_v45 = vpop.f32.mrf.mxu1 }
 0x19b   :  { %v967_v60 = vadd.f32 %v2673_v62, %v966_v45  ;;  %v1227_v45 = vld [vmem:[#allocation2 + $0x1] sm:$0xff] }
 0x19d   :  { %v990_v24 = vadd.f32 %v967_v60, %v2347_v54 }
 0x19f   :  { %v1012_v4 = vmul.f32 %v1977_v36, %v990_v24 }
 0x1a1   :  { %v2760_v23 = vmul.f32 %v3131_v11, %v1012_v4 }
 0x1a2   :  { %v969_v17 = vpop.f32.mrf.mxu1 }
 0x1a3   :  { %v1038_v28 = vpack.c.bf16 %v2760_v23, %v2756_v7  ;;  %v970_v53 = vadd.f32 %v2673_v62, %v969_v17  ;;  %v1276_v17 = vld [vmem:[#allocation2 + $0x2] sm:$0xff] }
 0x1a5   :  { %1827 = vmatmul.msk.bf16.gmra.mxu2 %vm319_vm0, %v1038_v28  ;;  %v991_v18 = vadd.f32 %v970_v53, %v2371_v63 }
 0x1a7   :  { %v1013_v6 = vmul.f32 %v1977_v36, %v991_v18 }
 0x1a9   :  { %v2771_v12 = vmul.f32 %v3132_v48, %v1013_v6 }
 0x1aa   :  { %v971_v54 = vpop.f32.mrf.mxu1 }
 0x1ab   :  { %v972_v14 = vadd.f32 %v2673_v62, %v971_v54 }
 0x1ad   :  { %v992_v22 = vadd.f32 %v972_v14, %v2375_v0 }
 0x1af   :  { %v1014_v29 = vmul.f32 %v1977_v36, %v992_v22 }
 0x1b1   :  { %v2775_v15 = vmul.f32 %v3133_v49, %v1014_v29 }
 0x1b2   :  { %v974_v46 = vpop.f32.mrf.mxu1 }
 0x1b3   :  { %v1039_v26 = vpack.c.bf16 %v2775_v15, %v2771_v12  ;;  %v975_v63 = vadd.f32 %v2673_v62, %v974_v46 }
 0x1b5   :  { %1828 = vmatmul.msk.bf16.gmra.mxu2 %vm319_vm0, %v1039_v26  ;;  %v993_v51 = vadd.f32 %v975_v63, %v2411_v19  ;;  %v1881_v19 = vld [vmem:[%s3095_s13 + $0x38] sm:$0xff] }
 0x1b6   :  { %1664 = vmatpush.bf16.msra.mxu3 %v1881_v19 }
 0x1b7   :  { %v1015_v47 = vmul.f32 %v1977_v36, %v993_v51 }
 0x1b9   :  { %v2786_v21 = vmul.f32 %v3135_v40, %v1015_v47 }
 0x1ba   :  { %v976_v0 = vpop.f32.mrf.mxu1 }
 0x1bb   :  { %v977_v27 = vadd.f32 %v2673_v62, %v976_v0  ;;  %v1879_v62 = vld [vmem:[%s3095_s13 + $0x28] sm:$0xff] }
 0x1bd   :  { %v994_v38 = vadd.f32 %v977_v27, %v2415_v20  ;;  %v1880_v20 = vld [vmem:[%s3095_s13 + $0x30] sm:$0xff] }
 0x1be   :  { %1665 = vmatpush.bf16.msra.mxu3 %v1880_v20 }
 0x1bf   :  { %v1016_v41 = vmul.f32 %v1977_v36, %v994_v38  ;;  %v260_v36 = vld [vmem:[#allocation9] sm:$0xff] }
 0x1c0   :  { %v2818_v61 = vperm.slane %v260_v36, 0  ;;  %v2821_v5 = vperm.slane %v260_v36, 4  ;;  %v2828_v60 = vperm.slane %v260_v36, 1  ;;  %v2834_v39 = vperm.slane %v260_v36, 2 }
 0x1c1   :  { %v2790_v42 = vmul.f32 %v3136_v56, %v1016_v41  ;;  %v2837_v53 = vperm.slane %v260_v36, 3  ;;  %v2843_v63 = vperm.slane %v260_v36, 5  ;;  %v2847_v38 = vperm.slane %v260_v36, 6 }
 0x1c2   :  { %1666 = vmatpush.bf16.msra.mxu3 %v1879_v62  ;;  %v1195_v9 = vmul.f32 %v2818_v61, %v1178_v8  ;;  %v1244_v4 = vmul.f32 %v2828_v60, %v1227_v45  ;;  %v1293_v14 = vmul.f32 %v2834_v39, %v1276_v17  ;;  %v2852_v20 = vperm.slane %v260_v36, 7  ;;  %v2859_v45 = vld [vmem:[#allocation9 + $0x8] ss:$0 sm:$0xff] }
 0x1c3   :  { %v1040_v33 = vpack.c.bf16 %v2790_v42, %v2786_v21 }
 0x1c5   :  { %1829 = vmatmul.msk.bf16.gmra.mxu2 %vm319_vm0, %v1040_v33 }
 0x1c6   :  { %1667 = vmatpush.bf16.msra.mxu3 %v1878_v35 }
 0x1ca   :  { %1668 = vmatpush.bf16.msra.mxu3 %v1877_v50 }
 0x1ce   :  { %1669 = vmatpush.bf16.msra.mxu3 %v1876_v1 }
 0x1d2   :  { %1670 = vmatpush.bf16.msra.mxu3 %v1875_v44 }
 0x1d6   :  { %1671 = vmatpush.bf16.msra.mxu3 %v1874_v16 }
 0x1d8   :  { %v1089_v59 = vpop.f32.mrf.mxu2 }
 0x1d9   :  { %v1090_v30 = vadd.f32 %v2813_v52, %v1089_v59 }
 0x1db   :  { %v1129_v31 = vmax.f32 %v1090_v30, 0.0 }
 0x1dd   :  { %1145 = vst [vmem:[#allocation2 + $0x11] sm:$0xff] %v1129_v31  ;;  %v1162_v10 = vmul.f32 %v2821_v5, %v1129_v31  ;;  %v1245_v47 = vmul.f32 %v2828_v60, %v1129_v31 }
 0x1df   :  { %v1211_v24 = vadd.f32 %v1195_v9, %v1162_v10 }
 0x1e0   :  { %v1091_v11 = vpop.f32.mrf.mxu2 }
 0x1e1   :  { %v1092_v28 = vadd.f32 %v2813_v52, %v1091_v11  ;;  %v1260_v54 = vadd.f32 %v1244_v4, %v1211_v24 }
 0x1e3   :  { %v1130_v18 = vmax.f32 %v1092_v28, 0.0  ;;  %v1309_v49 = vadd.f32 %v1293_v14, %v1260_v54 }
 0x1e4   :  { %v1325_v6 = vld [vmem:[#allocation2 + $0x10] sm:$0xff] }
 0x1e5   :  { %1146 = vst [vmem:[#allocation2 + $0x21] sm:$0xff] %v1130_v18  ;;  %v1163_v22 = vmul.f32 %v2821_v5, %v1130_v18  ;;  %v1196_v29 = vmul.f32 %v1325_v6, %v2818_v61  ;;  %v1342_v48 = vmul.f32 %v2837_v53, %v1325_v6  ;;  %v1277_v51 = vld [vmem:[#allocation2 + $0x12] sm:$0xff]  ;;  %v1489_v10 = vmul.f32 %v2852_v20, %v1130_v18 }
 0x1e6   :  { %v1391_v56 = vmul.f32 %v2843_v63, %v1277_v51  ;;  %v1294_v62 = vmul.f32 %v2834_v39, %v1277_v51  ;;  %v1246_v16 = vmul.f32 %v2828_v60, %v1130_v18 }
 0x1e7   :  { %v1212_v46 = vadd.f32 %v1196_v29, %v1163_v22  ;;  %v1358_v27 = vadd.f32 %v1342_v48, %v1309_v49 }
 0x1e8   :  { %v1094_v26 = vpop.f32.mrf.mxu2 }
 0x1e9   :  { %v1095_v0 = vadd.f32 %v2813_v52, %v1094_v26  ;;  %v1261_v57 = vadd.f32 %v1245_v47, %v1212_v46  ;;  %v1407_v50 = vadd.f32 %v1391_v56, %v1358_v27  ;;  %v2872_v26 = vld [vmem:[%s3094_s12] ss:$0 sm:$0xff] }
 0x1eb   :  { %v1131_v41 = vmax.f32 %v1095_v0, 0.0  ;;  %v1310_v59 = vadd.f32 %v1294_v62, %v1261_v57 }
 0x1ec   :  { %v1326_v40 = vld [vmem:[#allocation2 + $0x20] sm:$0xff] }
 0x1ed   :  { %1147 = vst [vmem:[#allocation2 + $0x31] sm:$0xff] %v1131_v41  ;;  %v1164_v33 = vmul.f32 %v2821_v5, %v1131_v41  ;;  %v1197_v19 = vmul.f32 %v1326_v40, %v2818_v61  ;;  %v1343_v35 = vmul.f32 %v2837_v53, %v1326_v40  ;;  %v1440_v1 = vmul.f32 %v2847_v38, %v1326_v40  ;;  %v1278_v44 = vld [vmem:[#allocation2 + $0x22] sm:$0xff] }
 0x1ee   :  { %v1392_v28 = vmul.f32 %v2843_v63, %v1278_v44  ;;  %v1538_v6 = vmul.f32 %v2859_v45, %v1278_v44  ;;  %v1295_v22 = vmul.f32 %v2834_v39, %v1278_v44  ;;  %v1490_v57 = vmul.f32 %v2852_v20, %v1131_v41 }
 0x1ef   :  { %v1213_v30 = vadd.f32 %v1197_v19, %v1164_v33  ;;  %v1456_v31 = vadd.f32 %v1440_v1, %v1407_v50  ;;  %v1359_v36 = vadd.f32 %v1343_v35, %v1310_v59  ;;  %v1247_v33 = vmul.f32 %v2828_v60, %v1131_v41 }
 0x1f0   :  { %v1096_v8 = vpop.f32.mrf.mxu2 }
 0x1f1   :  { %v1097_v9 = vadd.f32 %v2813_v52, %v1096_v8  ;;  %v1505_v4 = vadd.f32 %v1489_v10, %v1456_v31  ;;  %v1262_v11 = vadd.f32 %v1246_v16, %v1213_v30  ;;  %v1408_v48 = vadd.f32 %v1392_v28, %v1359_v36 }
 0x1f3   :  { %v1132_v24 = vmax.f32 %v1097_v9, 0.0  ;;  %v1554_v46 = vadd.f32 %v1538_v6, %v1505_v4  ;;  %v1311_v51 = vadd.f32 %v1295_v22, %v1262_v11 }
 0x1f4   :  { %v1327_v17 = vld [vmem:[#allocation2 + $0x30] sm:$0xff] }
 0x1f5   :  { %1148 = vst [vmem:[#allocation2 + $0x41] sm:$0xff] %v1132_v24  ;;  %v1165_v54 = vmul.f32 %v2821_v5, %v1132_v24  ;;  %v1198_v14 = vmul.f32 %v1327_v17, %v2818_v61  ;;  %v1344_v29 = vmul.f32 %v2837_v53, %v1327_v17  ;;  %v1441_v18 = vmul.f32 %v2847_v38, %v1327_v17  ;;  %v1279_v49 = vld [vmem:[#allocation2 + $0x32] sm:$0xff] }
 0x1f6   :  { %v1539_v62 = vmul.f32 %v2859_v45, %v1279_v49  ;;  %v1573_v50 = vadd.f32 %v2872_v26, %v1554_v46  ;;  %v1393_v8 = vmul.f32 %v2843_v63, %v1279_v49  ;;  %v1296_v31 = vmul.f32 %v2834_v39, %v1279_v49 }
 0x1f7   :  { %v1214_v0 = vadd.f32 %v1198_v14, %v1165_v54  ;;  %v1457_v47 = vadd.f32 %v1441_v18, %v1408_v48  ;;  %v1360_v56 = vadd.f32 %v1344_v29, %v1311_v51  ;;  %v1491_v29 = vmul.f32 %v2852_v20, %v1132_v24 }
 0x1f8   :  { %v1099_v27 = vpop.f32.mrf.mxu2  ;;  %v1589_v4 = vmax.f32 %v1573_v50, 0.0  ;;  %v1248_v18 = vmul.f32 %v2828_v60, %v1132_v24 }
 0x1f9   :  { %v1100_v40 = vadd.f32 %v2813_v52, %v1099_v27  ;;  %v1506_v19 = vadd.f32 %v1490_v57, %v1457_v47  ;;  %v1263_v1 = vadd.f32 %v1247_v33, %v1214_v0  ;;  %v1409_v36 = vadd.f32 %v1393_v8, %v1360_v56 }
 0x1fb   :  { %v1133_v35 = vmax.f32 %v1100_v40, 0.0  ;;  %v1555_v30 = vadd.f32 %v1539_v62, %v1506_v19  ;;  %v1312_v11 = vadd.f32 %v1296_v31, %v1263_v1 }
 0x1fc   :  { %v1328_v59 = vld [vmem:[#allocation2 + $0x40] sm:$0xff] }
 0x1fd   :  { %1149 = vst [vmem:[#allocation2 + $0x51] sm:$0xff] %v1133_v35  ;;  %v1166_v44 = vmul.f32 %v2821_v5, %v1133_v35  ;;  %v1199_v9 = vmul.f32 %v1328_v59, %v2818_v61  ;;  %v1345_v41 = vmul.f32 %v2837_v53, %v1328_v59  ;;  %v1574_v10 = vadd.f32 %v2872_v26, %v1555_v30  ;;  %v1280_v6 = vld [vmem:[#allocation2 + $0x42] sm:$0xff] }
 0x1fe   :  { %v1442_v16 = vmul.f32 %v2847_v38, %v1328_v59  ;;  %v1394_v47 = vmul.f32 %v2843_v63, %v1280_v6  ;;  %v1540_v56 = vmul.f32 %v2859_v45, %v1280_v6  ;;  %v1297_v33 = vmul.f32 %v2834_v39, %v1280_v6 }
 0x1ff   :  { %v1215_v17 = vadd.f32 %v1199_v9, %v1166_v44  ;;  %v1590_v54 = vmax.f32 %v1574_v10, 0.0  ;;  %v1361_v48 = vadd.f32 %v1345_v41, %v1312_v11  ;;  %v1492_v44 = vmul.f32 %v2852_v20, %v1133_v35 }
 0x200   :  { %v1101_v28 = vpop.f32.mrf.mxu2  ;;  %v1458_v14 = vadd.f32 %v1442_v16, %v1409_v36  ;;  %v1249_v10 = vmul.f32 %v2828_v60, %v1133_v35 }
 0x201   :  { %v1102_v22 = vadd.f32 %v2813_v52, %v1101_v28  ;;  %v1605_v49 = vpack.c.bf16 %v1590_v54, %v1589_v4  ;;  %v1264_v0 = vadd.f32 %v1248_v18, %v1215_v17  ;;  %v1410_v24 = vadd.f32 %v1394_v47, %v1361_v48 }
 0x202   :  { %v1507_v51 = vadd.f32 %v1491_v29, %v1458_v14 }
 0x203   :  { %v1134_v46 = vmax.f32 %v1102_v22, 0.0  ;;  %1672 = vmatmul.bf16.vlgmr.msra.gmra.mxu3 %v1605_v49  ;;  %v1313_v59 = vadd.f32 %v1297_v33, %v1264_v0 }
 0x204   :  { %v1329_v27 = vld [vmem:[#allocation2 + $0x50] sm:$0xff]  ;;  %v1556_v1 = vadd.f32 %v1540_v56, %v1507_v51 }
 0x205   :  { %1150 = vst [vmem:[#allocation2 + $0x61] sm:$0xff] %v1134_v46  ;;  %v1167_v57 = vmul.f32 %v2821_v5, %v1134_v46  ;;  %v1200_v40 = vmul.f32 %v1329_v27, %v2818_v61  ;;  %v1346_v19 = vmul.f32 %v2837_v53, %v1329_v27  ;;  %v1443_v62 = vmul.f32 %v2847_v38, %v1329_v27  ;;  %v1281_v50 = vld [vmem:[#allocation2 + $0x52] sm:$0xff] }
 0x206   :  { %v1541_v16 = vmul.f32 %v2859_v45, %v1281_v50  ;;  %v1575_v11 = vadd.f32 %v2872_v26, %v1556_v1  ;;  %v1395_v14 = vmul.f32 %v2843_v63, %v1281_v50  ;;  %v1298_v6 = vmul.f32 %v2834_v39, %v1281_v50 }
 0x207   :  { %v1216_v30 = vadd.f32 %v1200_v40, %v1167_v57  ;;  %v1459_v31 = vadd.f32 %v1443_v62, %v1410_v24  ;;  %v1362_v41 = vadd.f32 %v1346_v19, %v1313_v59  ;;  %v1250_v24 = vmul.f32 %v2828_v60, %v1134_v46 }
 0x208   :  { %v1104_v8 = vpop.f32.mrf.mxu2  ;;  %v1591_v51 = vmax.f32 %v1575_v11, 0.0  ;;  %v1493_v50 = vmul.f32 %v2852_v20, %v1134_v46 }
 0x209   :  { %v1105_v9 = vadd.f32 %v2813_v52, %v1104_v8  ;;  %v1508_v36 = vadd.f32 %v1492_v44, %v1459_v31  ;;  %v1265_v17 = vadd.f32 %v1249_v10, %v1216_v30  ;;  %v1411_v18 = vadd.f32 %v1395_v14, %v1362_v41 }
 0x20b   :  { %v1135_v4 = vmax.f32 %v1105_v9, 0.0  ;;  %v1557_v54 = vadd.f32 %v1541_v16, %v1508_v36  ;;  %v1314_v0 = vadd.f32 %v1298_v6, %v1265_v17 }
 0x20c   :  { %v1330_v28 = vld [vmem:[#allocation2 + $0x60] sm:$0xff] }
 0x20d   :  { %1151 = vst [vmem:[#allocation2 + $0x71] sm:$0xff] %v1135_v4  ;;  %v1168_v22 = vmul.f32 %v2821_v5, %v1135_v4  ;;  %v1201_v29 = vmul.f32 %v1330_v28, %v2818_v61  ;;  %v1347_v35 = vmul.f32 %v2837_v53, %v1330_v28  ;;  %v1576_v48 = vadd.f32 %v2872_v26, %v1557_v54  ;;  %v1282_v56 = vld [vmem:[#allocation2 + $0x62] sm:$0xff] }
 0x20e   :  { %v1444_v49 = vmul.f32 %v2847_v38, %v1330_v28  ;;  %v1396_v8 = vmul.f32 %v2843_v63, %v1282_v56  ;;  %v1299_v44 = vmul.f32 %v2834_v39, %v1282_v56  ;;  %v1542_v46 = vmul.f32 %v2859_v45, %v1282_v56 }
 0x20f   :  { %v1217_v27 = vadd.f32 %v1201_v29, %v1168_v22  ;;  %v1592_v57 = vmax.f32 %v1576_v48, 0.0  ;;  %v1363_v19 = vadd.f32 %v1347_v35, %v1314_v0  ;;  %v1251_v17 = vmul.f32 %v2828_v60, %v1135_v4 }
 0x210   :  { %v1106_v47 = vpop.f32.mrf.mxu2  ;;  %v1460_v40 = vadd.f32 %v1444_v49, %v1411_v18  ;;  %v1494_v22 = vmul.f32 %v2852_v20, %v1135_v4  ;;  %v1186_v18 = vld [vmem:[#allocation2 + $0xa0] sm:$0xff] }
 0x211   :  { %v1107_v33 = vadd.f32 %v2813_v52, %v1106_v47  ;;  %v1606_v62 = vpack.c.bf16 %v1592_v57, %v1591_v51  ;;  %v1266_v59 = vadd.f32 %v1250_v24, %v1217_v27  ;;  %v1412_v36 = vadd.f32 %v1396_v8, %v1363_v19  ;;  %v1235_v57 = vld [vmem:[#allocation2 + $0xa1] sm:$0xff] }
 0x212   :  { %v1509_v31 = vadd.f32 %v1493_v50, %v1460_v40  ;;  %v1203_v56 = vmul.f32 %v2818_v61, %v1186_v18 }
 0x213   :  { %v1136_v1 = vmax.f32 %v1107_v33, 0.0  ;;  %1677 = vmatmul.bf16.gmra.mxu3 %v1606_v62  ;;  %v1315_v54 = vadd.f32 %v1299_v44, %v1266_v59  ;;  %v1430_v62 = vld [vmem:[#allocation2 + $0x90] sm:$0xff] }
 0x214   :  { %v1331_v30 = vld [vmem:[#allocation2 + $0x70] sm:$0xff]  ;;  %v1558_v29 = vadd.f32 %v1542_v46, %v1509_v31 }
 0x215   :  { %1152 = vst [vmem:[#allocation2 + $0x81] sm:$0xff] %v1136_v1  ;;  %v1169_v9 = vmul.f32 %v2821_v5, %v1136_v1  ;;  %v1202_v41 = vmul.f32 %v1331_v30, %v2818_v61  ;;  %v1348_v10 = vmul.f32 %v2837_v53, %v1331_v30  ;;  %v1445_v16 = vmul.f32 %v2847_v38, %v1331_v30  ;;  %v1283_v28 = vld [vmem:[#allocation2 + $0x72] sm:$0xff] }
 0x216   :  { %v1543_v0 = vmul.f32 %v2859_v45, %v1283_v28  ;;  %v1300_v27 = vmul.f32 %v2834_v39, %v1283_v28  ;;  %v1577_v19 = vadd.f32 %v2872_v26, %v1558_v29  ;;  %v1397_v24 = vmul.f32 %v2843_v63, %v1283_v28  ;;  %v1528_v29 = vld [vmem:[#allocation2 + $0x92] sm:$0xff] }
 0x217   :  { %v1218_v11 = vadd.f32 %v1202_v41, %v1169_v9  ;;  %v1461_v6 = vadd.f32 %v1445_v16, %v1412_v36  ;;  %v1364_v49 = vadd.f32 %v1348_v10, %v1315_v54  ;;  %v1252_v41 = vmul.f32 %v2828_v60, %v1235_v57  ;;  %v1479_v16 = vld [vmem:[#allocation2 + $0x91] sm:$0xff] }
 0x218   :  { %v1109_v14 = vpop.f32.mrf.mxu2  ;;  %v1447_v36 = vmul.f32 %v2847_v38, %v1430_v62  ;;  %v1496_v18 = vmul.f32 %v2852_v20, %v1479_v16 }
 0x219   :  { %v1267_v35 = vadd.f32 %v1251_v17, %v1218_v11  ;;  %v1110_v48 = vadd.f32 %v2813_v52, %v1109_v14  ;;  %v1510_v51 = vadd.f32 %v1494_v22, %v1461_v6  ;;  %v1413_v31 = vadd.f32 %v1397_v24, %v1364_v49  ;;  %v1284_v14 = vld [vmem:[#allocation2 + $0xa2] sm:$0xff] }
 0x21a   :  { %v1593_v17 = vmax.f32 %v1577_v19, 0.0 }
 0x21b   :  { %v1137_v47 = vmax.f32 %v1110_v48, 0.0  ;;  %v1559_v33 = vadd.f32 %v1543_v0, %v1510_v51  ;;  %v1316_v50 = vadd.f32 %v1300_v27, %v1267_v35  ;;  %v1495_v48 = vmul.f32 %v2852_v20, %v1136_v1 }
 0x21c   :  { %v1332_v40 = vld [vmem:[#allocation2 + $0x80] sm:$0xff]  ;;  %v1301_v27 = vmul.f32 %v2834_v39, %v1284_v14 }
 0x21d   :  { %v1381_v4 = vld [vmem:[#allocation2 + $0x82] sm:$0xff]  ;;  %v1349_v59 = vmul.f32 %v2837_v53, %v1332_v40  ;;  %1153 = vst [vmem:[#allocation2 + $0xb1] sm:$0xff] %v1137_v47  ;;  %v1170_v30 = vmul.f32 %v2821_v5, %v1137_v47  ;;  %v1578_v8 = vadd.f32 %v2872_v26, %v1559_v33  ;;  %v1446_v44 = vmul.f32 %v2847_v38, %v1332_v40 }
 0x21e   :  { %v1398_v10 = vmul.f32 %v2843_v63, %v1381_v4  ;;  %v1544_v62 = vmul.f32 %v2859_v45, %v1381_v4 }
 0x21f   :  { %v1365_v9 = vadd.f32 %v1349_v59, %v1316_v50  ;;  %v1219_v46 = vadd.f32 %v1203_v56, %v1170_v30  ;;  %v1594_v28 = vmax.f32 %v1578_v8, 0.0  ;;  %v1462_v54 = vadd.f32 %v1446_v44, %v1413_v31 }
 0x220   :  { %v1111_v11 = vpop.f32.mrf.mxu2  ;;  %v1545_v56 = vmul.f32 %v2859_v45, %v1528_v29 }
 0x221   :  { %v1112_v6 = vadd.f32 %v2813_v52, %v1111_v11  ;;  %v1414_v22 = vadd.f32 %v1398_v10, %v1365_v9  ;;  %v1607_v35 = vpack.c.bf16 %v1594_v28, %v1593_v17  ;;  %v1268_v0 = vadd.f32 %v1252_v41, %v1219_v46 }
 0x222   :  { %v1511_v40 = vadd.f32 %v1495_v48, %v1462_v54  ;;  %v1253_v10 = vmul.f32 %v2828_v60, %v1137_v47 }
 0x223   :  { %v1138_v49 = vmax.f32 %v1112_v6, 0.0  ;;  %v1463_v51 = vadd.f32 %v1447_v36, %v1414_v22  ;;  %1682 = vmatmul.bf16.gmra.mxu3 %v1607_v35  ;;  %v1317_v50 = vadd.f32 %v1301_v27, %v1268_v0 }
 0x224   :  { %v1333_v57 = vld [vmem:[#allocation2 + $0xb0] sm:$0xff]  ;;  %v1560_v8 = vadd.f32 %v1544_v62, %v1511_v40 }
 0x225   :  { %1154 = vst [vmem:[#allocation2 + $0xc1] sm:$0xff] %v1138_v49  ;;  %v1171_v33 = vmul.f32 %v2821_v5, %v1138_v49  ;;  %v1204_v19 = vmul.f32 %v1333_v57, %v2818_v61  ;;  %v1350_v24 = vmul.f32 %v2837_v53, %v1333_v57  ;;  %v1512_v1 = vadd.f32 %v1496_v18, %v1463_v51  ;;  %v1285_v44 = vld [vmem:[#allocation2 + $0xb2] sm:$0xff] }
 0x226   :  { %v1579_v17 = vadd.f32 %v2872_v26, %v1560_v8  ;;  %v1399_v4 = vmul.f32 %v2843_v63, %v1285_v44  ;;  %v1302_v28 = vmul.f32 %v2834_v39, %v1285_v44  ;;  %v1497_v40 = vmul.f32 %v2852_v20, %v1138_v49 }
 0x227   :  { %v1220_v59 = vadd.f32 %v1204_v19, %v1171_v33  ;;  %v1561_v31 = vadd.f32 %v1545_v56, %v1512_v1  ;;  %v1366_v41 = vadd.f32 %v1350_v24, %v1317_v50  ;;  %v1254_v33 = vmul.f32 %v2828_v60, %v1138_v49 }
 0x228   :  { %v1114_v30 = vpop.f32.mrf.mxu2  ;;  %v1595_v51 = vmax.f32 %v1579_v17, 0.0 }
 0x229   :  { %v1115_v9 = vadd.f32 %v2813_v52, %v1114_v30  ;;  %v1580_v36 = vadd.f32 %v2872_v26, %v1561_v31  ;;  %v1269_v46 = vadd.f32 %v1253_v10, %v1220_v59  ;;  %v1415_v47 = vadd.f32 %v1399_v4, %v1366_v41 }
 0x22b   :  { %v1139_v16 = vmax.f32 %v1115_v9, 0.0  ;;  %v1596_v22 = vmax.f32 %v1580_v36, 0.0  ;;  %v1318_v35 = vadd.f32 %v1302_v28, %v1269_v46 }
 0x22c   :  { %v1334_v11 = vld [vmem:[#allocation2 + $0xc0] sm:$0xff] }
 0x22d   :  { %1155 = vst [vmem:[#allocation2 + $0xd1] sm:$0xff] %v1139_v16  ;;  %v1172_v54 = vmul.f32 %v2821_v5, %v1139_v16  ;;  %v1205_v14 = vmul.f32 %v1334_v11, %v2818_v61  ;;  %v1351_v6 = vmul.f32 %v2837_v53, %v1334_v11  ;;  %v1448_v29 = vmul.f32 %v2847_v38, %v1334_v11  ;;  %v1286_v27 = vld [vmem:[#allocation2 + $0xc2] sm:$0xff] }
 0x22e   :  { %v1608_v19 = vpack.c.bf16 %v1596_v22, %v1595_v51  ;;  %v1400_v59 = vmul.f32 %v2843_v63, %v1286_v27  ;;  %v1546_v31 = vmul.f32 %v2859_v45, %v1286_v27  ;;  %v1303_v44 = vmul.f32 %v2834_v39, %v1286_v27 }
 0x22f   :  { %v1221_v48 = vadd.f32 %v1205_v14, %v1172_v54  ;;  %v1464_v0 = vadd.f32 %v1448_v29, %v1415_v47  ;;  %v1367_v56 = vadd.f32 %v1351_v6, %v1318_v35  ;;  %v1498_v28 = vmul.f32 %v2852_v20, %v1139_v16 }
 0x230   :  { %v1116_v18 = vpop.f32.mrf.mxu2  ;;  %v1255_v6 = vmul.f32 %v2828_v60, %v1139_v16 }
 0x231   :  { %v1117_v57 = vadd.f32 %v2813_v52, %v1116_v18  ;;  %v1513_v1 = vadd.f32 %v1497_v40, %v1464_v0  ;;  %v1270_v62 = vadd.f32 %v1254_v33, %v1221_v48  ;;  %v1416_v49 = vadd.f32 %v1400_v59, %v1367_v56 }
 0x233   :  { %v1140_v24 = vmax.f32 %v1117_v57, 0.0  ;;  %1687 = vmatmul.bf16.gmra.mxu3 %v1608_v19  ;;  %v1562_v36 = vadd.f32 %v1546_v31, %v1513_v1  ;;  %v1319_v46 = vadd.f32 %v1303_v44, %v1270_v62 }
 0x234   :  { %v1335_v50 = vld [vmem:[#allocation2 + $0xd0] sm:$0xff] }
 0x235   :  { %1156 = vst [vmem:[#allocation2 + $0xe1] sm:$0xff] %v1140_v24  ;;  %v1173_v30 = vmul.f32 %v2821_v5, %v1140_v24  ;;  %v1206_v8 = vmul.f32 %v1335_v50, %v2818_v61  ;;  %v1352_v9 = vmul.f32 %v2837_v53, %v1335_v50  ;;  %v1449_v41 = vmul.f32 %v2847_v38, %v1335_v50  ;;  %v1287_v10 = vld [vmem:[#allocation2 + $0xd2] sm:$0xff] }
 0x236   :  { %v1547_v47 = vmul.f32 %v2859_v45, %v1287_v10  ;;  %v1581_v35 = vadd.f32 %v2872_v26, %v1562_v36  ;;  %v1401_v0 = vmul.f32 %v2843_v63, %v1287_v10  ;;  %v1304_v27 = vmul.f32 %v2834_v39, %v1287_v10 }
 0x237   :  { %v1222_v11 = vadd.f32 %v1206_v8, %v1173_v30  ;;  %v1465_v4 = vadd.f32 %v1449_v41, %v1416_v49  ;;  %v1368_v14 = vadd.f32 %v1352_v9, %v1319_v46  ;;  %v1499_v9 = vmul.f32 %v2852_v20, %v1140_v24 }
 0x238   :  { %v1119_v17 = vpop.f32.mrf.mxu2  ;;  %v1597_v1 = vmax.f32 %v1581_v35, 0.0  ;;  %v1256_v41 = vmul.f32 %v2828_v60, %v1140_v24 }
 0x239   :  { %v1120_v54 = vadd.f32 %v2813_v52, %v1119_v17  ;;  %v1514_v22 = vadd.f32 %v1498_v28, %v1465_v4  ;;  %v1271_v48 = vadd.f32 %v1255_v6, %v1222_v11  ;;  %v1417_v33 = vadd.f32 %v1401_v0, %v1368_v14 }
 0x23b   :  { %v1141_v29 = vmax.f32 %v1120_v54, 0.0  ;;  %v1563_v51 = vadd.f32 %v1547_v47, %v1514_v22  ;;  %v1320_v62 = vadd.f32 %v1304_v27, %v1271_v48 }
 0x23c   :  { %v1336_v18 = vld [vmem:[#allocation2 + $0xe0] sm:$0xff] }
 0x23d   :  { %1157 = vst [vmem:[#allocation2 + $0xf1] sm:$0xff] %v1141_v29  ;;  %v1174_v57 = vmul.f32 %v2821_v5, %v1141_v29  ;;  %v1207_v40 = vmul.f32 %v1336_v18, %v2818_v61  ;;  %v1353_v16 = vmul.f32 %v2837_v53, %v1336_v18  ;;  %v1582_v56 = vadd.f32 %v2872_v26, %v1563_v51  ;;  %v1288_v31 = vld [vmem:[#allocation2 + $0xe2] sm:$0xff] }
 0x23e   :  { %v1450_v19 = vmul.f32 %v2847_v38, %v1336_v18  ;;  %v1402_v4 = vmul.f32 %v2843_v63, %v1288_v31  ;;  %v1548_v14 = vmul.f32 %v2859_v45, %v1288_v31  ;;  %v1305_v6 = vmul.f32 %v2834_v39, %v1288_v31 }
 0x23f   :  { %v1223_v50 = vadd.f32 %v1207_v40, %v1174_v57  ;;  %v1598_v30 = vmax.f32 %v1582_v56, 0.0  ;;  %v1369_v49 = vadd.f32 %v1353_v16, %v1320_v62  ;;  %v1500_v57 = vmul.f32 %v2852_v20, %v1141_v29 }
 0x240   :  { %v1121_v59 = vpop.f32.mrf.mxu2  ;;  %v1466_v8 = vadd.f32 %v1450_v19, %v1417_v33  ;;  %v1257_v56 = vmul.f32 %v2828_v60, %v1141_v29 }
 0x241   :  { %v1122_v44 = vadd.f32 %v2813_v52, %v1121_v59  ;;  %v1609_v10 = vpack.c.bf16 %v1598_v30, %v1597_v1  ;;  %v1272_v11 = vadd.f32 %v1256_v41, %v1223_v50  ;;  %v1418_v24 = vadd.f32 %v1402_v4, %v1369_v49 }
 0x242   :  { %v1515_v46 = vadd.f32 %v1499_v9, %v1466_v8 }
 0x243   :  { %v1142_v36 = vmax.f32 %v1122_v44, 0.0  ;;  %1692 = vmatmul.bf16.gmra.mxu3 %v1609_v10  ;;  %v1321_v18 = vadd.f32 %v1305_v6, %v1272_v11 }
 0x244   :  { %v1337_v17 = vld [vmem:[#allocation2 + $0xf0] sm:$0xff]  ;;  %v1564_v48 = vadd.f32 %v1548_v14, %v1515_v46 }
 0x245   :  { %1158 = vst [vmem:[#allocation2 + $0x101] sm:$0xff] %v1142_v36  ;;  %v1175_v28 = vmul.f32 %v2821_v5, %v1142_v36  ;;  %v1208_v54 = vmul.f32 %v1337_v17, %v2818_v61  ;;  %v1354_v22 = vmul.f32 %v2837_v53, %v1337_v17  ;;  %v1451_v47 = vmul.f32 %v2847_v38, %v1337_v17  ;;  %v1289_v35 = vld [vmem:[#allocation2 + $0xf2] sm:$0xff] }
 0x246   :  { %v1549_v19 = vmul.f32 %v2859_v45, %v1289_v35  ;;  %v1583_v62 = vadd.f32 %v2872_v26, %v1564_v48  ;;  %v1403_v8 = vmul.f32 %v2843_v63, %v1289_v35  ;;  %v1306_v31 = vmul.f32 %v2834_v39, %v1289_v35 }
 0x247   :  { %v1224_v51 = vadd.f32 %v1208_v54, %v1175_v28  ;;  %v1467_v27 = vadd.f32 %v1451_v47, %v1418_v24  ;;  %v1370_v16 = vadd.f32 %v1354_v22, %v1321_v18  ;;  %v1258_v24 = vmul.f32 %v2828_v60, %v1142_v36 }
 0x248   :  { %v1124_v0 = vpop.f32.mrf.mxu2  ;;  %v1599_v46 = vmax.f32 %v1583_v62, 0.0  ;;  %v1501_v35 = vmul.f32 %v2852_v20, %v1142_v36 }
 0x249   :  { %v1125_v40 = vadd.f32 %v2813_v52, %v1124_v0  ;;  %v1516_v33 = vadd.f32 %v1500_v57, %v1467_v27  ;;  %v1273_v50 = vadd.f32 %v1257_v56, %v1224_v51  ;;  %v1419_v41 = vadd.f32 %v1403_v8, %v1370_v16 }
 0x24b   :  { %v1143_v1 = vmax.f32 %v1125_v40, 0.0  ;;  %v1565_v30 = vadd.f32 %v1549_v19, %v1516_v33  ;;  %v1322_v11 = vadd.f32 %v1306_v31, %v1273_v50 }
 0x24c   :  { %v1338_v59 = vld [vmem:[#allocation2 + $0x100] sm:$0xff] }
 0x24d   :  { %1159 = vst [vmem:[#allocation2 + $0x111] sm:$0xff] %v1143_v1  ;;  %v1176_v44 = vmul.f32 %v2821_v5, %v1143_v1  ;;  %v1209_v9 = vmul.f32 %v1338_v59, %v2818_v61  ;;  %v1355_v29 = vmul.f32 %v2837_v53, %v1338_v59  ;;  %v1584_v49 = vadd.f32 %v2872_v26, %v1565_v30  ;;  %v1290_v14 = vld [vmem:[#allocation2 + $0x102] sm:$0xff] }
 0x24e   :  { %v1452_v10 = vmul.f32 %v2847_v38, %v1338_v59  ;;  %v1404_v0 = vmul.f32 %v2843_v63, %v1290_v14  ;;  %v1307_v57 = vmul.f32 %v2834_v39, %v1290_v14  ;;  %v1550_v36 = vmul.f32 %v2859_v45, %v1290_v14  ;;  %v1487_v14 = vld [vmem:[#allocation2 + $0x131] sm:$0xff] }
 0x24f   :  { %v1225_v17 = vadd.f32 %v1209_v9, %v1176_v44  ;;  %v1600_v28 = vmax.f32 %v1584_v49, 0.0  ;;  %v1371_v22 = vadd.f32 %v1355_v29, %v1322_v11  ;;  %v1259_v62 = vmul.f32 %v2828_v60, %v1143_v1  ;;  %v1438_v11 = vld [vmem:[#allocation2 + $0x130] sm:$0xff] }
 0x250   :  { %v1126_v4 = vpop.f32.mrf.mxu2  ;;  %v1468_v54 = vadd.f32 %v1452_v10, %v1419_v41  ;;  %v1502_v8 = vmul.f32 %v2852_v20, %v1143_v1 }
 0x251   :  { %v1127_v6 = vadd.f32 %v2813_v52, %v1126_v4  ;;  %v1610_v47 = vpack.c.bf16 %v1600_v28, %v1599_v46  ;;  %v1274_v18 = vadd.f32 %v1258_v24, %v1225_v17  ;;  %v1420_v56 = vadd.f32 %v1404_v0, %v1371_v22 }
 0x252   :  { %v1517_v27 = vadd.f32 %v1501_v35, %v1468_v54  ;;  %v1455_v22 = vmul.f32 %v2847_v38, %v1438_v11  ;;  %v1504_v0 = vmul.f32 %v2852_v20, %v1487_v14 }
 0x253   :  { %v1144_v48 = vmax.f32 %v1127_v6, 0.0  ;;  %1697 = vmatmul.bf16.gmra.mxu3 %v1610_v47  ;;  %v1323_v59 = vadd.f32 %v1307_v57, %v1274_v18  ;;  %v1536_v18 = vld [vmem:[#allocation2 + $0x132] sm:$0xff] }
 0x254   :  { %v1339_v51 = vld [vmem:[#allocation2 + $0x110] sm:$0xff]  ;;  %v1566_v31 = vadd.f32 %v1550_v36, %v1517_v27 }
 0x255   :  { %1160 = vst [vmem:[#allocation2 + $0x121] sm:$0xff] %v1144_v48  ;;  %v1177_v40 = vmul.f32 %v2821_v5, %v1144_v48  ;;  %v1210_v52 = vmul.f32 %v1339_v51, %v2818_v61  ;;  %v1356_v16 = vmul.f32 %v2837_v53, %v1339_v51  ;;  %v1453_v33 = vmul.f32 %v2847_v38, %v1339_v51  ;;  %v1291_v50 = vld [vmem:[#allocation2 + $0x112] sm:$0xff] }
 0x256   :  { %v1551_v61 = vmul.f32 %v2859_v45, %v1291_v50  ;;  %v1308_v29 = vmul.f32 %v2834_v39, %v1291_v50  ;;  %v1585_v10 = vadd.f32 %v2872_v26, %v1566_v31  ;;  %v1405_v60 = vmul.f32 %v2843_v63, %v1291_v50 }
 0x257   :  { %v1226_v19 = vadd.f32 %v1210_v52, %v1177_v40  ;;  %v1469_v30 = vadd.f32 %v1453_v33, %v1420_v56  ;;  %v1372_v5 = vadd.f32 %v1356_v16, %v1323_v59  ;;  %v1553_v40 = vmul.f32 %v2859_v45, %v1536_v18 }
 0x258   :  { %v1601_v24 = vmax.f32 %v1585_v10, 0.0 }
 0x259   :  { %v1275_v44 = vadd.f32 %v1259_v62, %v1226_v19  ;;  %v1518_v9 = vadd.f32 %v1502_v8, %v1469_v30  ;;  %v1421_v54 = vadd.f32 %v1405_v60, %v1372_v5 }
 0x25b   :  { %v1567_v41 = vadd.f32 %v1551_v61, %v1518_v9  ;;  %v1324_v17 = vadd.f32 %v1308_v29, %v1275_v44 }
 0x25c   :  { %v1340_v49 = vld [vmem:[#allocation2 + $0x120] sm:$0xff] }
 0x25d   :  { %v1389_v46 = vld [vmem:[#allocation2 + $0x122] sm:$0xff]  ;;  %v1357_v4 = vmul.f32 %v2837_v53, %v1340_v49  ;;  %v1454_v1 = vmul.f32 %v2847_v38, %v1340_v49  ;;  %v1586_v28 = vadd.f32 %v2872_v26, %v1567_v41  ;;  %v1503_v53 = vmul.f32 %v2852_v20, %v1144_v48  ;;  %v3026_v20 = vld [vmem:[%s3096_s14] ss:$0 sm:$0xff]  ;;  %s2121_s14 = smov [#allocation11]  }
 0x25e   :  { %v1406_v39 = vmul.f32 %v2843_v63, %v1389_v46  ;;  %v1552_v63 = vmul.f32 %v2859_v45, %v1389_v46  ;;  %s1749_s24 = sshll.u32 %s2121_s14, 4  ;;  %s1750_s24 = int_to_ptr.vmem [resolvable:$true] %s1749_s24 }
 0x25f   :  { %v1373_v6 = vadd.f32 %v1357_v4, %v1324_v17  ;;  %v1602_v47 = vmax.f32 %v1586_v28, 0.0  ;;  %v1470_v35 = vadd.f32 %v1454_v1, %v1421_v54 }
 0x261   :  { %v1422_v51 = vadd.f32 %v1406_v39, %v1373_v6  ;;  %v1611_v27 = vpack.c.bf16 %v1602_v47, %v1601_v24  ;;  %v1519_v52 = vadd.f32 %v1503_v53, %v1470_v35 }
 0x263   :  { %v1471_v57 = vadd.f32 %v1455_v22, %v1422_v51  ;;  %1702 = vmatmul.bf16.gmra.mxu3 %v1611_v27  ;;  %v1568_v38 = vadd.f32 %v1552_v63, %v1519_v52 }
 0x265   :  { %v1520_v16 = vadd.f32 %v1504_v0, %v1471_v57  ;;  %v1587_v36 = vadd.f32 %v2872_v26, %v1568_v38 }
 0x267   :  { %v1569_v56 = vadd.f32 %v1553_v40, %v1520_v16  ;;  %v1603_v62 = vmax.f32 %v1587_v36, 0.0 }
 0x269   :  { %v1588_v33 = vadd.f32 %v2872_v26, %v1569_v56 }
 0x26b   :  { %v1604_v19 = vmax.f32 %v1588_v33, 0.0 }
 0x26d   :  { %v1612_v50 = vpack.c.bf16 %v1604_v19, %v1603_v62 }
 0x273   :  { %1707 = vmatmul.bf16.gmra.mxu3 %v1612_v50 }
 0x286   :  { %v1673_v48 = vpop.f32.mrf.mxu3 }
 0x287   :  { %v1674_v59 = vadd.f32 %v3026_v20, %v1673_v48 }
 0x289   :  { %v1713_v45 = vadd.f32 %v1674_v59, %v2681_v32 }
 0x28b   :  { %1729 = vst.msk [vmem:[#allocation11] sm:$0xff] %vm319_vm0, %v1713_v45 }
 0x28e   :  { %v1675_v30 = vpop.f32.mrf.mxu3 }
 0x28f   :  { %v1676_v8 = vadd.f32 %v3026_v20, %v1675_v30 }
 0x291   :  { %v1714_v26 = vadd.f32 %v1676_v8, %v2685_v34 }
 0x293   :  { %1730 = vst.msk [vmem:[#allocation11 + $0x8] sm:$0xff] %vm319_vm0, %v1714_v26 }
 0x296   :  { %v1678_v31 = vpop.f32.mrf.mxu3 }
 0x297   :  { %v1679_v44 = vadd.f32 %v3026_v20, %v1678_v31 }
 0x299   :  { %v1715_v5 = vadd.f32 %v1679_v44, %v2696_v37 }
 0x29b   :  { %1731 = vst.msk [vmem:[#allocation11 + $0x10] sm:$0xff] %vm319_vm0, %v1715_v5 }
 0x29e   :  { %v1680_v9 = vpop.f32.mrf.mxu3 }
 0x29f   :  { %v1681_v61 = vadd.f32 %v3026_v20, %v1680_v9 }
 0x2a1   :  { %v1716_v32 = vadd.f32 %v1681_v61, %v2700_v2 }
 0x2a3   :  { %1732 = vst.msk [vmem:[#allocation11 + $0x18] sm:$0xff] %vm319_vm0, %v1716_v32 }
 0x2a6   :  { %v1683_v29 = vpop.f32.mrf.mxu3 }
 0x2a7   :  { %v1684_v49 = vadd.f32 %v3026_v20, %v1683_v29 }
 0x2a9   :  { %v1717_v34 = vadd.f32 %v1684_v49, %v2711_v13 }
 0x2ab   :  { %1733 = vst.msk [vmem:[#allocation11 + $0x20] sm:$0xff] %vm319_vm0, %v1717_v34 }
 0x2ae   :  { %v1685_v41 = vpop.f32.mrf.mxu3 }
 0x2af   :  { %v1686_v10 = vadd.f32 %v3026_v20, %v1685_v41 }
 0x2b1   :  { %v1718_v37 = vadd.f32 %v1686_v10, %v2715_v58 }
 0x2b3   :  { %1734 = vst.msk [vmem:[#allocation11 + $0x28] sm:$0xff] %vm319_vm0, %v1718_v37 }
 0x2b6   :  { %v1688_v46 = vpop.f32.mrf.mxu3 }
 0x2b7   :  { %v1689_v60 = vadd.f32 %v3026_v20, %v1688_v46 }
 0x2b9   :  { %v1719_v2 = vadd.f32 %v1689_v60, %v2726_v43 }
 0x2bb   :  { %1735 = vst.msk [vmem:[#allocation11 + $0x30] sm:$0xff] %vm319_vm0, %v1719_v2 }
 0x2be   :  { %v1690_v11 = vpop.f32.mrf.mxu3 }
 0x2bf   :  { %v1691_v17 = vadd.f32 %v3026_v20, %v1690_v11 }
 0x2c1   :  { %v1720_v13 = vadd.f32 %v1691_v17, %v2730_v55 }
 0x2c3   :  { %1736 = vst.msk [vmem:[#allocation11 + $0x38] sm:$0xff] %vm319_vm0, %v1720_v13 }
 0x2c6   :  { %v1693_v4 = vpop.f32.mrf.mxu3 }
 0x2c7   :  { %v1694_v1 = vadd.f32 %v3026_v20, %v1693_v4 }
 0x2c9   :  { %v1721_v58 = vadd.f32 %v1694_v1, %v2741_v25 }
 0x2cb   :  { %1737 = vst.msk [vmem:[#allocation11 + $0x40] sm:$0xff] %vm319_vm0, %v1721_v58 }
 0x2ce   :  { %v1695_v28 = vpop.f32.mrf.mxu3 }
 0x2cf   :  { %v1696_v54 = vadd.f32 %v3026_v20, %v1695_v28 }
 0x2d1   :  { %v1722_v43 = vadd.f32 %v1696_v54, %v2745_v3 }
 0x2d3   :  { %1738 = vst.msk [vmem:[#allocation11 + $0x48] sm:$0xff] %vm319_vm0, %v1722_v43 }
 0x2d6   :  { %v1698_v14 = vpop.f32.mrf.mxu3 }
 0x2d7   :  { %v1699_v6 = vadd.f32 %v3026_v20, %v1698_v14 }
 0x2d9   :  { %v1723_v55 = vadd.f32 %v1699_v6, %v2756_v7 }
 0x2db   :  { %1739 = vst.msk [vmem:[#allocation11 + $0x50] sm:$0xff] %vm319_vm0, %v1723_v55 }
 0x2de   :  { %v1700_v39 = vpop.f32.mrf.mxu3 }
 0x2df   :  { %v1701_v22 = vadd.f32 %v3026_v20, %v1700_v39 }
 0x2e1   :  { %v1724_v25 = vadd.f32 %v1701_v22, %v2760_v23 }
 0x2e3   :  { %1740 = vst.msk [vmem:[#allocation11 + $0x58] sm:$0xff] %vm319_vm0, %v1724_v25 }
 0x2e6   :  { %v1703_v24 = vpop.f32.mrf.mxu3 }
 0x2e7   :  { %v1704_v47 = vadd.f32 %v3026_v20, %v1703_v24 }
 0x2e9   :  { %v1725_v3 = vadd.f32 %v1704_v47, %v2771_v12 }
 0x2eb   :  { %1741 = vst.msk [vmem:[#allocation11 + $0x60] sm:$0xff] %vm319_vm0, %v1725_v3 }
 0x2ee   :  { %v1705_v35 = vpop.f32.mrf.mxu3 }
 0x2ef   :  { %v1706_v18 = vadd.f32 %v3026_v20, %v1705_v35 }
 0x2f1   :  { %v1726_v7 = vadd.f32 %v1706_v18, %v2775_v15 }
 0x2f3   :  { %1742 = vst.msk [vmem:[#allocation11 + $0x68] sm:$0xff] %vm319_vm0, %v1726_v7 }
 0x2f6   :  { %v1708_v51 = vpop.f32.mrf.mxu3 }
 0x2f7   :  { %v1709_v0 = vadd.f32 %v3026_v20, %v1708_v51 }
 0x2f9   :  { %v1727_v23 = vadd.f32 %v1709_v0, %v2786_v21 }
 0x2fb   :  { %1743 = vst.msk [vmem:[#allocation11 + $0x70] sm:$0xff] %vm319_vm0, %v1727_v23 }
 0x2fe   :  { %v1710_v27 = vpop.f32.mrf.mxu3 }
 0x2ff   :  { %v1711_v12 = vadd.f32 %v3026_v20, %v1710_v27 }
 0x301   :  { %v1728_v15 = vadd.f32 %v1711_v12, %v2790_v42 }
 0x303   :  { %1744 = vst.msk [vmem:[#allocation11 + $0x78] sm:$0xff] %vm319_vm0, %v1728_v15 }
 0x304   :  { %1757 = dma.vmem_to_hbm [thread:$0]  %s1750_s24, 2048, %s1752_s6, [#allocation5], %s3118_s25, %s3118_s25, %s2112_s27  }
 0x305   :  { %2108 = dma.done.wait [#allocation5], 2048  }
 0x306   :  { %2109 = vsyncadd [#allocation5], 4294965248 }
 0x307   :  { %1762 = vsyncpa [#allocation4], 1 }
 0x308   :  { %1763 = vsyncpa [#allocation7], 1 }
 0x309   :  { %1764 = vsyncpa [#allocation10], 1 }
 0x30a   :  { %1765 = vsyncpa [#allocation5], 1 }

</bundles_post_ra>
